<compile_context>
chip_gen: v7x
topology: tpu7x:2x2x1
jax: 0.10.0
libtpu: 0.0.40
codegen_flags: <defaults>
</compile_context>

<pallas_src>
import functools

import jax
import jax.numpy as jnp
from jax.experimental import pallas as pl
from jax.experimental.pallas import tpu as pltpu

# ----------------------------- model constants -----------------------------

C4, C5, C2D, CSHR = 16, 32, 32, 32
NUM_CLASSES_PER_HEAD = (1, 2)
NHM = sum(NUM_CLASSES_PER_HEAD)                       # fused heatmap channels (3)
REG_BRANCHES = (("center", 2), ("center_z", 1), ("dim", 3), ("rot", 2))
REG_DIM = sum(d for _, d in REG_BRANCHES)             # 8 regression columns per head


# --------------------------------------------------------------------------
# Fused per-batch kernel: conv5 + backbone_2d + shared conv + heatmaps
# --------------------------------------------------------------------------


def _fused_dense_head_kernel(x4_ref, s2d_ref,
                             w5_ref, b5_ref, w4_ref, b4_ref, wb5_ref, bb5_ref,
                             wsa_ref, wsb_ref, bs_ref, whm_ref, bhm_ref,
                             shr_ref, hm_ref, *, H, W):
    f32 = jnp.float32
    bf16 = jnp.bfloat16
    Hs, Ws = H // 2, W // 2

    def pad2d(x, top, bottom, left, right):
        # SAME padding built in-kernel by concatenating zero blocks (no HBM pad copy).
        h, w, c = x.shape
        if top or bottom:
            parts = ([jnp.zeros((top, w, c), x.dtype)] if top else []) + [x] + \
                    ([jnp.zeros((bottom, w, c), x.dtype)] if bottom else [])
            x = jnp.concatenate(parts, axis=0)
            h = h + top + bottom
        if left or right:
            parts = ([jnp.zeros((h, left, c), x.dtype)] if left else []) + [x] + \
                    ([jnp.zeros((h, right, c), x.dtype)] if right else [])
            x = jnp.concatenate(parts, axis=1)
        return x

    def im2col(xp, k, ho, wo):
        # Full k*k-tap im2col slab in VMEM -> one deep-K MXU matmul per conv.
        c = xp.shape[-1]
        cols = []
        for i in range(k):
            for j in range(k):
                cols.append(xp[i:i + ho, j:j + wo, :].reshape(ho * wo, c))
        return jnp.concatenate(cols, axis=-1)          # [ho*wo, k*k*c]

    # ---- backbone_3d.forward_dense: conv5 (3x3 / stride 2) as a 2x2 conv on the ----
    # ---- space-to-depth input (weight remapped on the host), K = 256            ----
    s2dp = pad2d(s2d_ref[...], 1, 0, 1, 0)                                  # [Hs+1, Ws+1, 4*C4]
    p5 = im2col(s2dp, 2, Hs, Ws)                                            # [Hs*Ws, 256]
    x5 = jnp.maximum(jnp.dot(p5, w5_ref[...], preferred_element_type=f32)
                     + b5_ref[...], 0.0)                                    # [Hs*Ws, C5]

    # ---- backbone_2d block on x_conv4: 3x3 s1 + ReLU, K = 144 ----
    x4p = pad2d(x4_ref[...], 1, 1, 1, 1)                                    # [H+2, W+2, C4]
    p4 = im2col(x4p, 3, H, W)                                               # [H*W, 144]
    f4 = jnp.maximum(jnp.dot(p4, w4_ref[...], preferred_element_type=f32)
                     + b4_ref[...], 0.0)                                    # [H*W, C2D]

    # ---- backbone_2d block on x_conv5: 3x3 s1 + ReLU (K = 288), nearest 2x upsample ----
    x5p = pad2d(x5.astype(bf16).reshape(Hs, Ws, C5), 1, 1, 1, 1)            # [Hs+2, Ws+2, C5]
    pb5 = im2col(x5p, 3, Hs, Ws)                                            # [Hs*Ws, 288]
    f5 = jnp.maximum(jnp.dot(pb5, wb5_ref[...], preferred_element_type=f32)
                     + bb5_ref[...], 0.0)                                   # [Hs*Ws, C2D]
    f5 = f5.astype(bf16).reshape(Hs, Ws, C2D)
    f5 = jnp.stack([f5, f5], axis=2).reshape(Hs, W, C2D)                    # nearest up (W)
    f5u = jnp.stack([f5, f5], axis=1).reshape(H, W, C2D)                    # nearest up (H)

    # ---- dense_head shared 3x3 conv on concat([f4, f5_up]) + ReLU ----
    # concat folded away: the [3,3,64,32] weight was split into two transposed halves and
    # each half is contracted (A @ B^T style, lane-dim contraction) against its im2col.
    f4p = pad2d(f4.astype(bf16).reshape(H, W, C2D), 1, 1, 1, 1)             # [H+2, W+2, C2D]
    ct = (((1,), (1,)), ((), ()))                                           # contract last dims
    shr_t = jax.lax.dot_general(wsa_ref[...], im2col(f4p, 3, H, W), ct,
                                preferred_element_type=f32)                 # [CSHR, H*W]
    f5up = pad2d(f5u, 1, 1, 1, 1)
    shr_t = shr_t + jax.lax.dot_general(wsb_ref[...], im2col(f5up, 3, H, W), ct,
                                        preferred_element_type=f32)
    shr_t = jnp.maximum(shr_t + bs_ref[...], 0.0)                           # [CSHR, H*W]
    shr_ref[...] = shr_t                                                    # lane-dense store

    # ---- fused per-head 1x1 heatmap convs + sigmoid, emitted pre-transposed ----
    hm_t = jnp.dot(whm_ref[...], shr_t.astype(bf16),
                   preferred_element_type=f32) + bhm_ref[...]               # [NHM, H*W]
    hm_ref[...] = jax.nn.sigmoid(hm_t)                                      # lane-dense store


def fused_dense_path(p, x4, x4s2d):
    """One pallas_call for the whole dense path of one forward (grid over batch)."""
    B, H, W, _ = x4.shape
    weights = [p["w5"], p["b5"], p["w4"], p["b4"], p["wb5"], p["bb5"],
               p["wsa_t"], p["wsb_t"], p["bs"], p["whm_t"], p["bhm"]]

    def bcast_spec(a):
        nd = a.ndim
        return pl.BlockSpec(a.shape, lambda b, _nd=nd: (0,) * _nd)

    # TODO(synk): for v7x with B == 1, add a second "parallel" grid axis over H halves
    # (1-row halo) so both TensorCores are fed; with B >= 2 each core gets a batch elem.
    shr_t, hm = pl.pallas_call(
        functools.partial(_fused_dense_head_kernel, H=H, W=W),
        out_shape=(jax.ShapeDtypeStruct((B, CSHR, H * W), jnp.float32),
                   jax.ShapeDtypeStruct((B, NHM, H * W), jnp.float32)),
        grid=(B,),
        in_specs=[pl.BlockSpec((None, H, W, C4), lambda b: (b, 0, 0, 0)),
                  pl.BlockSpec((None, H // 2, W // 2, 4 * C4), lambda b: (b, 0, 0, 0))]
                 + [bcast_spec(a) for a in weights],
        out_specs=(pl.BlockSpec((None, CSHR, H * W), lambda b: (b, 0, 0)),
                   pl.BlockSpec((None, NHM, H * W), lambda b: (b, 0, 0))),
        compiler_params=pltpu.CompilerParams(dimension_semantics=("parallel",)),
    )(x4, x4s2d, *weights)
    return shr_t, hm


# ----------------------------- parameter init ------------------------------


def init_params(key):
    ks = iter(jax.random.split(key, 64))

    def w(shape, scale=0.1):
        return (scale * jax.random.normal(next(ks), shape)).astype(jnp.float32)

    return {
        # backbone_3d.forward_dense (dense conv5 block): 3x3 stride-2
        "conv5_w": w((3, 3, C4, C5)), "conv5_b": w((C5,), 0.01),
        # backbone_2d per-scale blocks
        "b2d4_w": w((3, 3, C4, C2D)), "b2d4_b": w((C2D,), 0.01),
        "b2d5_w": w((3, 3, C5, C2D)), "b2d5_b": w((C2D,), 0.01),
        # dense_head shared conv on concatenated features (2*C2D -> CSHR)
        "shr_w": w((3, 3, 2 * C2D, CSHR)), "shr_b": w((CSHR,), 0.01),
        # per-head 1x1 heatmap convs
        "hm_w": [w((CSHR, nc)) for nc in NUM_CLASSES_PER_HEAD],
        "hm_b": [w((nc,), 0.01) for nc in NUM_CLASSES_PER_HEAD],
        # per-head regression branches (1x1 convs on sliced features == linears)
        "reg_w": [{name: w((CSHR, dim)) for name, dim in REG_BRANCHES}
                  for _ in NUM_CLASSES_PER_HEAD],
        "reg_b": [{name: w((dim,), 0.01) for name, dim in REG_BRANCHES}
                  for _ in NUM_CLASSES_PER_HEAD],
    }


def prepare_params(params):
    """One-time weight prep (reshape / cast / concat / conv5 remap) outside the jit."""
    bf = lambda t: jnp.asarray(t, jnp.bfloat16)
    f32 = lambda t: jnp.asarray(t, jnp.float32)

    # conv5 (3x3, stride 2, pad 1) -> equivalent 2x2 stride-1 conv on the 2x2
    # space-to-depth input.  Tap i in {0,1,2} maps to (ki, dy): 0->(0,1), 1->(1,0), 2->(1,1).
    w5 = params["conv5_w"]                                            # [3,3,C4,C5]
    w5_eq = jnp.zeros((2, 2, 2, 2, C4, C5), w5.dtype)                 # [ki,kj,dy,dx,cin,cout]
    for i in range(3):
        ki, dy = (0, 1) if i == 0 else (1, i - 1)
        for j in range(3):
            kj, dx = (0, 1) if j == 0 else (1, j - 1)
            w5_eq = w5_eq.at[ki, kj, dy, dx].set(w5[i, j])

    shr_w = params["shr_w"]                                           # [3,3,2*C2D,CSHR]
    wsa_t = shr_w[:, :, :C2D, :].reshape(9 * C2D, CSHR).T             # [CSHR, 288] (f4 half)
    wsb_t = shr_w[:, :, C2D:, :].reshape(9 * C2D, CSHR).T             # [CSHR, 288] (f5_up half)

    hm_w_cat = jnp.concatenate(params["hm_w"], axis=1)                # [CSHR, NHM]
    hm_b_cat = jnp.concatenate(params["hm_b"])                        # [NHM]

    n_heads = len(NUM_CLASSES_PER_HEAD)
    reg_w_stack = jnp.stack(
        [jnp.concatenate([params["reg_w"][h][n] for n, _ in REG_BRANCHES], axis=1)
         for h in range(n_heads)])                                    # [nh, CSHR, 8]
    reg_b_stack = jnp.stack(
        [jnp.concatenate([params["reg_b"][h][n] for n, _ in REG_BRANCHES])
         for h in range(n_heads)])                                    # [nh, 8]

    return {
        "w5": bf(w5_eq.reshape(16 * C4, C5)),
        "b5": f32(params["conv5_b"]).reshape(1, C5),
        "w4": bf(params["b2d4_w"].reshape(9 * C4, C2D)),
        "b4": f32(params["b2d4_b"]).reshape(1, C2D),
        "wb5": bf(params["b2d5_w"].reshape(9 * C5, C2D)),
        "bb5": f32(params["b2d5_b"]).reshape(1, C2D),
        "wsa_t": bf(wsa_t), "wsb_t": bf(wsb_t),
        "bs": f32(params["shr_b"]).reshape(CSHR, 1),
        "whm_t": bf(hm_w_cat.T),                                      # [NHM, CSHR]
        "bhm": f32(hm_b_cat).reshape(NHM, 1),
        "reg_w": f32(reg_w_stack), "reg_b": f32(reg_b_stack),
    }


# ------------------------------ full forward -------------------------------


def dense_convs_pipeline_forward(prepped, x_conv4_nchw, K=8):
    # boundary transpose: NCHW (PyTorch) -> NHWC bf16 (kernel layout, half the DMA bytes)
    x4 = jnp.transpose(x_conv4_nchw, (0, 2, 3, 1)).astype(jnp.bfloat16)
    B, H, W, _ = x4.shape
    assert H % 2 == 0 and W % 2 == 0
    HW = H * W

    # space-to-depth view of x_conv4 for the folded stride-2 conv5 (one XLA transpose)
    x4s2d = x4.reshape(B, H // 2, 2, W // 2, 2, C4).transpose(0, 1, 3, 2, 4, 5) \
              .reshape(B, H // 2, W // 2, 4 * C4)

    # ONE fused Pallas kernel: conv5, backbone_2d, upsample+concat, shared conv, heatmaps
    shr_t, hm = fused_dense_path(prepped, x4, x4s2d)
    # shr_t: [B, CSHR, HW] (channel-major, lane-dense) / hm: [B, NHM, HW] (sigmoided)

    # dense_head.forward_topk_trt (per head, on its class slice of the fused heatmap)
    # TODO(synk): no local-max / max-pool NMS before top-k; add it if the reference
    # forward_topk_trt suppresses non-peak pixels.
    topk_outputs = []
    c0 = 0
    for nc in NUM_CLASSES_PER_HEAD:
        flat = hm[:, c0:c0 + nc, :].reshape(B, nc * HW)
        scores, inds = jax.lax.top_k(flat, K)
        labels = (inds // HW).astype(jnp.int32)
        rem = inds % HW
        ys = (rem // W).astype(jnp.float32)
        xs = (rem % W).astype(jnp.float32)
        topk_outputs.append((scores, labels, ys, xs))
        c0 += nc

    # dense_head.slice_shr_conv_outp: gather shared-conv features at the top-k locations
    sliced = []
    for (_, _, ys, xs) in topk_outputs:
        idx = ys.astype(jnp.int32) * W + xs.astype(jnp.int32)                # [B, K]
        idx = jnp.broadcast_to(idx[:, None, :], (B, CSHR, K))
        sliced.append(jnp.take_along_axis(shr_t, idx, axis=2))               # [B, CSHR, K]
    a = jnp.stack(sliced, axis=0)                                            # [nh, B, C, K]

    # dense_head.forward_sliced_inp_trt: all heads x all regression branches as one
    # batched XLA einsum (a Pallas launch costs more than these ~16 KFLOP).
    reg = jnp.einsum("hbck,hcd->hbkd", a, prepped["reg_w"]) \
        + prepped["reg_b"][:, None, None, :]                                 # [nh, B, K, 8]

    outputs = []
    for h in range(len(NUM_CLASSES_PER_HEAD)):
        off = 0
        for _, dim in REG_BRANCHES:
            outputs.append(reg[h, :, :, off:off + dim])                      # [B, K, dim]
            off += dim

    # append every top-k output (scores, labels, ys, xs per head), as in the module
    for topk_output in topk_outputs:
        outputs += list(topk_output)
    return outputs


# ---------------------------------- main -----------------------------------

if __name__ == "__main__":
    key = jax.random.PRNGKey(0)
    k_param, k_x = jax.random.split(key)
    params = init_params(k_param)
    prepped = prepare_params(params)      # one-time weight prep, outside the jit

    # x_conv4 in NCHW: [batch=2, C4=16, H=16, W=16]
    # TODO(synk): backbone_3d.forward_dense is modelled as one 3x3/s2 conv + ReLU and the
    # backbone_2d deblock as nearest 2x upsampling; swap in the real weights/ops if the
    # deployed config differs.
    x_conv4 = jax.random.normal(k_x, (2, C4, 16, 16), dtype=jnp.float32)

    fwd = jax.jit(functools.partial(dense_convs_pipeline_forward, K=8))
    outputs = fwd(prepped, x_conv4)
    jax.block_until_ready(outputs)
    print("KERNEL_OK")
</pallas_src>

<mosaic_0001>
module attributes {stable_mosaic.version = 11 : i64} {
  func.func @_fused_dense_head_kernel(%arg0: i32, %arg1: memref<1x16x16x16xbf16, #tpu.memory_space<vmem>>, %arg2: memref<1x8x8x64xbf16, #tpu.memory_space<vmem>>, %arg3: memref<256x32xbf16, #tpu.memory_space<vmem>>, %arg4: memref<1x32xf32, #tpu.memory_space<vmem>>, %arg5: memref<144x32xbf16, #tpu.memory_space<vmem>>, %arg6: memref<1x32xf32, #tpu.memory_space<vmem>>, %arg7: memref<288x32xbf16, #tpu.memory_space<vmem>>, %arg8: memref<1x32xf32, #tpu.memory_space<vmem>>, %arg9: memref<32x288xbf16, #tpu.memory_space<vmem>>, %arg10: memref<32x288xbf16, #tpu.memory_space<vmem>>, %arg11: memref<32x1xf32, #tpu.memory_space<vmem>>, %arg12: memref<3x32xbf16, #tpu.memory_space<vmem>>, %arg13: memref<3x1xf32, #tpu.memory_space<vmem>>, %arg14: memref<1x32x256xf32, #tpu.memory_space<vmem>>, %arg15: memref<1x3x256xf32, #tpu.memory_space<vmem>>) attributes {dimension_semantics = [#tpu.dimension_semantics<parallel>], iteration_bounds = array<i64: 2>, scalar_prefetch = 0 : i64, scratch_operands = 0 : i64, tpu.core_type = #tpu.core_type<tc>, window_params = [{transform_indices = @transform_0, window_bounds = array<i64: 1, 16, 16, 16>}, {transform_indices = @transform_1, window_bounds = array<i64: 1, 8, 8, 64>}, {pipeline_mode = #tpu.pipeline_mode<synchronous>, transform_indices = @transform_2, window_bounds = array<i64: 256, 32>}, {pipeline_mode = #tpu.pipeline_mode<synchronous>, transform_indices = @transform_3, window_bounds = array<i64: 1, 32>}, {pipeline_mode = #tpu.pipeline_mode<synchronous>, transform_indices = @transform_4, window_bounds = array<i64: 144, 32>}, {pipeline_mode = #tpu.pipeline_mode<synchronous>, transform_indices = @transform_5, window_bounds = array<i64: 1, 32>}, {pipeline_mode = #tpu.pipeline_mode<synchronous>, transform_indices = @transform_6, window_bounds = array<i64: 288, 32>}, {pipeline_mode = #tpu.pipeline_mode<synchronous>, transform_indices = @transform_7, window_bounds = array<i64: 1, 32>}, {pipeline_mode = #tpu.pipeline_mode<synchronous>, transform_indices = @transform_8, window_bounds = array<i64: 32, 288>}, {pipeline_mode = #tpu.pipeline_mode<synchronous>, transform_indices = @transform_9, window_bounds = array<i64: 32, 288>}, {pipeline_mode = #tpu.pipeline_mode<synchronous>, transform_indices = @transform_10, window_bounds = array<i64: 32, 1>}, {pipeline_mode = #tpu.pipeline_mode<synchronous>, transform_indices = @transform_11, window_bounds = array<i64: 3, 32>}, {pipeline_mode = #tpu.pipeline_mode<synchronous>, transform_indices = @transform_12, window_bounds = array<i64: 3, 1>}, {transform_indices = @transform_13, window_bounds = array<i64: 1, 32, 256>}, {transform_indices = @transform_14, window_bounds = array<i64: 1, 3, 256>}]} {
    %c0 = arith.constant 0 : index
    %c0_0 = arith.constant 0 : index
    %c0_1 = arith.constant 0 : index
    %c0_2 = arith.constant 0 : index
    %0 = vector.load %arg2[%c0, %c0_0, %c0_1, %c0_2] : memref<1x8x8x64xbf16, #tpu.memory_space<vmem>>, vector<1x8x8x64xbf16>
    %1 = vector.shape_cast %0 : vector<1x8x8x64xbf16> to vector<8x8x64xbf16>
    %cst = arith.constant 0.000000e+00 : bf16
    %2 = vector.broadcast %cst : bf16 to vector<1x8x64xbf16>
    %3 = tpu.concatenate %2, %1 in 0 : vector<1x8x64xbf16>, vector<8x8x64xbf16> -> vector<9x8x64xbf16>
    %cst_3 = arith.constant 0.000000e+00 : bf16
    %4 = vector.broadcast %cst_3 : bf16 to vector<9x1x64xbf16>
    %5 = tpu.concatenate %4, %3 in 1 : vector<9x1x64xbf16>, vector<9x8x64xbf16> -> vector<9x9x64xbf16>
    %6 = vector.extract_strided_slice %5 {offsets = [0, 0, 0], sizes = [8, 8, 64], strides = [1, 1, 1]} : vector<9x9x64xbf16> to vector<8x8x64xbf16>
    %7 = vector.shape_cast %6 : vector<8x8x64xbf16> to vector<64x64xbf16>
    %8 = vector.extract_strided_slice %5 {offsets = [0, 1, 0], sizes = [8, 8, 64], strides = [1, 1, 1]} : vector<9x9x64xbf16> to vector<8x8x64xbf16>
    %9 = vector.shape_cast %8 : vector<8x8x64xbf16> to vector<64x64xbf16>
    %10 = vector.extract_strided_slice %5 {offsets = [1, 0, 0], sizes = [8, 8, 64], strides = [1, 1, 1]} : vector<9x9x64xbf16> to vector<8x8x64xbf16>
    %11 = vector.shape_cast %10 : vector<8x8x64xbf16> to vector<64x64xbf16>
    %12 = vector.extract_strided_slice %5 {offsets = [1, 1, 0], sizes = [8, 8, 64], strides = [1, 1, 1]} : vector<9x9x64xbf16> to vector<8x8x64xbf16>
    %13 = vector.shape_cast %12 : vector<8x8x64xbf16> to vector<64x64xbf16>
    %14 = tpu.concatenate %7, %9, %11, %13 in 1 : vector<64x64xbf16>, vector<64x64xbf16>, vector<64x64xbf16>, vector<64x64xbf16> -> vector<64x256xbf16>
    %c0_4 = arith.constant 0 : index
    %c0_5 = arith.constant 0 : index
    %15 = vector.load %arg3[%c0_4, %c0_5] : memref<256x32xbf16, #tpu.memory_space<vmem>>, vector<256x32xbf16>
    %cst_6 = arith.constant dense<0.000000e+00> : vector<64x32xf32>
    %16 = tpu.matmul %14, %15, %cst_6 {dimension_numbers = #tpu.dot_dimension_numbers<[1], [0], [0], [1], [0, 0, 1, 1], [], []>} : vector<64x256xbf16>, vector<256x32xbf16>, vector<64x32xf32> -> vector<64x32xf32>
    %c0_7 = arith.constant 0 : index
    %c0_8 = arith.constant 0 : index
    %17 = vector.load %arg4[%c0_7, %c0_8] : memref<1x32xf32, #tpu.memory_space<vmem>>, vector<1x32xf32>
    %18 = vector.broadcast %17 : vector<1x32xf32> to vector<64x32xf32>
    %19 = arith.addf %16, %18 : vector<64x32xf32>
    %cst_9 = arith.constant 0.000000e+00 : f32
    %20 = vector.broadcast %cst_9 : f32 to vector<64x32xf32>
    %21 = arith.maximumf %19, %20 : vector<64x32xf32>
    %c0_10 = arith.constant 0 : index
    %c0_11 = arith.constant 0 : index
    %c0_12 = arith.constant 0 : index
    %c0_13 = arith.constant 0 : index
    %22 = vector.load %arg1[%c0_10, %c0_11, %c0_12, %c0_13] : memref<1x16x16x16xbf16, #tpu.memory_space<vmem>>, vector<1x16x16x16xbf16>
    %23 = vector.shape_cast %22 : vector<1x16x16x16xbf16> to vector<16x16x16xbf16>
    %cst_14 = arith.constant 0.000000e+00 : bf16
    %24 = vector.broadcast %cst_14 : bf16 to vector<1x16x16xbf16>
    %cst_15 = arith.constant 0.000000e+00 : bf16
    %25 = vector.broadcast %cst_15 : bf16 to vector<1x16x16xbf16>
    %26 = tpu.concatenate %24, %23, %25 in 0 : vector<1x16x16xbf16>, vector<16x16x16xbf16>, vector<1x16x16xbf16> -> vector<18x16x16xbf16>
    %cst_16 = arith.constant 0.000000e+00 : bf16
    %27 = vector.broadcast %cst_16 : bf16 to vector<18x1x16xbf16>
    %cst_17 = arith.constant 0.000000e+00 : bf16
    %28 = vector.broadcast %cst_17 : bf16 to vector<18x1x16xbf16>
    %29 = tpu.concatenate %27, %26, %28 in 1 : vector<18x1x16xbf16>, vector<18x16x16xbf16>, vector<18x1x16xbf16> -> vector<18x18x16xbf16>
    %30 = vector.extract_strided_slice %29 {offsets = [0, 0, 0], sizes = [16, 16, 16], strides = [1, 1, 1]} : vector<18x18x16xbf16> to vector<16x16x16xbf16>
    %31 = vector.shape_cast %30 : vector<16x16x16xbf16> to vector<256x16xbf16>
    %32 = vector.extract_strided_slice %29 {offsets = [0, 1, 0], sizes = [16, 16, 16], strides = [1, 1, 1]} : vector<18x18x16xbf16> to vector<16x16x16xbf16>
    %33 = vector.shape_cast %32 : vector<16x16x16xbf16> to vector<256x16xbf16>
    %34 = vector.extract_strided_slice %29 {offsets = [0, 2, 0], sizes = [16, 16, 16], strides = [1, 1, 1]} : vector<18x18x16xbf16> to vector<16x16x16xbf16>
    %35 = vector.shape_cast %34 : vector<16x16x16xbf16> to vector<256x16xbf16>
    %36 = vector.extract_strided_slice %29 {offsets = [1, 0, 0], sizes = [16, 16, 16], strides = [1, 1, 1]} : vector<18x18x16xbf16> to vector<16x16x16xbf16>
    %37 = vector.shape_cast %36 : vector<16x16x16xbf16> to vector<256x16xbf16>
    %38 = vector.extract_strided_slice %29 {offsets = [1, 1, 0], sizes = [16, 16, 16], strides = [1, 1, 1]} : vector<18x18x16xbf16> to vector<16x16x16xbf16>
    %39 = vector.shape_cast %38 : vector<16x16x16xbf16> to vector<256x16xbf16>
    %40 = vector.extract_strided_slice %29 {offsets = [1, 2, 0], sizes = [16, 16, 16], strides = [1, 1, 1]} : vector<18x18x16xbf16> to vector<16x16x16xbf16>
    %41 = vector.shape_cast %40 : vector<16x16x16xbf16> to vector<256x16xbf16>
    %42 = vector.extract_strided_slice %29 {offsets = [2, 0, 0], sizes = [16, 16, 16], strides = [1, 1, 1]} : vector<18x18x16xbf16> to vector<16x16x16xbf16>
    %43 = vector.shape_cast %42 : vector<16x16x16xbf16> to vector<256x16xbf16>
    %44 = vector.extract_strided_slice %29 {offsets = [2, 1, 0], sizes = [16, 16, 16], strides = [1, 1, 1]} : vector<18x18x16xbf16> to vector<16x16x16xbf16>
    %45 = vector.shape_cast %44 : vector<16x16x16xbf16> to vector<256x16xbf16>
    %46 = vector.extract_strided_slice %29 {offsets = [2, 2, 0], sizes = [16, 16, 16], strides = [1, 1, 1]} : vector<18x18x16xbf16> to vector<16x16x16xbf16>
    %47 = vector.shape_cast %46 : vector<16x16x16xbf16> to vector<256x16xbf16>
    %48 = tpu.concatenate %31, %33, %35, %37, %39, %41, %43, %45, %47 in 1 : vector<256x16xbf16>, vector<256x16xbf16>, vector<256x16xbf16>, vector<256x16xbf16>, vector<256x16xbf16>, vector<256x16xbf16>, vector<256x16xbf16>, vector<256x16xbf16>, vector<256x16xbf16> -> vector<256x144xbf16>
    %c0_18 = arith.constant 0 : index
    %c0_19 = arith.constant 0 : index
    %49 = vector.load %arg5[%c0_18, %c0_19] : memref<144x32xbf16, #tpu.memory_space<vmem>>, vector<144x32xbf16>
    %cst_20 = arith.constant dense<0.000000e+00> : vector<256x32xf32>
    %50 = tpu.matmul %48, %49, %cst_20 {dimension_numbers = #tpu.dot_dimension_numbers<[1], [0], [0], [1], [0, 0, 1, 1], [], []>} : vector<256x144xbf16>, vector<144x32xbf16>, vector<256x32xf32> -> vector<256x32xf32>
    %c0_21 = arith.constant 0 : index
    %c0_22 = arith.constant 0 : index
    %51 = vector.load %arg6[%c0_21, %c0_22] : memref<1x32xf32, #tpu.memory_space<vmem>>, vector<1x32xf32>
    %52 = vector.broadcast %51 : vector<1x32xf32> to vector<256x32xf32>
    %53 = arith.addf %50, %52 : vector<256x32xf32>
    %cst_23 = arith.constant 0.000000e+00 : f32
    %54 = vector.broadcast %cst_23 : f32 to vector<256x32xf32>
    %55 = arith.maximumf %53, %54 : vector<256x32xf32>
    %56 = arith.truncf %21 : vector<64x32xf32> to vector<64x32xbf16>
    %57 = vector.shape_cast %56 : vector<64x32xbf16> to vector<8x8x32xbf16>
    %cst_24 = arith.constant 0.000000e+00 : bf16
    %58 = vector.broadcast %cst_24 : bf16 to vector<1x8x32xbf16>
    %cst_25 = arith.constant 0.000000e+00 : bf16
    %59 = vector.broadcast %cst_25 : bf16 to vector<1x8x32xbf16>
    %60 = tpu.concatenate %58, %57, %59 in 0 : vector<1x8x32xbf16>, vector<8x8x32xbf16>, vector<1x8x32xbf16> -> vector<10x8x32xbf16>
    %cst_26 = arith.constant 0.000000e+00 : bf16
    %61 = vector.broadcast %cst_26 : bf16 to vector<10x1x32xbf16>
    %cst_27 = arith.constant 0.000000e+00 : bf16
    %62 = vector.broadcast %cst_27 : bf16 to vector<10x1x32xbf16>
    %63 = tpu.concatenate %61, %60, %62 in 1 : vector<10x1x32xbf16>, vector<10x8x32xbf16>, vector<10x1x32xbf16> -> vector<10x10x32xbf16>
    %64 = vector.extract_strided_slice %63 {offsets = [0, 0, 0], sizes = [8, 8, 32], strides = [1, 1, 1]} : vector<10x10x32xbf16> to vector<8x8x32xbf16>
    %65 = vector.shape_cast %64 : vector<8x8x32xbf16> to vector<64x32xbf16>
    %66 = vector.extract_strided_slice %63 {offsets = [0, 1, 0], sizes = [8, 8, 32], strides = [1, 1, 1]} : vector<10x10x32xbf16> to vector<8x8x32xbf16>
    %67 = vector.shape_cast %66 : vector<8x8x32xbf16> to vector<64x32xbf16>
    %68 = vector.extract_strided_slice %63 {offsets = [0, 2, 0], sizes = [8, 8, 32], strides = [1, 1, 1]} : vector<10x10x32xbf16> to vector<8x8x32xbf16>
    %69 = vector.shape_cast %68 : vector<8x8x32xbf16> to vector<64x32xbf16>
    %70 = vector.extract_strided_slice %63 {offsets = [1, 0, 0], sizes = [8, 8, 32], strides = [1, 1, 1]} : vector<10x10x32xbf16> to vector<8x8x32xbf16>
    %71 = vector.shape_cast %70 : vector<8x8x32xbf16> to vector<64x32xbf16>
    %72 = vector.extract_strided_slice %63 {offsets = [1, 1, 0], sizes = [8, 8, 32], strides = [1, 1, 1]} : vector<10x10x32xbf16> to vector<8x8x32xbf16>
    %73 = vector.shape_cast %72 : vector<8x8x32xbf16> to vector<64x32xbf16>
    %74 = vector.extract_strided_slice %63 {offsets = [1, 2, 0], sizes = [8, 8, 32], strides = [1, 1, 1]} : vector<10x10x32xbf16> to vector<8x8x32xbf16>
    %75 = vector.shape_cast %74 : vector<8x8x32xbf16> to vector<64x32xbf16>
    %76 = vector.extract_strided_slice %63 {offsets = [2, 0, 0], sizes = [8, 8, 32], strides = [1, 1, 1]} : vector<10x10x32xbf16> to vector<8x8x32xbf16>
    %77 = vector.shape_cast %76 : vector<8x8x32xbf16> to vector<64x32xbf16>
    %78 = vector.extract_strided_slice %63 {offsets = [2, 1, 0], sizes = [8, 8, 32], strides = [1, 1, 1]} : vector<10x10x32xbf16> to vector<8x8x32xbf16>
    %79 = vector.shape_cast %78 : vector<8x8x32xbf16> to vector<64x32xbf16>
    %80 = vector.extract_strided_slice %63 {offsets = [2, 2, 0], sizes = [8, 8, 32], strides = [1, 1, 1]} : vector<10x10x32xbf16> to vector<8x8x32xbf16>
    %81 = vector.shape_cast %80 : vector<8x8x32xbf16> to vector<64x32xbf16>
    %82 = tpu.concatenate %65, %67, %69, %71, %73, %75, %77, %79, %81 in 1 : vector<64x32xbf16>, vector<64x32xbf16>, vector<64x32xbf16>, vector<64x32xbf16>, vector<64x32xbf16>, vector<64x32xbf16>, vector<64x32xbf16>, vector<64x32xbf16>, vector<64x32xbf16> -> vector<64x288xbf16>
    %c0_28 = arith.constant 0 : index
    %c0_29 = arith.constant 0 : index
    %83 = vector.load %arg7[%c0_28, %c0_29] : memref<288x32xbf16, #tpu.memory_space<vmem>>, vector<288x32xbf16>
    %cst_30 = arith.constant dense<0.000000e+00> : vector<64x32xf32>
    %84 = tpu.matmul %82, %83, %cst_30 {dimension_numbers = #tpu.dot_dimension_numbers<[1], [0], [0], [1], [0, 0, 1, 1], [], []>} : vector<64x288xbf16>, vector<288x32xbf16>, vector<64x32xf32> -> vector<64x32xf32>
    %c0_31 = arith.constant 0 : index
    %c0_32 = arith.constant 0 : index
    %85 = vector.load %arg8[%c0_31, %c0_32] : memref<1x32xf32, #tpu.memory_space<vmem>>, vector<1x32xf32>
    %86 = vector.broadcast %85 : vector<1x32xf32> to vector<64x32xf32>
    %87 = arith.addf %84, %86 : vector<64x32xf32>
    %cst_33 = arith.constant 0.000000e+00 : f32
    %88 = vector.broadcast %cst_33 : f32 to vector<64x32xf32>
    %89 = arith.maximumf %87, %88 : vector<64x32xf32>
    %90 = arith.truncf %89 : vector<64x32xf32> to vector<64x32xbf16>
    %91 = vector.shape_cast %90 : vector<64x32xbf16> to vector<8x8x32xbf16>
    %92 = vector.shape_cast %91 : vector<8x8x32xbf16> to vector<8x8x1x32xbf16>
    %93 = vector.shape_cast %91 : vector<8x8x32xbf16> to vector<8x8x1x32xbf16>
    %94 = tpu.concatenate %92, %93 in 2 : vector<8x8x1x32xbf16>, vector<8x8x1x32xbf16> -> vector<8x8x2x32xbf16>
    %95 = vector.shape_cast %94 : vector<8x8x2x32xbf16> to vector<8x16x32xbf16>
    %96 = vector.shape_cast %95 : vector<8x16x32xbf16> to vector<8x1x16x32xbf16>
    %97 = vector.shape_cast %95 : vector<8x16x32xbf16> to vector<8x1x16x32xbf16>
    %98 = tpu.concatenate %96, %97 in 1 : vector<8x1x16x32xbf16>, vector<8x1x16x32xbf16> -> vector<8x2x16x32xbf16>
    %99 = vector.shape_cast %98 : vector<8x2x16x32xbf16> to vector<16x16x32xbf16>
    %100 = arith.truncf %55 : vector<256x32xf32> to vector<256x32xbf16>
    %101 = vector.shape_cast %100 : vector<256x32xbf16> to vector<16x16x32xbf16>
    %cst_34 = arith.constant 0.000000e+00 : bf16
    %102 = vector.broadcast %cst_34 : bf16 to vector<1x16x32xbf16>
    %cst_35 = arith.constant 0.000000e+00 : bf16
    %103 = vector.broadcast %cst_35 : bf16 to vector<1x16x32xbf16>
    %104 = tpu.concatenate %102, %101, %103 in 0 : vector<1x16x32xbf16>, vector<16x16x32xbf16>, vector<1x16x32xbf16> -> vector<18x16x32xbf16>
    %cst_36 = arith.constant 0.000000e+00 : bf16
    %105 = vector.broadcast %cst_36 : bf16 to vector<18x1x32xbf16>
    %cst_37 = arith.constant 0.000000e+00 : bf16
    %106 = vector.broadcast %cst_37 : bf16 to vector<18x1x32xbf16>
    %107 = tpu.concatenate %105, %104, %106 in 1 : vector<18x1x32xbf16>, vector<18x16x32xbf16>, vector<18x1x32xbf16> -> vector<18x18x32xbf16>
    %c0_38 = arith.constant 0 : index
    %c0_39 = arith.constant 0 : index
    %108 = vector.load %arg9[%c0_38, %c0_39] : memref<32x288xbf16, #tpu.memory_space<vmem>>, vector<32x288xbf16>
    %109 = vector.extract_strided_slice %107 {offsets = [0, 0, 0], sizes = [16, 16, 32], strides = [1, 1, 1]} : vector<18x18x32xbf16> to vector<16x16x32xbf16>
    %110 = vector.shape_cast %109 : vector<16x16x32xbf16> to vector<256x32xbf16>
    %111 = vector.extract_strided_slice %107 {offsets = [0, 1, 0], sizes = [16, 16, 32], strides = [1, 1, 1]} : vector<18x18x32xbf16> to vector<16x16x32xbf16>
    %112 = vector.shape_cast %111 : vector<16x16x32xbf16> to vector<256x32xbf16>
    %113 = vector.extract_strided_slice %107 {offsets = [0, 2, 0], sizes = [16, 16, 32], strides = [1, 1, 1]} : vector<18x18x32xbf16> to vector<16x16x32xbf16>
    %114 = vector.shape_cast %113 : vector<16x16x32xbf16> to vector<256x32xbf16>
    %115 = vector.extract_strided_slice %107 {offsets = [1, 0, 0], sizes = [16, 16, 32], strides = [1, 1, 1]} : vector<18x18x32xbf16> to vector<16x16x32xbf16>
    %116 = vector.shape_cast %115 : vector<16x16x32xbf16> to vector<256x32xbf16>
    %117 = vector.extract_strided_slice %107 {offsets = [1, 1, 0], sizes = [16, 16, 32], strides = [1, 1, 1]} : vector<18x18x32xbf16> to vector<16x16x32xbf16>
    %118 = vector.shape_cast %117 : vector<16x16x32xbf16> to vector<256x32xbf16>
    %119 = vector.extract_strided_slice %107 {offsets = [1, 2, 0], sizes = [16, 16, 32], strides = [1, 1, 1]} : vector<18x18x32xbf16> to vector<16x16x32xbf16>
    %120 = vector.shape_cast %119 : vector<16x16x32xbf16> to vector<256x32xbf16>
    %121 = vector.extract_strided_slice %107 {offsets = [2, 0, 0], sizes = [16, 16, 32], strides = [1, 1, 1]} : vector<18x18x32xbf16> to vector<16x16x32xbf16>
    %122 = vector.shape_cast %121 : vector<16x16x32xbf16> to vector<256x32xbf16>
    %123 = vector.extract_strided_slice %107 {offsets = [2, 1, 0], sizes = [16, 16, 32], strides = [1, 1, 1]} : vector<18x18x32xbf16> to vector<16x16x32xbf16>
    %124 = vector.shape_cast %123 : vector<16x16x32xbf16> to vector<256x32xbf16>
    %125 = vector.extract_strided_slice %107 {offsets = [2, 2, 0], sizes = [16, 16, 32], strides = [1, 1, 1]} : vector<18x18x32xbf16> to vector<16x16x32xbf16>
    %126 = vector.shape_cast %125 : vector<16x16x32xbf16> to vector<256x32xbf16>
    %127 = tpu.concatenate %110, %112, %114, %116, %118, %120, %122, %124, %126 in 1 : vector<256x32xbf16>, vector<256x32xbf16>, vector<256x32xbf16>, vector<256x32xbf16>, vector<256x32xbf16>, vector<256x32xbf16>, vector<256x32xbf16>, vector<256x32xbf16>, vector<256x32xbf16> -> vector<256x288xbf16>
    %cst_40 = arith.constant dense<0.000000e+00> : vector<32x256xf32>
    %128 = tpu.matmul %108, %127, %cst_40 {dimension_numbers = #tpu.dot_dimension_numbers<[1], [1], [0], [0], [0, 0, 1, 0], [], []>} : vector<32x288xbf16>, vector<256x288xbf16>, vector<32x256xf32> -> vector<32x256xf32>
    %cst_41 = arith.constant 0.000000e+00 : bf16
    %129 = vector.broadcast %cst_41 : bf16 to vector<1x16x32xbf16>
    %cst_42 = arith.constant 0.000000e+00 : bf16
    %130 = vector.broadcast %cst_42 : bf16 to vector<1x16x32xbf16>
    %131 = tpu.concatenate %129, %99, %130 in 0 : vector<1x16x32xbf16>, vector<16x16x32xbf16>, vector<1x16x32xbf16> -> vector<18x16x32xbf16>
    %cst_43 = arith.constant 0.000000e+00 : bf16
    %132 = vector.broadcast %cst_43 : bf16 to vector<18x1x32xbf16>
    %cst_44 = arith.constant 0.000000e+00 : bf16
    %133 = vector.broadcast %cst_44 : bf16 to vector<18x1x32xbf16>
    %134 = tpu.concatenate %132, %131, %133 in 1 : vector<18x1x32xbf16>, vector<18x16x32xbf16>, vector<18x1x32xbf16> -> vector<18x18x32xbf16>
    %c0_45 = arith.constant 0 : index
    %c0_46 = arith.constant 0 : index
    %135 = vector.load %arg10[%c0_45, %c0_46] : memref<32x288xbf16, #tpu.memory_space<vmem>>, vector<32x288xbf16>
    %136 = vector.extract_strided_slice %134 {offsets = [0, 0, 0], sizes = [16, 16, 32], strides = [1, 1, 1]} : vector<18x18x32xbf16> to vector<16x16x32xbf16>
    %137 = vector.shape_cast %136 : vector<16x16x32xbf16> to vector<256x32xbf16>
    %138 = vector.extract_strided_slice %134 {offsets = [0, 1, 0], sizes = [16, 16, 32], strides = [1, 1, 1]} : vector<18x18x32xbf16> to vector<16x16x32xbf16>
    %139 = vector.shape_cast %138 : vector<16x16x32xbf16> to vector<256x32xbf16>
    %140 = vector.extract_strided_slice %134 {offsets = [0, 2, 0], sizes = [16, 16, 32], strides = [1, 1, 1]} : vector<18x18x32xbf16> to vector<16x16x32xbf16>
    %141 = vector.shape_cast %140 : vector<16x16x32xbf16> to vector<256x32xbf16>
    %142 = vector.extract_strided_slice %134 {offsets = [1, 0, 0], sizes = [16, 16, 32], strides = [1, 1, 1]} : vector<18x18x32xbf16> to vector<16x16x32xbf16>
    %143 = vector.shape_cast %142 : vector<16x16x32xbf16> to vector<256x32xbf16>
    %144 = vector.extract_strided_slice %134 {offsets = [1, 1, 0], sizes = [16, 16, 32], strides = [1, 1, 1]} : vector<18x18x32xbf16> to vector<16x16x32xbf16>
    %145 = vector.shape_cast %144 : vector<16x16x32xbf16> to vector<256x32xbf16>
    %146 = vector.extract_strided_slice %134 {offsets = [1, 2, 0], sizes = [16, 16, 32], strides = [1, 1, 1]} : vector<18x18x32xbf16> to vector<16x16x32xbf16>
    %147 = vector.shape_cast %146 : vector<16x16x32xbf16> to vector<256x32xbf16>
    %148 = vector.extract_strided_slice %134 {offsets = [2, 0, 0], sizes = [16, 16, 32], strides = [1, 1, 1]} : vector<18x18x32xbf16> to vector<16x16x32xbf16>
    %149 = vector.shape_cast %148 : vector<16x16x32xbf16> to vector<256x32xbf16>
    %150 = vector.extract_strided_slice %134 {offsets = [2, 1, 0], sizes = [16, 16, 32], strides = [1, 1, 1]} : vector<18x18x32xbf16> to vector<16x16x32xbf16>
    %151 = vector.shape_cast %150 : vector<16x16x32xbf16> to vector<256x32xbf16>
    %152 = vector.extract_strided_slice %134 {offsets = [2, 2, 0], sizes = [16, 16, 32], strides = [1, 1, 1]} : vector<18x18x32xbf16> to vector<16x16x32xbf16>
    %153 = vector.shape_cast %152 : vector<16x16x32xbf16> to vector<256x32xbf16>
    %154 = tpu.concatenate %137, %139, %141, %143, %145, %147, %149, %151, %153 in 1 : vector<256x32xbf16>, vector<256x32xbf16>, vector<256x32xbf16>, vector<256x32xbf16>, vector<256x32xbf16>, vector<256x32xbf16>, vector<256x32xbf16>, vector<256x32xbf16>, vector<256x32xbf16> -> vector<256x288xbf16>
    %cst_47 = arith.constant dense<0.000000e+00> : vector<32x256xf32>
    %155 = tpu.matmul %135, %154, %cst_47 {dimension_numbers = #tpu.dot_dimension_numbers<[1], [1], [0], [0], [0, 0, 1, 0], [], []>} : vector<32x288xbf16>, vector<256x288xbf16>, vector<32x256xf32> -> vector<32x256xf32>
    %156 = arith.addf %128, %155 : vector<32x256xf32>
    %c0_48 = arith.constant 0 : index
    %c0_49 = arith.constant 0 : index
    %157 = vector.load %arg11[%c0_48, %c0_49] : memref<32x1xf32, #tpu.memory_space<vmem>>, vector<32x1xf32>
    %158 = vector.broadcast %157 : vector<32x1xf32> to vector<32x256xf32>
    %159 = arith.addf %156, %158 : vector<32x256xf32>
    %cst_50 = arith.constant 0.000000e+00 : f32
    %160 = vector.broadcast %cst_50 : f32 to vector<32x256xf32>
    %161 = arith.maximumf %159, %160 : vector<32x256xf32>
    %c0_51 = arith.constant 0 : index
    %c0_52 = arith.constant 0 : index
    %c0_53 = arith.constant 0 : index
    %162 = vector.load %arg14[%c0_51, %c0_52, %c0_53] : memref<1x32x256xf32, #tpu.memory_space<vmem>>, vector<1x32x256xf32>
    %163 = vector.shape_cast %162 : vector<1x32x256xf32> to vector<32x256xf32>
    %164 = vector.shape_cast %161 : vector<32x256xf32> to vector<1x32x256xf32>
    tpu.vector_store %arg14[%c0_51, %c0_52, %c0_53], %164 {strides = array<i32>} : memref<1x32x256xf32, #tpu.memory_space<vmem>>, vector<1x32x256xf32>,
    %c0_54 = arith.constant 0 : index
    %c0_55 = arith.constant 0 : index
    %165 = vector.load %arg12[%c0_54, %c0_55] : memref<3x32xbf16, #tpu.memory_space<vmem>>, vector<3x32xbf16>
    %166 = arith.truncf %161 : vector<32x256xf32> to vector<32x256xbf16>
    %cst_56 = arith.constant dense<0.000000e+00> : vector<3x256xf32>
    %167 = tpu.matmul %165, %166, %cst_56 {dimension_numbers = #tpu.dot_dimension_numbers<[1], [0], [0], [1], [0, 0, 1, 1], [], []>} : vector<3x32xbf16>, vector<32x256xbf16>, vector<3x256xf32> -> vector<3x256xf32>
    %c0_57 = arith.constant 0 : index
    %c0_58 = arith.constant 0 : index
    %168 = vector.load %arg13[%c0_57, %c0_58] : memref<3x1xf32, #tpu.memory_space<vmem>>, vector<3x1xf32>
    %169 = vector.broadcast %168 : vector<3x1xf32> to vector<3x256xf32>
    %170 = arith.addf %167, %169 : vector<3x256xf32>
    %171 = arith.negf %170 : vector<3x256xf32>
    %172 = math.exp %171 : vector<3x256xf32>
    %cst_59 = arith.constant 1.000000e+00 : f32
    %173 = vector.broadcast %cst_59 : f32 to vector<3x256xf32>
    %174 = arith.addf %173, %172 : vector<3x256xf32>
    %175 = arith.divf %173, %174 : vector<3x256xf32>
    %c0_60 = arith.constant 0 : index
    %c0_61 = arith.constant 0 : index
    %c0_62 = arith.constant 0 : index
    %176 = vector.load %arg15[%c0_60, %c0_61, %c0_62] : memref<1x3x256xf32, #tpu.memory_space<vmem>>, vector<1x3x256xf32>
    %177 = vector.shape_cast %176 : vector<1x3x256xf32> to vector<3x256xf32>
    %178 = vector.shape_cast %175 : vector<3x256xf32> to vector<1x3x256xf32>
    tpu.vector_store %arg15[%c0_60, %c0_61, %c0_62], %178 {strides = array<i32>} : memref<1x3x256xf32, #tpu.memory_space<vmem>>, vector<1x3x256xf32>,
    return
  }
  func.func @transform_0(%arg0: i32) -> (i32, i32, i32, i32) {
    %c0_i32 = arith.constant 0 : i32
    %c0_i32_0 = arith.constant 0 : i32
    %c0_i32_1 = arith.constant 0 : i32
    %c0_i32_2 = arith.constant 0 : i32
    return %arg0, %c0_i32, %c0_i32_0, %c0_i32_1 : i32, i32, i32, i32
  }
  func.func @transform_1(%arg0: i32) -> (i32, i32, i32, i32) {
    %c0_i32 = arith.constant 0 : i32
    %c0_i32_0 = arith.constant 0 : i32
    %c0_i32_1 = arith.constant 0 : i32
    %c0_i32_2 = arith.constant 0 : i32
    return %arg0, %c0_i32, %c0_i32_0, %c0_i32_1 : i32, i32, i32, i32
  }
  func.func @transform_2(%arg0: i32) -> (i32, i32) {
    %c0_i32 = arith.constant 0 : i32
    %c0_i32_0 = arith.constant 0 : i32
    %c0_i32_1 = arith.constant 0 : i32
    return %c0_i32, %c0_i32_0 : i32, i32
  }
  func.func @transform_3(%arg0: i32) -> (i32, i32) {
    %c0_i32 = arith.constant 0 : i32
    %c0_i32_0 = arith.constant 0 : i32
    %c0_i32_1 = arith.constant 0 : i32
    return %c0_i32, %c0_i32_0 : i32, i32
  }
  func.func @transform_4(%arg0: i32) -> (i32, i32) {
    %c0_i32 = arith.constant 0 : i32
    %c0_i32_0 = arith.constant 0 : i32
    %c0_i32_1 = arith.constant 0 : i32
    return %c0_i32, %c0_i32_0 : i32, i32
  }
  func.func @transform_5(%arg0: i32) -> (i32, i32) {
    %c0_i32 = arith.constant 0 : i32
    %c0_i32_0 = arith.constant 0 : i32
    %c0_i32_1 = arith.constant 0 : i32
    return %c0_i32, %c0_i32_0 : i32, i32
  }
  func.func @transform_6(%arg0: i32) -> (i32, i32) {
    %c0_i32 = arith.constant 0 : i32
    %c0_i32_0 = arith.constant 0 : i32
    %c0_i32_1 = arith.constant 0 : i32
    return %c0_i32, %c0_i32_0 : i32, i32
  }
  func.func @transform_7(%arg0: i32) -> (i32, i32) {
    %c0_i32 = arith.constant 0 : i32
    %c0_i32_0 = arith.constant 0 : i32
    %c0_i32_1 = arith.constant 0 : i32
    return %c0_i32, %c0_i32_0 : i32, i32
  }
  func.func @transform_8(%arg0: i32) -> (i32, i32) {
    %c0_i32 = arith.constant 0 : i32
    %c0_i32_0 = arith.constant 0 : i32
    %c0_i32_1 = arith.constant 0 : i32
    return %c0_i32, %c0_i32_0 : i32, i32
  }
  func.func @transform_9(%arg0: i32) -> (i32, i32) {
    %c0_i32 = arith.constant 0 : i32
    %c0_i32_0 = arith.constant 0 : i32
    %c0_i32_1 = arith.constant 0 : i32
    return %c0_i32, %c0_i32_0 : i32, i32
  }
  func.func @transform_10(%arg0: i32) -> (i32, i32) {
    %c0_i32 = arith.constant 0 : i32
    %c0_i32_0 = arith.constant 0 : i32
    %c0_i32_1 = arith.constant 0 : i32
    return %c0_i32, %c0_i32_0 : i32, i32
  }
  func.func @transform_11(%arg0: i32) -> (i32, i32) {
    %c0_i32 = arith.constant 0 : i32
    %c0_i32_0 = arith.constant 0 : i32
    %c0_i32_1 = arith.constant 0 : i32
    return %c0_i32, %c0_i32_0 : i32, i32
  }
  func.func @transform_12(%arg0: i32) -> (i32, i32) {
    %c0_i32 = arith.constant 0 : i32
    %c0_i32_0 = arith.constant 0 : i32
    %c0_i32_1 = arith.constant 0 : i32
    return %c0_i32, %c0_i32_0 : i32, i32
  }
  func.func @transform_13(%arg0: i32) -> (i32, i32, i32) {
    %c0_i32 = arith.constant 0 : i32
    %c0_i32_0 = arith.constant 0 : i32
    %c0_i32_1 = arith.constant 0 : i32
    return %arg0, %c0_i32, %c0_i32_0 : i32, i32, i32
  }
  func.func @transform_14(%arg0: i32) -> (i32, i32, i32) {
    %c0_i32 = arith.constant 0 : i32
    %c0_i32_0 = arith.constant 0 : i32
    %c0_i32_1 = arith.constant 0 : i32
    return %arg0, %c0_i32, %c0_i32_0 : i32, i32, i32
  }
}

</mosaic_0001>

<bundles_post_ra>
// kernel: dense_convs_pipeline_forward.1
= control target key start
LH: loop header
LB: loop body
LE: loop exit
PB: predicated region body
PF: predicated region fallthrough
CT: control target
= control target key end

     0   :  { %s6928_s29 = smov 0   ;;  %s10227_s0 = inlined_call_operand.vmem [shape: bf16[2,16,16,16], index: 0, kind: input, shape index: {}]   ;;  %s10228_s1 = inlined_call_operand.vmem [shape: bf16[2,8,8,64], index: 1, kind: input, shape index: {}]   ;;  %s10229_s2 = inlined_call_operand.vmem [shape: bf16[256,32], index: 2, kind: input, shape index: {}]   ;;  %s10230_s3 = inlined_call_operand.vmem [shape: f32[1,32], index: 3, kind: input, shape index: {}]   ;;  %s10231_s4 = inlined_call_operand.vmem [shape: bf16[144,32], index: 4, kind: input, shape index: {}]   ;;  %s10232_s5 = inlined_call_operand.vmem [shape: f32[1,32], index: 5, kind: input, shape index: {}]   ;;  %s10233_s6 = inlined_call_operand.vmem [shape: bf16[288,32], index: 6, kind: input, shape index: {}]   ;;  %s10234_s7 = inlined_call_operand.vmem [shape: f32[1,32], index: 7, kind: input, shape index: {}]   ;;  %s10235_s8 = inlined_call_operand.vmem [shape: bf16[32,288], index: 8, kind: input, shape index: {}]   ;;  %s10236_s9 = inlined_call_operand.vmem [shape: bf16[32,288], index: 9, kind: input, shape index: {}]   ;;  %s10237_s10 = inlined_call_operand.vmem [shape: f32[32,1], index: 10, kind: input, shape index: {}]   ;;  %s10238_s11 = inlined_call_operand.vmem [shape: bf16[3,32], index: 11, kind: input, shape index: {}]   ;;  %s10239_s12 = inlined_call_operand.vmem [shape: f32[3,1], index: 12, kind: input, shape index: {}]   ;;  %s10240_s13 = inlined_call_operand.vmem [shape: f32[2,32,256], index: 13, kind: output, shape index: {0}]   ;;  %s10241_s14 = inlined_call_operand.vmem [shape: f32[2,3,256], index: 14, kind: output, shape index: {1}]  }
   0x1 LB: > { %s6271_s30 = sadd.s32 4294967295, %s6842_s29   ;;  %p6275_p0 = scmp.ge.s32.totalorder %s6842_s29, 1  ;;  %s6842_s29 = sphi %s6928_s29, %s25_s29  }
   0x2   : > { %p425_p1 = scmp.lt.s32.totalorder %s6842_s29, 3 }
   0x4   : > { %p426_p2 = pnand %p6275_p0, %p425_p1 }
   0x6   : > { %429 = sbr.rel (%p426_p2) target bundleno = 1820 (0x71c), region = 72 }
   0xd   : > { %p481_p3 = scmp.lt.s32.totalorder %s6271_s30, 1  ;;  %vm582_vm0 = vcmask 1040384   ;;  %vm583_vm1 = vsmask.f32 256  ;;  %v10242_v0 = vmov 0   ;;  %v6752_v2 = vld [vmem:[%s10229_s2 + $0x40] sm:$0xff]  }
   0xe   : > { %v6937_v1 = vrot.slane %v10242_v0, 7  ;;  %2227 = vmatprep.subr.bf16.mxu1 %v10242_v0  ;;  %6751 = vset.pattern.permute.xlu1 %v10242_v0  ;;  %vm6946_vm2 = vmand %vm582_vm0, %vm583_vm1  ;;  %vm634_vm3 = vsmask.f32 3328  ;;  %vm635_vm4 = vsmask.f32 7440  ;;  %v6753_v5 = vld [vmem:[%s10229_s2] sm:$0xff]  }
   0xf   : > { %s10424_s30 = smov (!%p481_p3, %s6271_s30), 1  ;;  %6750 = vset.pattern.permute.xlu0 %v10242_v0  ;;  %6531 = vmatprep.subr.bf16.mxu0 %v6752_v2  ;;  %v6754_v8 = vld [vmem:[%s10229_s2 + $0x48] sm:$0xff]   ;;  %v6756_v42 = vld [vmem:[%s10229_s2 + $0x50] sm:$0xff]   ;;  %vm6997_vm5 = vmor %vm634_vm3, %vm635_vm4  ;;  %s6845_s23 = smov 64   ;;  %vm809_vm6 = vcmask 523264   ;;  %vm1564_vm7 = vcmask 1046528  }
  0x10   : > { %v6954_v4 = vsel %vm6946_vm2, 0, %v6937_v1  ;;  %s6520_s19 = sshll.u32 %s10424_s30, 5  ;;  %6532 = vmatpush3.bf16.msra.mxu0 %v6753_v5  ;;  %v6755_v33 = vld [vmem:[%s10229_s2 + $0x8] sm:$0xff]   ;;  %v6757_v48 = vld [vmem:[%s10229_s2 + $0x10] sm:$0xff]   ;;  %v6758_v57 = vld [vmem:[%s10229_s2 + $0x58] sm:$0xff]   ;;  %s6519_s18 = sshll.u32 %s10424_s30, 7 }
  0x11   : > { %10300 = vst [vmem:[#allocation2_spill] sm:$0xff] %v6954_v4  ;;  %v6284_v6 = vcombine.low %v6954_v4, %v6954_v4  ;;  %v6285_v7 = vcombine.high %v6954_v4, %v6954_v4  ;;  %s6967_s22 = scalar_lea.vmem %s10228_s1, %s6520_s19  ;;  %6533 = vmatprep.subr.bf16.mxu0 %v6754_v8  ;;  %v6759_v58 = vld [vmem:[%s10229_s2 + $0x18] sm:$0xff]   ;;  %s7082_s26 = scalar_lea.vmem %s10227_s0, %s6519_s18  ;;  %vm1340_vm8 = vsmask.f32 7424  ;;  %vm2516_vm9 = vcmask 1044480  }
  0x12   : > { %v502_v9 = vld [vmem:[%s6967_s22] sm:$0xf]  ;;  %v503_v10 = vld [vmem:[%s6967_s22 + $0x4] sm:$0xf]  ;;  %v504_v17 = vld [vmem:[%s6967_s22 + $0x8] sm:$0xf] }
  0x13   : > { %v638_v11 = vshrl.u32 %v6284_v6, 16  ;;  %v641_v12 = vshll.u32 %v6284_v6, 16  ;;  %v518_v13 = vshrl.u32 %v502_v9, 16  ;;  %v521_v14 = vshll.u32 %v502_v9, 16  ;;  %v505_v21 = vld [vmem:[%s6967_s22 + $0xc] sm:$0xf] }
  0x14   : > { %v525_v15 = vshrl.u32 %v503_v10, 16  ;;  %v528_v16 = vshll.u32 %v503_v10, 16  ;;  %v647_v20 = vshll.u32 %v6285_v7, 16  ;;  %v532_v22 = vshrl.u32 %v504_v17, 16  ;;  %v506_v25 = vld [vmem:[%s6967_s22 + $0x10] sm:$0xf]  ;;  %6534 = vmatpush3.bf16.msra.mxu0 %v6755_v33 }
  0x15   : > { %v640_v18 = vrot.slane %v638_v11, 4  ;;  %v643_v19 = vrot.slane %v641_v12, 5  ;;  %v520_v23 = vrot.slane %v518_v13, 7  ;;  %v535_v26 = vshll.u32 %v504_v17, 16  ;;  %v6978_v32 = vld [vmem:[%s6967_s22 + $0x14] sm:$0xf]  ;;  %6535 = vmatprep.subr.bf16.mxu0 %v6756_v42 }
  0x16   : > { %v527_v24 = vrot.slane %v525_v15, 7  ;;  %v539_v27 = vshrl.u32 %v505_v21, 16  ;;  %v649_v29 = vrot.slane %v647_v20, 5  ;;  %v534_v30 = vrot.slane %v532_v22, 7  ;;  %v6760_v7 = vld [vmem:[%s10229_s2 + $0x60] sm:$0xff]   ;;  %v6763_v42 = vld [vmem:[%s10229_s2 + $0x28] sm:$0xff]  }
  0x17   : > { %v644_v28 = vor.u32 %v643_v19, %v640_v18  ;;  %v542_v31 = vshll.u32 %v505_v21, 16  ;;  %v523_v34 = vor.u32 %v521_v14, %v520_v23  ;;  %v546_v37 = vshrl.u32 %v506_v25, 16  ;;  %v6761_v20 = vld [vmem:[%s10229_s2 + $0x20] sm:$0xff]   ;;  %s6846_s15 = smov 32   ;;  %s6847_s16 = smov 16  }
  0x18   : > { %v530_v35 = vor.u32 %v528_v16, %v527_v24  ;;  %v541_v36 = vrot.slane %v539_v27, 7  ;;  %v537_v39 = vor.u32 %v535_v26, %v534_v30  ;;  %v549_v40 = vshll.u32 %v506_v25, 16  ;;  %6536 = vmatpush3.bf16.msra.mxu0 %v6757_v48  ;;  %v6762_v25 = vld [vmem:[%s10229_s2 + $0x68] sm:$0xff]   ;;  %s6848_s17 = smov 48   ;;  %s6849_s18 = smov 96  }
  0x19   : > { %v645_v38 = vrot.slane %v644_v28, 4  ;;  %v553_v41 = vshrl.u32 %v6978_v32, 16  ;;  %v6989_v43 = vsel %vm6946_vm2, 0, %v523_v34  ;;  %v548_v47 = vrot.slane %v546_v37, 7  ;;  %6537 = vmatprep.subr.bf16.mxu0 %v6758_v57  ;;  %s6851_s27 = smov 112   ;;  %s6522_s20 = sshll.u32 %s10424_s30, 3 }
  0x1a   : > { %v6993_v44 = vsel %vm6946_vm2, 0, %v530_v35  ;;  %v544_v46 = vor.u32 %v542_v31, %v541_v36  ;;  %v6286_v49 = vcombine.low %v6989_v43, %v6989_v43  ;;  %v6287_v50 = vcombine.high %v6989_v43, %v6989_v43  ;;  %v508_v35 = vld [vmem:[%s6967_s22 + $0x18] sm:$0xf]  ;;  %s500_s25 = scalar_lea.vmem %s10241_s14, %s6522_s20 }
  0x1b   : > { %v6288_v51 = vcombine.low %v6993_v44, %v6993_v44  ;;  %v6289_v52 = vcombine.high %v6993_v44, %v6993_v44  ;;  %v7014_v53 = vsel %vm6997_vm5, %v645_v38, %v649_v29  ;;  %v551_v54 = vor.u32 %v549_v40, %v548_v47  ;;  %v509_v40 = vld [vmem:[%s6967_s22 + $0x1c] sm:$0xf]  ;;  %s6850_s22 = smov 80  }
  0x1c   : > { %v7018_v55 = vsel %vm6946_vm2, 0, %v537_v39  ;;  %v7022_v56 = vsel %vm6946_vm2, 0, %v544_v46  ;;  %v652_v59 = vshrl.u32 %v6286_v49, 16  ;;  %v655_v60 = vshll.u32 %v6286_v49, 16  ;;  %6538 = vmatpush3.bf16.msra.mxu0 %v6759_v58  ;;  %v6765_v58 = vld [vmem:[%s10229_s2 + $0x30] sm:$0xff]  }
  0x1d   : > { %v661_v61 = vshll.u32 %v6287_v50, 16  ;;  %v666_v62 = vshrl.u32 %v6288_v51, 16  ;;  %v669_v63 = vshll.u32 %v6288_v51, 16  ;;  %v675_v2 = vshll.u32 %v6289_v52, 16  ;;  %6539 = vmatprep.subr.bf16.mxu0 %v6760_v7  ;;  %v6764_v50 = vld [vmem:[%s10229_s2 + $0x70] sm:$0xff]  }
  0x1e   : > { %v7032_v5 = vsel %vm6946_vm2, 0, %v551_v54  ;;  %v6290_v6 = vcombine.low %v7018_v55, %v7018_v55  ;;  %v654_v8 = vrot.slane %v652_v59, 4  ;;  %v657_v9 = vrot.slane %v655_v60, 5 }
  0x1f   : > { %v663_v10 = vrot.slane %v661_v61, 5  ;;  %v668_v11 = vrot.slane %v666_v62, 4  ;;  %v671_v12 = vrot.slane %v669_v63, 5  ;;  %v677_v13 = vrot.slane %v675_v2, 5  ;;  %v6766_v62 = vld [vmem:[%s10229_s2 + $0x78] sm:$0xff]  }
  0x20   : > { %v6291_v14 = vcombine.high %v7018_v55, %v7018_v55  ;;  %v6292_v15 = vcombine.low %v7022_v56, %v7022_v56  ;;  %v658_v16 = vor.u32 %v657_v9, %v654_v8  ;;  %v6293_v17 = vcombine.high %v7022_v56, %v7022_v56  ;;  %6540 = vmatpush3.bf16.msra.mxu0 %v6761_v20 }
  0x21   : > { %v6294_v18 = vcombine.low %v7032_v5, %v7032_v5  ;;  %v6295_v19 = vcombine.high %v7032_v5, %v7032_v5  ;;  %v672_v21 = vor.u32 %v671_v12, %v668_v11  ;;  %v680_v22 = vshrl.u32 %v6290_v6, 16  ;;  %6541 = vmatprep.subr.bf16.mxu0 %v6762_v25 }
  0x22   : > { %v683_v23 = vshll.u32 %v6290_v6, 16  ;;  %v689_v24 = vshll.u32 %v6291_v14, 16  ;;  %v659_v26 = vrot.slane %v658_v16, 4  ;;  %v694_v27 = vshrl.u32 %v6292_v15, 16 }
  0x23   : > { %v697_v28 = vshll.u32 %v6292_v15, 16  ;;  %v703_v29 = vshll.u32 %v6293_v17, 16  ;;  %v673_v30 = vrot.slane %v672_v21, 4  ;;  %v682_v31 = vrot.slane %v680_v22, 4 }
  0x24   : > { %v685_v33 = vrot.slane %v683_v23, 5  ;;  %v691_v34 = vrot.slane %v689_v24, 5  ;;  %v664_v36 = vsel %vm6997_vm5, %v659_v26, %v663_v10  ;;  %v696_v37 = vrot.slane %v694_v27, 4  ;;  %6542 = vmatpush3.bf16.msra.mxu0 %v6763_v42 }
  0x25   : > { %v699_v38 = vrot.slane %v697_v28, 5  ;;  %v705_v39 = vrot.slane %v703_v29, 5  ;;  %v678_v46 = vsel %vm6997_vm5, %v673_v30, %v677_v13  ;;  %v6306_v47 = vcombine.low %v7014_v53, %v664_v36  ;;  %6543 = vmatprep.subr.bf16.mxu0 %v6764_v50  ;;  %v6767_v13 = vld [vmem:[%s10229_s2 + $0x38] sm:$0xff]  }
  0x26   : > { %v686_v48 = vor.u32 %v685_v33, %v682_v31  ;;  %v708_v49 = vshrl.u32 %v6294_v18, 16  ;;  %v6314_v51 = vcombine.low %v664_v36, %v678_v46  ;;  %v711_v54 = vshll.u32 %v6294_v18, 16 }
  0x27   : > { %v700_v52 = vor.u32 %v699_v38, %v696_v37  ;;  %v717_v57 = vshll.u32 %v6295_v19, 16  ;;  %v555_v53 = vrot.slane %v553_v41, 7  ;;  %v556_v61 = vshll.u32 %v6978_v32, 16 }
  0x28   : > { %v687_v59 = vrot.slane %v686_v48, 4  ;;  %v710_v60 = vrot.slane %v708_v49, 4  ;;  %801 = vrot.lane.b32.xlu0 %v6314_v51, %s6845_s23  ;;  %v713_v2 = vrot.slane %v711_v54, 5  ;;  %v560_v7 = vshrl.u32 %v508_v35, 16  ;;  %6544 = vmatpush3.bf16.msra.mxu0 %v6765_v58 }
  0x29   : > { %v701_v63 = vrot.slane %v700_v52, 4  ;;  %v719_v6 = vrot.slane %v717_v57, 5  ;;  %v558_v41 = vor.u32 %v556_v61, %v555_v53  ;;  %v563_v8 = vshll.u32 %v508_v35, 16  ;;  %6545 = vmatprep.subr.bf16.mxu0 %v6766_v62 }
  0x2a   : > { %v692_v32 = vsel %vm6997_vm5, %v687_v59, %v691_v34  ;;  %v567_v9 = vshrl.u32 %v509_v40, 16  ;;  %v714_v11 = vor.u32 %v713_v2, %v710_v60  ;;  %v562_v12 = vrot.slane %v560_v7, 7 }
  0x2b   : > { %v706_v10 = vsel %vm6997_vm5, %v701_v63, %v705_v39  ;;  %v7093_v15 = vsel %vm6946_vm2, 0, %v558_v41  ;;  %v570_v17 = vshll.u32 %v509_v40, 16  ;;  %v6307_v22 = vcombine.low %v678_v46, %v692_v32 }
  0x2c   : > { %v6315_v14 = vcombine.low %v692_v32, %v706_v10  ;;  %v569_v16 = vrot.slane %v567_v9, 7  ;;  %784 = vrot.lane.b32.xlu0 %v6306_v47, %s6845_s23  ;;  %v715_v18 = vrot.slane %v714_v11, 4  ;;  %v6296_v19 = vcombine.low %v7093_v15, %v7093_v15  ;;  %6546 = vmatpush3.bf16.msra.mxu0 %v6767_v13 }
  0x2d   : > { %v6297_v20 = vcombine.high %v7093_v15, %v7093_v15  ;;  %v565_v21 = vor.u32 %v563_v8, %v562_v12  ;;  %v6310_v24 = vcombine.low %v6989_v43, %v6993_v44  ;;  %v6311_v33 = vcombine.low %v7018_v55, %v7022_v56 }
  0x2e   : > { %803 = vrot.lane.b32.xlu1 %v6315_v14, %s6845_s23  ;;  %v572_v23 = vor.u32 %v570_v17, %v569_v16  ;;  %v720_v25 = vsel %vm6997_vm5, %v715_v18, %v719_v6  ;;  %v722_v26 = vshrl.u32 %v6296_v19, 16  ;;  %v725_v27 = vshll.u32 %v6296_v19, 16 }
  0x2f   : > { %v731_v28 = vshll.u32 %v6297_v20, 16  ;;  %v6308_v29 = vcombine.low %v706_v10, %v720_v25  ;;  %v7107_v30 = vsel %vm6946_vm2, 0, %v565_v21  ;;  %v6303_v42 = vcombine.low %v6993_v44, %v7018_v55 }
  0x30   : > { %v7111_v31 = vsel %vm6946_vm2, 0, %v572_v23  ;;  %v724_v34 = vrot.slane %v722_v26, 4  ;;  %v727_v35 = vrot.slane %v725_v27, 5  ;;  %v6298_v37 = vcombine.low %v7107_v30, %v7107_v30  ;;  %v6768_v27 = vld [vmem:[%s7082_s26] sm:$0xff]  }
  0x31   : > { %v733_v36 = vrot.slane %v731_v28, 5  ;;  %v6299_v38 = vcombine.high %v7107_v30, %v7107_v30  ;;  %v6300_v39 = vcombine.low %v7111_v31, %v7111_v31  ;;  %v6301_v40 = vcombine.high %v7111_v31, %v7111_v31 }
  0x32   : > { %786 = vrot.lane.b32.xlu1 %v6307_v22, %s6845_s23  ;;  %v728_v46 = vor.u32 %v727_v35, %v724_v34  ;;  %v736_v47 = vshrl.u32 %v6298_v37, 16  ;;  %v739_v48 = vshll.u32 %v6298_v37, 16  ;;  %v6312_v49 = vcombine.low %v7032_v5, %v7093_v15 }
  0x33   : > { %v745_v50 = vshll.u32 %v6299_v38, 16  ;;  %v755_v51 = vshrl.u32 %v6300_v39, 16  ;;  %v758_v52 = vshll.u32 %v6300_v39, 16  ;;  %v764_v54 = vshll.u32 %v6301_v40, 16 }
  0x34   : > { %v729_v57 = vrot.slane %v728_v46, 4  ;;  %v738_v58 = vrot.slane %v736_v47, 4  ;;  %v741_v59 = vrot.slane %v739_v48, 5  ;;  %v6304_v60 = vcombine.low %v7022_v56, %v7032_v5 }
  0x35   : > { %v747_v53 = vrot.slane %v745_v50, 5  ;;  %v757_v44 = vrot.slane %v755_v51, 4  ;;  %v760_v55 = vrot.slane %v758_v52, 5  ;;  %v766_v61 = vrot.slane %v764_v54, 5  ;;  %v6769_v54 = vld [vmem:[%s7082_s26 + $0x8] sm:$0xff]  }
  0x36   : > { %788 = vrot.lane.b32.xlu1 %v6308_v29, %s6845_s23  ;;  %v734_v62 = vsel %vm6997_vm5, %v729_v57, %v733_v36  ;;  %v742_v63 = vor.u32 %v741_v59, %v738_v58  ;;  %v6313_v2 = vcombine.low %v7107_v30, %v7111_v31  ;;  %v6305_v6 = vcombine.low %v7093_v15, %v7107_v30 }
  0x37   : > { %v6316_v7 = vcombine.low %v720_v25, %v734_v62  ;;  %v761_v32 = vor.u32 %v760_v55, %v757_v44  ;;  %v6302_v13 = vcombine.low %v6954_v4, %v6989_v43  ;;  %v1163_v28 = vshrl.u32 %v6768_v27, 16 }
  0x38   : > { %v743_v41 = vrot.slane %v742_v63, 4  ;;  %v1166_v30 = vshll.u32 %v6768_v27, 16  ;;  %v1344_v31 = vshll.u32 %v6954_v4, 16  ;;  %v1342_v35 = vshrl.u32 %v6954_v4, 16  ;;  %v6773_v27 = vld [vmem:[%s10233_s6 + $0x40] sm:$0xff]  }
  0x39   : > { %805 = vrot.lane.b32.xlu0 %v6316_v7, %s6845_s23  ;;  %v762_v56 = vrot.slane %v761_v32, 4  ;;  %v1165_v29 = vrot.slane %v1163_v28, 7  ;;  %v1565_v38 = vrot.slane %v6954_v4, 1  ;;  %v1170_v59 = vshrl.u32 %v6769_v54, 16  ;;  %v6775_v28 = vld [vmem:[%s10233_s6] sm:$0xff]   ;;  %6571 = vmatprep.subr.bf16.mxu0 %v6773_v27 }
  0x3a   : > { %v748_v5 = vsel %vm6997_vm5, %v743_v41, %v747_v53  ;;  %v1346_v36 = vrot.slane %v1344_v31, 1  ;;  %v1173_v44 = vshll.u32 %v6769_v54, 16  ;;  %vm2517_vm10 = vsmask.f32 4352 }
  0x3b   : > { %v767_v8 = vsel %vm6997_vm5, %v762_v56, %v766_v61  ;;  %v6309_v9 = vcombine.low %v734_v62, %v748_v5  ;;  %v1168_v34 = vor.u32 %v1166_v30, %v1165_v29  ;;  %v1324_v48 = vsel %vm6946_vm2, %v1165_v29, 0  ;;  %vm7199_vm11 = vmand %vm2516_vm9, %vm2517_vm10 }
  0x3c   : > { %v6317_v10 = vcombine.low %v748_v5, %v767_v8  ;;  %v1361_v52 = vshll.u32 %v1324_v48, 16  ;;  %v1172_v53 = vrot.slane %v1170_v59, 7  ;;  %v1569_v62 = vrot.slane %v1324_v48, 1  ;;  %v7219_v5 = vld [vmem:[%s10230_s3] ss:$0 sm:$0xff] }
  0x3d   : > { %790 = vrot.lane.b32.xlu1 %v6309_v9, %s6845_s23  ;;  %v7163_v40 = vsel %vm6946_vm2, 0, %v1168_v34  ;;  %v7206_v7 = vsel %vm7199_vm11, %v6954_v4, 0  ;;  %vm1854_vm12 = vcmask 130048   ;;  %vm2680_vm13 = vcmask 1042432  }
  0x3e   : > { %807 = vrot.lane.b32.xlu0 %v6317_v10, %s6845_s23  ;;  %v1356_v47 = vshll.u32 %v7163_v40, 16  ;;  %v1354_v50 = vshrl.u32 %v7163_v40, 16  ;;  %v1363_v58 = vrot.slane %v1361_v52, 1  ;;  %v1175_v55 = vor.u32 %v1173_v44, %v1172_v53 }
  0x3f   : > { %v1568_v61 = vrot.slane %v7163_v40, 1  ;;  %v7210_v32 = vcombine.low %v7206_v7, %v7206_v7  ;;  %v7214_v56 = vsel %vm6946_vm2, %v1172_v53, 0  ;;  %vm2681_vm14 = vcmask 1046532  }
  0x40   : > { %v1358_v51 = vrot.slane %v1356_v47, 1  ;;  %v7190_v63 = vsel %vm6946_vm2, 0, %v1175_v55  ;;  %v1572_v10 = vrot.slane %v7214_v56, 1  ;;  %vm7250_vm15 = vmor %vm2680_vm13, %vm2681_vm14  ;;  %vm1887_vm0 = vcmask 261120  }
  0x41   : > { %v1571_v9 = vrot.slane %v7190_v63, 1  ;;  %vm2018_vm1 = vcmask 785408   ;;  %vm1920_vm3 = vcmask 392192   ;;  %vm1985_vm4 = vcmask 654336  }
  0x42   : > { %v1359_v57 = vor.u32 %v1358_v51, %v1354_v50  ;;  %v6776_v50 = vld [vmem:[%s10233_s6 + $0x48] sm:$0xff]  }
  0x43   : > { %v6777_v51 = vld [vmem:[%s10233_s6 + $0x8] sm:$0xff]  }
  0x9a   : > { %v802_v11 = vpop.permute.xlu0 %801 }
  0x9b   : > { %v828_v12 = vsel %vm809_vm6, %v6310_v24, %v802_v11 }
  0x9c   : > { %1009 = vmatprep.mubr.bf16.mxu0 %v828_v12 }
  0x9e   : > { %v785_v14 = vpop.permute.xlu0 %784 }
  0x9f   : > { %v812_v15 = vsel %vm809_vm6, %v6302_v13, %v785_v14  ;;  %v2569_v14 = vshrl.u32 %v7210_v32, 16 }
  0xa0   : > { %v804_v16 = vpop.permute.xlu1 %803  ;;  %1010 = vmatmul.mubr.bf16.vlgmr.msra.gmra.mrb[0].mxu0 %v812_v15  ;;  %v2572_v15 = vshll.u32 %v7210_v32, 16 }
  0xa1   : > { %v832_v17 = vsel %vm809_vm6, %v6311_v33, %v804_v16  ;;  %v1323_v33 = vsel %vm6946_vm2, %v6937_v1, 0  ;;  %6572 = vmatpush3.bf16.msra.mxu0 %v6775_v28 }
  0xa2   : > { %1017 = vmatprep.mubr.bf16.mxu0 %v832_v17  ;;  %v1349_v37 = vshll.u32 %v1323_v33, 16  ;;  %v1566_v39 = vrot.slane %v1323_v33, 1  ;;  %6573 = vmatprep.subr.bf16.mxu0 %v6776_v50 }
  0xa4   : > { %v787_v18 = vpop.permute.xlu1 %786  ;;  %v1351_v46 = vrot.slane %v1349_v37, 1  ;;  %v7167_v1 = vsel %vm1564_vm7, %v1565_v38, %v1566_v39 }
  0xa5   : > { %v816_v19 = vsel %vm809_vm6, %v6303_v42, %v787_v18  ;;  %v1347_v42 = vor.u32 %v1346_v36, %v1342_v35  ;;  %10303 = vst [vmem:[#allocation3_spill] sm:$0xff] %v7167_v1  ;;  %1662 = vrot.lane.b32.xlu1 %v7167_v1, %s6846_s15  ;;  %v7227_v18 = vsel %vm1564_vm7, %v1571_v9, %v1572_v10 }
  0xa6   : > { %6361 = vmatprep.mubr.msk.bf16.mxu1 %vm1854_vm12, %v7227_v18  ;;  %6574 = vmatpush3.bf16.msra.mxu0 %v6777_v51 }
  0xa8   : > { %1018 = vmatmul.mubr.bf16.gmra.mrb[4].mxu0 %v816_v19  ;;  %v789_v20 = vpop.permute.xlu1 %788 }
  0xa9   : > { %v820_v43 = vsel %vm809_vm6, %v6304_v60, %v789_v20  ;;  %v7181_v60 = vsel %vm1340_vm8, %v1359_v57, %v1363_v58 }
  0xaa   : > { %1726 = vrot.lane.b32.xlu1 %v7181_v60, %s6845_s23 }
  0xab   : > { %v806_v21 = vpop.permute.xlu0 %805 }
  0xac   : > { %v836_v22 = vsel %vm809_vm6, %v6312_v49, %v806_v21  ;;  %v7174_v49 = vsel %vm1340_vm8, %v1347_v42, %v1351_v46  ;;  %v2571_v21 = vrot.slane %v2569_v14, 4  ;;  %v6401_v46 = vrot.slane %v7210_v32, 9 }
  0xad   : > { %1025 = vmatprep.mubr.bf16.mxu0 %v836_v22  ;;  %10304 = vst [vmem:[#allocation4_spill] sm:$0xff] %v7174_v49  ;;  %1630 = vrot.lane.b32.xlu0 %v7174_v49, %s6847_s16  ;;  %v2574_v22 = vrot.slane %v2572_v15, 5 }
  0xae   : > { %1790 = vrot.lane.b32.xlu1 %v7190_v63, %s6849_s18 }
  0xaf   : > { %v791_v25 = vpop.permute.xlu1 %790  ;;  %v2575_v35 = vor.u32 %v2574_v22, %v2571_v21 }
  0xb0   : > { %1026 = vmatmul.mubr.bf16.gmra.mrb[8].mxu0 %v820_v43  ;;  %v808_v23 = vpop.permute.xlu0 %807  ;;  %v824_v26 = vsel %vm809_vm6, %v6305_v6, %v791_v25 }
  0xb1   : > { %v840_v24 = vsel %vm809_vm6, %v6313_v2, %v808_v23  ;;  %1694 = vrot.lane.b32.xlu0 %v7163_v40, %s6848_s17  ;;  %v7195_v2 = vsel %vm1564_vm7, %v1568_v61, %v1569_v62  ;;  %v2576_v32 = vrot.slane %v2575_v35, 4 }
  0xb2   : > { %1033 = vmatprep.mubr.bf16.mxu0 %v840_v24 }
  0xb5   : > { %1758 = vrot.lane.b32.xlu0 %v7195_v2, %s6850_s22 }
  0xb8   : > { %1034 = vmatmul.mubr.bf16.gmra.mrb[12].mxu0 %v824_v26  ;;  %v6386_v26 = vcombine.high %v7206_v7, %v7206_v7 }
  0xba   : > { %v2685_v47 = vrot.slane %v6386_v26, 5  ;;  %v2578_v48 = vshll.u32 %v6386_v26, 16 }
  0xbc   : > { %v7263_v10 = vsel %vm7250_vm15, %v6401_v46, %v2685_v47 }
 0x173   : > { %v6547_v41 = vpop.f32.mrb[0].mxu0 }
 0x174   : > { %v6548_v8 = vpop.f32.mrb[1].mxu0 }
 0x175   : > { %v6549_v11 = vadd.f32 %v6548_v8, %v6547_v41  ;;  %v6550_v12 = vpop.f32.mrb[2].mxu0 }
 0x176   : > { %v6551_v13 = vpop.f32.mrb[3].mxu0 }
 0x177   : > { %v1012_v16 = vadd.f32 %v6549_v11, %v7219_v5  ;;  %v6552_v17 = vadd.f32 %v6551_v13, %v6550_v12  ;;  %v2580_v11 = vrot.slane %v2578_v48, 5  ;;  %v6778_v12 = vld [vmem:[%s10233_s6 + $0x50] sm:$0xff]  }
 0x178   : > { %v6779_v13 = vld [vmem:[%s10233_s6 + $0x10] sm:$0xff]   ;;  %6575 = vmatprep.subr.bf16.mxu0 %v6778_v12 }
 0x179   : > { %v1042_v19 = vmax.f32 %v1012_v16, 0.0  ;;  %v1015_v20 = vadd.f32 %v6552_v17, %v7219_v5  ;;  %6576 = vmatpush3.bf16.msra.mxu0 %v6779_v13 }
 0x17b   : > { %v6523_v43 = vpack.c.bf16 %v1042_v19, %v1042_v19  ;;  %v1043_v23 = vmax.f32 %v1015_v20, 0.0  ;;  %v6553_v24 = vpop.f32.mrb[4].mxu0 }
 0x17c   : > { %v6554_v25 = vpop.f32.mrb[5].mxu0 }
 0x17d   : > { %v2445_v29 = vshrl.u32 %v6523_v43, 16  ;;  %v6524_v30 = vpack.c.bf16 %v1043_v23, %v1043_v23  ;;  %v6555_v31 = vadd.f32 %v6554_v25, %v6553_v24  ;;  %v6556_v33 = vpop.f32.mrb[6].mxu0  ;;  %v2448_v37 = vshll.u32 %v6523_v43, 16 }
 0x17e   : > { %v6557_v34 = vpop.f32.mrb[7].mxu0 }
 0x17f   : > { %v2447_v36 = vrot.slane %v2445_v29, 7  ;;  %v2452_v38 = vshrl.u32 %v6524_v30, 16  ;;  %v1020_v39 = vadd.f32 %v6555_v31, %v7219_v5  ;;  %v6558_v42 = vadd.f32 %v6557_v34, %v6556_v33  ;;  %v6780_v33 = vld [vmem:[%s10233_s6 + $0x58] sm:$0xff]  }
 0x180   : > { %v2455_v57 = vshll.u32 %v6524_v30, 16  ;;  %v7290_v31 = vsel %vm6997_vm5, %v2576_v32, %v2580_v11  ;;  %v6781_v34 = vld [vmem:[%s10233_s6 + $0x18] sm:$0xff]   ;;  %6577 = vmatprep.subr.bf16.mxu0 %v6780_v33  ;;  %v6785_v32 = vld [vmem:[%s10233_s6 + $0x68] sm:$0xff]  }
 0x181   : > { %v2450_v52 = vor.u32 %v2448_v37, %v2447_v36  ;;  %v2454_v54 = vrot.slane %v2452_v38, 7  ;;  %v1044_v58 = vmax.f32 %v1020_v39, 0.0  ;;  %v1023_v53 = vadd.f32 %v6558_v42, %v7219_v5  ;;  %6578 = vmatpush3.bf16.msra.mxu0 %v6781_v34 }
 0x183   : > { %v2457_v44 = vor.u32 %v2455_v57, %v2454_v54  ;;  %v6525_v55 = vpack.c.bf16 %v1044_v58, %v1044_v58  ;;  %v6559_v61 = vpop.f32.mrb[8].mxu0  ;;  %v2508_v62 = vsel %vm6946_vm2, 0, %v2450_v52  ;;  %v1045_v41 = vmax.f32 %v1023_v53, 0.0 }
 0x184   : > { %v6560_v8 = vpop.f32.mrb[9].mxu0  ;;  %v7259_v9 = vsel %vm7199_vm11, %v2508_v62, 0  ;;  %v6784_v62 = vld [vmem:[%s10233_s6 + $0x20] sm:$0xff]  }
 0x185   : > { %v2459_v14 = vshrl.u32 %v6525_v55, 16  ;;  %v2462_v15 = vshll.u32 %v6525_v55, 16  ;;  %v6561_v16 = vadd.f32 %v6560_v8, %v6559_v61  ;;  %v6562_v17 = vpop.f32.mrb[10].mxu0  ;;  %v2509_v19 = vsel %vm6946_vm2, 0, %v2457_v44  ;;  %v6783_v61 = vld [vmem:[%s10233_s6 + $0x60] sm:$0xff]  }
 0x186   : > { %v6526_v20 = vpack.c.bf16 %v1045_v41, %v1045_v41  ;;  %v6563_v21 = vpop.f32.mrb[11].mxu0  ;;  %v2521_v22 = vsel %vm7199_vm11, %v2509_v19, 0  ;;  %v7277_v43 = vcombine.low %v7259_v9, %v7259_v9  ;;  %v7281_v23 = vcombine.high %v7259_v9, %v7259_v9  ;;  %6579 = vmatprep.subr.bf16.mxu0 %v6783_v61 }
 0x187   : > { %v2461_v24 = vrot.slane %v2459_v14, 7  ;;  %v1028_v25 = vadd.f32 %v6561_v16, %v7219_v5  ;;  %v6564_v26 = vadd.f32 %v6563_v21, %v6562_v17  ;;  %v7284_v27 = vcombine.low %v2521_v22, %v2521_v22  ;;  %6580 = vmatpush3.bf16.msra.mxu0 %v6784_v62 }
 0x188   : > { %v2466_v28 = vshrl.u32 %v6526_v20, 16  ;;  %v6424_v29 = vcombine.low %v7259_v9, %v2521_v22  ;;  %v6402_v30 = vrot.slane %v7277_v43, 9  ;;  %v2689_v38 = vrot.slane %v7281_v23, 5  ;;  %6581 = vmatprep.subr.bf16.mxu0 %v6785_v32 }
 0x189   : > { %v2464_v35 = vor.u32 %v2462_v15, %v2461_v24  ;;  %v1046_v36 = vmax.f32 %v1028_v25, 0.0  ;;  %v1031_v37 = vadd.f32 %v6564_v26, %v7219_v5  ;;  %v2469_v42 = vshll.u32 %v6526_v20, 16 }
 0x18a   : > { %v2468_v39 = vrot.slane %v2466_v28, 7  ;;  %2786 = vrot.lane.b32.xlu1 %v6424_v29, %s6849_s18  ;;  %v7301_v46 = vcombine.high %v2521_v22, %v2521_v22  ;;  %v6403_v47 = vrot.slane %v7284_v27, 9  ;;  %v2690_v52 = vsel %vm7250_vm15, %v6402_v30, %v2689_v38  ;;  %v6788_v38 = vld [vmem:[%s10233_s6 + $0x70] sm:$0xff]  }
 0x18b   : > { %v6527_v48 = vpack.c.bf16 %v1046_v36, %v1046_v36  ;;  %v1047_v50 = vmax.f32 %v1031_v37, 0.0  ;;  %v6565_v51 = vpop.f32.mrb[12].mxu0  ;;  %v2510_v54 = vsel %vm6946_vm2, 0, %v2464_v35  ;;  %v6420_v53 = vcombine.low %v7263_v10, %v2690_v52  ;;  %v6786_v36 = vld [vmem:[%s10233_s6 + $0x28] sm:$0xff]   ;;  %v6787_v37 = vld [vmem:[%s10231_s4] sm:$0xff]  }
 0x18c   : > { %v2471_v57 = vor.u32 %v2469_v42, %v2468_v39  ;;  %v6566_v58 = vpop.f32.mrb[13].mxu0  ;;  %v2693_v44 = vrot.slane %v7301_v46, 5  ;;  %v2522_v55 = vsel %vm7199_vm11, %v2510_v54, 0  ;;  %v2583_v13 = vshrl.u32 %v7277_v43, 16  ;;  %6582 = vmatpush3.bf16.msra.mxu0 %v6786_v36  ;;  %2228 = vmatpush1.bf16.msra.mxu1 %v6787_v37 }
 0x18d   : > { %v2473_v41 = vshrl.u32 %v6527_v48, 16  ;;  %v6528_v8 = vpack.c.bf16 %v1047_v50, %v1047_v50  ;;  %v6567_v11 = vadd.f32 %v6566_v58, %v6565_v51  ;;  %v6568_v12 = vpop.f32.mrb[14].mxu0  ;;  %v2476_v14 = vshll.u32 %v6527_v48, 16  ;;  %6583 = vmatprep.subr.bf16.mxu0 %v6788_v38  ;;  %2229 = vmatprep.subr.bf16.mxu1 %v10242_v0 }
 0x18e   : > { %2774 = vrot.lane.b32.xlu1 %v6420_v53, %s6845_s23  ;;  %v6569_v15 = vpop.f32.mrb[15].mxu0  ;;  %v7325_v16 = vsel %vm7250_vm15, %v6403_v47, %v2693_v44  ;;  %v2511_v17 = vsel %vm6946_vm2, 0, %v2471_v57  ;;  %v7329_v19 = vcombine.low %v2521_v22, %v2522_v55  ;;  %v7332_v25 = vcombine.low %v2522_v55, %v2522_v55  ;;  %v6789_v57 = vld [vmem:[%s10233_s6 + $0x30] sm:$0xff]  }
 0x18f   : > { %v2475_v20 = vrot.slane %v2473_v41, 7  ;;  %v2480_v21 = vshrl.u32 %v6528_v8, 16  ;;  %v1036_v24 = vadd.f32 %v6567_v11, %v7219_v5  ;;  %v2483_v26 = vshll.u32 %v6528_v8, 16 }
 0x190   : > { %v6570_v28 = vadd.f32 %v6569_v15, %v6568_v12  ;;  %v6432_v29 = vcombine.low %v2690_v52, %v7325_v16  ;;  %v2523_v30 = vsel %vm7199_vm11, %v2511_v17, 0  ;;  %v2585_v35 = vrot.slane %v2583_v13, 4  ;;  %6584 = vmatpush3.bf16.msra.mxu0 %v6789_v57 }
 0x191   : > { %v2482_v33 = vrot.slane %v2480_v21, 7  ;;  %v1048_v34 = vmax.f32 %v1036_v24, 0.0  ;;  %v7337_v22 = vcombine.low %v2523_v30, %v2523_v30  ;;  %v2478_v39 = vor.u32 %v2476_v14, %v2475_v20  ;;  %v6792_v20 = vld [vmem:[%s10233_s6 + $0x38] sm:$0xff]  }
 0x192   : > { %v1039_v42 = vadd.f32 %v6570_v28, %v7219_v5  ;;  %2804 = vrot.lane.b32.xlu0 %v6432_v29, %s6846_s15  ;;  %v6425_v47 = vcombine.low %v2522_v55, %v2523_v30  ;;  %v2586_v48 = vshll.u32 %v7277_v43, 16  ;;  %v7351_v52 = vcombine.high %v2522_v55, %v2522_v55  ;;  %v6790_v43 = vld [vmem:[%s10231_s4 + $0x8] sm:$0xff]   ;;  %v6791_v55 = vld [vmem:[%s10233_s6 + $0x78] sm:$0xff]  }
 0x193   : > { %v2485_v50 = vor.u32 %v2483_v26, %v2482_v33  ;;  %v6529_v51 = vpack.c.bf16 %v1048_v34, %v1048_v34  ;;  %v7353_v54 = vcombine.high %v2523_v30, %v2523_v30  ;;  %v2592_v53 = vshll.u32 %v7281_v23, 16  ;;  %2230 = vmatpush1.bf16.msra.mxu1 %v6790_v43  ;;  %6585 = vmatprep.subr.bf16.mxu0 %v6791_v55 }
 0x194   : > { %v1049_v58 = vmax.f32 %v1039_v42, 0.0  ;;  %2788 = vrot.lane.b32.xlu1 %v6425_v47, %s6849_s18  ;;  %v2588_v5 = vrot.slane %v2586_v48, 5  ;;  %v6404_v44 = vrot.slane %v7332_v25, 9  ;;  %v2697_v32 = vrot.slane %v7351_v52, 5  ;;  %2231 = vmatprep.subr.bf16.mxu1 %v10242_v0 }
 0x195   : > { %v2487_v61 = vshrl.u32 %v6529_v51, 16  ;;  %v2490_v62 = vshll.u32 %v6529_v51, 16  ;;  %v6405_v41 = vrot.slane %v7337_v22, 9  ;;  %v2701_v11 = vrot.slane %v7353_v54, 5  ;;  %6586 = vmatpush3.bf16.msra.mxu0 %v6792_v20 }
 0x196   : > { %v6530_v23 = vpack.c.bf16 %v1049_v58, %v1049_v58  ;;  %2813 = vrot.lane.b32.xlu0 %v7329_v19, %s6845_s23  ;;  %v2589_v8 = vor.u32 %v2588_v5, %v2585_v35  ;;  %v2512_v12 = vsel %vm6946_vm2, 0, %v2478_v39  ;;  %v2698_v14 = vsel %vm7250_vm15, %v6404_v44, %v2697_v32  ;;  %v6793_v58 = vld [vmem:[%s10231_s4 + $0x10] sm:$0xff]  }
 0x197   : > { %v2489_v13 = vrot.slane %v2487_v61, 7  ;;  %v7379_v15 = vsel %vm7199_vm11, %v2512_v12, 0  ;;  %v2513_v17 = vsel %vm6946_vm2, 0, %v2485_v50  ;;  %v2594_v26 = vrot.slane %v2592_v53, 5  ;;  %2232 = vmatpush1.bf16.msra.mxu1 %v6793_v58 }
 0x198   : > { %v2494_v21 = vshrl.u32 %v6530_v23, 16  ;;  %v2590_v24 = vrot.slane %v2589_v8, 4  ;;  %v2702_v28 = vsel %vm7250_vm15, %v6405_v41, %v2701_v11  ;;  %v2497_v33 = vshll.u32 %v6530_v23, 16  ;;  %2233 = vmatprep.subr.bf16.mxu1 %v10242_v0  ;;  %v6794_v23 = vld [vmem:[%s10231_s4 + $0x18] sm:$0xff]  }
 0x199   : > { %v2492_v29 = vor.u32 %v2490_v62, %v2489_v13  ;;  %v6433_v34 = vcombine.low %v2698_v14, %v2702_v28  ;;  %v7389_v35 = vcombine.low %v7325_v16, %v2698_v14  ;;  %v7397_v38 = vcombine.low %v2523_v30, %v7379_v15  ;;  %v7440_v13 = vld [vmem:[%s7082_s26 + $0x10] sm:$0xff]  }
 0x19a   : > { %v2496_v36 = vrot.slane %v2494_v21, 7  ;;  %v7394_v37 = vsel %vm6997_vm5, %v2590_v24, %v2594_v26  ;;  %v2525_v39 = vsel %vm7199_vm11, %v2513_v17, 0  ;;  %v7406_v16 = vcombine.low %v7379_v15, %v7379_v15 }
 0x19b   : > { %v6416_v42 = vcombine.low %v7290_v31, %v7394_v37  ;;  %2806 = vrot.lane.b32.xlu0 %v6433_v34, %s6846_s15  ;;  %v6426_v47 = vcombine.low %v7379_v15, %v2525_v39  ;;  %v2597_v48 = vshrl.u32 %v7284_v27, 16  ;;  %v7410_v50 = vcombine.low %v2525_v39, %v2525_v39  ;;  %2234 = vmatpush1.bf16.msra.mxu1 %v6794_v23 }
 0x19c   : > { %v2600_v30 = vshll.u32 %v7284_v27, 16  ;;  %v2606_v51 = vshll.u32 %v7301_v46, 16  ;;  %v2611_v57 = vshrl.u32 %v7332_v25, 16  ;;  %v2499_v5 = vor.u32 %v2497_v33, %v2496_v36  ;;  %2235 = vmatprep.subr.bf16.mxu1 %v10242_v0 }
 0x19d   : > { %2754 = vrot.lane.b32.xlu1 %v6416_v42, %s6846_s15  ;;  %v2599_v53 = vrot.slane %v2597_v48, 4  ;;  %v2614_v44 = vshll.u32 %v7332_v25, 16  ;;  %v7422_v43 = vcombine.high %v7379_v15, %v7379_v15  ;;  %v2620_v46 = vshll.u32 %v7351_v52, 16  ;;  %v6795_v48 = vld [vmem:[%s10231_s4 + $0x20] sm:$0xff]  }
 0x19e   : > { %v2602_v55 = vrot.slane %v2600_v30, 5  ;;  %v2613_v27 = vrot.slane %v2611_v57, 4  ;;  %v7425_v61 = vcombine.high %v2525_v39, %v2525_v39  ;;  %v2608_v62 = vrot.slane %v2606_v51, 5 }
 0x19f   : > { %2815 = vrot.lane.b32.xlu0 %v7397_v38, %s6845_s23  ;;  %v2616_v32 = vrot.slane %v2614_v44, 5  ;;  %v6406_v41 = vrot.slane %v7406_v16, 9  ;;  %v2705_v25 = vrot.slane %v7422_v43, 5  ;;  %v6407_v52 = vrot.slane %v7410_v50, 9  ;;  %2236 = vmatpush1.bf16.msra.mxu1 %v6795_v48 }
 0x1a0   : > { %v2603_v8 = vor.u32 %v2602_v55, %v2599_v53  ;;  %v2709_v11 = vrot.slane %v7425_v61, 5  ;;  %v2514_v12 = vsel %vm6946_vm2, 0, %v2492_v29  ;;  %v2515_v20 = vsel %vm6946_vm2, 0, %v2499_v5  ;;  %2237 = vmatprep.subr.bf16.mxu1 %v10242_v0 }
 0x1a1   : > { %2776 = vrot.lane.b32.xlu1 %v7389_v35, %s6845_s23  ;;  %v2617_v14 = vor.u32 %v2616_v32, %v2613_v27  ;;  %v2706_v15 = vsel %vm7250_vm15, %v6406_v41, %v2705_v25  ;;  %v7448_v17 = vsel %vm7199_vm11, %v2514_v12, 0  ;;  %v2622_v24 = vrot.slane %v2620_v46, 5  ;;  %v6796_v27 = vld [vmem:[%s10231_s4 + $0x28] sm:$0xff]  }
 0x1a2   : > { %v2604_v21 = vrot.slane %v2603_v8, 4  ;;  %v2710_v26 = vsel %vm7250_vm15, %v6407_v52, %v2709_v11  ;;  %v7454_v29 = vcombine.low %v2702_v28, %v2706_v15  ;;  %v7457_v36 = vcombine.low %v2525_v39, %v7448_v17 }
 0x1a3   : > { %v2618_v33 = vrot.slane %v2617_v14, 4  ;;  %v6434_v34 = vcombine.low %v2706_v15, %v2710_v26  ;;  %v7461_v42 = vsel %vm7199_vm11, %v2515_v20, 0  ;;  %v7473_v30 = vcombine.low %v7448_v17, %v7448_v17  ;;  %2238 = vmatpush1.bf16.msra.mxu1 %v6796_v27 }
 0x1a4   : > { %v7469_v28 = vsel %vm6997_vm5, %v2604_v21, %v2608_v62  ;;  %v6427_v39 = vcombine.low %v7448_v17, %v7461_v42  ;;  %v1177_v6 = vshrl.u32 %v7440_v13, 16  ;;  %v2625_v58 = vshrl.u32 %v7337_v22, 16  ;;  %2239 = vmatprep.subr.bf16.mxu1 %v10242_v0 }
 0x1a5   : > { %2790 = vrot.lane.b32.xlu1 %v6426_v47, %s6849_s18  ;;  %v7481_v51 = vsel %vm6997_vm5, %v2618_v33, %v2622_v24  ;;  %v2628_v5 = vshll.u32 %v7337_v22, 16  ;;  %v2634_v44 = vshll.u32 %v7353_v54, 16  ;;  %v2639_v55 = vshrl.u32 %v7406_v16, 16 }
 0x1a6   : > { %v6417_v53 = vcombine.low %v7469_v28, %v7481_v51  ;;  %v2642_v47 = vshll.u32 %v7406_v16, 16  ;;  %v2627_v46 = vrot.slane %v2625_v58, 4  ;;  %v2648_v32 = vshll.u32 %v7422_v43, 16 }
 0x1a7   : > { %v2630_v62 = vrot.slane %v2628_v5, 5  ;;  %v6400_v22 = vcombine.high %v7448_v17, %v7448_v17  ;;  %v6409_v54 = vcombine.low %v7461_v42, %v7461_v42  ;;  %v2641_v16 = vrot.slane %v2639_v55, 4 }
 0x1a8   : > { %2822 = vrot.lane.b32.xlu0 %v6417_v53, %s6849_s18  ;;  %v2644_v41 = vrot.slane %v2642_v47, 5  ;;  %v6408_v25 = vrot.slane %v7473_v30, 9  ;;  %v2636_v8 = vrot.slane %v2634_v44, 5  ;;  %v6410_v43 = vcombine.high %v7461_v42, %v7461_v42 }
 0x1a9   : > { %2756 = vrot.lane.b32.xlu1 %v6417_v53, %s6846_s15  ;;  %v2631_v23 = vor.u32 %v2630_v62, %v2627_v46  ;;  %v2713_v52 = vrot.slane %v6400_v22, 5  ;;  %v6411_v12 = vrot.slane %v6409_v54, 9  ;;  %v2653_v14 = vshrl.u32 %v7410_v50, 16 }
 0x1aa   : > { %v2645_v11 = vor.u32 %v2644_v41, %v2641_v16  ;;  %v2656_v15 = vshll.u32 %v7410_v50, 16  ;;  %v2650_v21 = vrot.slane %v2648_v32, 5  ;;  %v2736_v33 = vrot.slane %v6410_v43, 5  ;;  %v6797_v50 = vld [vmem:[%s10231_s4 + $0x30] sm:$0xff]   ;;  %v6798_v41 = vld [vmem:[%s10231_s4 + $0x38] sm:$0xff]  }
 0x1ab   : > { %v2632_v20 = vrot.slane %v2631_v23, 4  ;;  %v7510_v24 = vsel %vm7250_vm15, %v6408_v25, %v2713_v52  ;;  %v2655_v5 = vrot.slane %v2653_v14, 4  ;;  %v2667_v55 = vshrl.u32 %v7473_v30, 16  ;;  %2240 = vmatpush1.bf16.msra.mxu1 %v6797_v50 }
 0x1ac   : > { %2808 = vrot.lane.b32.xlu0 %v6434_v34, %s6846_s15  ;;  %v2646_v48 = vrot.slane %v2645_v11, 4  ;;  %v7515_v58 = vcombine.low %v2710_v26, %v7510_v24  ;;  %v2658_v53 = vrot.slane %v2656_v15, 5  ;;  %v7528_v34 = vsel %vm7250_vm15, %v6411_v12, %v2736_v33  ;;  %2241 = vmatprep.subr.bf16.mxu1 %v10242_v0 }
 0x1ad   : > { %2778 = vrot.lane.b32.xlu1 %v7454_v29, %s6845_s23  ;;  %v7524_v44 = vsel %vm6997_vm5, %v2632_v20, %v2636_v8  ;;  %v2662_v26 = vshll.u32 %v7425_v61, 16  ;;  %v6435_v46 = vcombine.low %v7510_v24, %v7528_v34  ;;  %v2669_v32 = vrot.slane %v2667_v55, 4 }
 0x1ae   : > { %v7534_v47 = vsel %vm6997_vm5, %v2646_v48, %v2650_v21  ;;  %v2659_v61 = vor.u32 %v2658_v53, %v2655_v5  ;;  %v2670_v16 = vshll.u32 %v7473_v30, 16  ;;  %v2676_v25 = vshll.u32 %v6400_v22, 16 }
 0x1af   : > { %v6418_v59 = vcombine.low %v7524_v44, %v7534_v47  ;;  %v2721_v23 = vshrl.u32 %v6409_v54, 16  ;;  %v2724_v8 = vshll.u32 %v6409_v54, 16  ;;  %v2664_v11 = vrot.slane %v2662_v26, 5  ;;  %2242 = vmatpush1.bf16.msra.mxu1 %v6798_v41 }
 0x1b0   : > { %2817 = vrot.lane.b32.xlu0 %v7457_v36, %s6845_s23  ;;  %v2660_v52 = vrot.slane %v2659_v61, 4  ;;  %v2672_v30 = vrot.slane %v2670_v16, 5  ;;  %v1180_v12 = vshll.u32 %v7440_v13, 16  ;;  %v6436_v14 = vcombine.low %v7461_v42, %v7206_v7  ;;  %2243 = vmatprep.subr.bf16.mxu1 %v10242_v0 }
 0x1b1   : > { %2792 = vrot.lane.b32.xlu1 %v6427_v39, %s6849_s18  ;;  %v2723_v15 = vrot.slane %v2721_v23, 4  ;;  %v2726_v20 = vrot.slane %v2724_v8, 5  ;;  %v2730_v21 = vshll.u32 %v6410_v43, 16  ;;  %v2678_v24 = vrot.slane %v2676_v25, 5  ;;  %v6799_v43 = vld [vmem:[%s10231_s4 + $0x40] sm:$0xff]  }
 0x1b2   : > { %v7560_v22 = vsel %vm6997_vm5, %v2660_v52, %v2664_v11  ;;  %v2673_v54 = vor.u32 %v2672_v30, %v2669_v32  ;;  %v1179_v17 = vrot.slane %v1177_v6, 7  ;;  %v1368_v48 = vshll.u32 %v7190_v63, 16  ;;  %v7600_v25 = vld [vmem:[%s10233_s6 + $0x80] sm:$0xff]   ;;  %v6771_v11 = vld [vmem:[%s7082_s26 + $0x18] sm:$0xff]  }
 0x1b3   : > { %v2727_v39 = vor.u32 %v2726_v20, %v2723_v15  ;;  %v2732_v13 = vrot.slane %v2730_v21, 5  ;;  %2244 = vmatpush1.bf16.msra.mxu1 %v6799_v43  ;;  %v1366_v55 = vshrl.u32 %v7190_v63, 16  ;;  %v1373_v32 = vshll.u32 %v7214_v56, 16  ;;  %6657 = vmatprep.subr.bf16.mxu0 %v7600_v25  ;;  %v6772_v20 = vld [vmem:[%s7082_s26 + $0x20] sm:$0xff]  }
 0x1b4   : > { %2819 = vrot.lane.b32.xlu0 %v6436_v14, %s6845_s23  ;;  %v2674_v33 = vrot.slane %v2673_v54, 4  ;;  %v1182_v53 = vor.u32 %v1180_v12, %v1179_v17  ;;  %v1370_v61 = vrot.slane %v1368_v48, 1  ;;  %v1326_v23 = vsel %vm6946_vm2, %v1179_v17, 0 }
 0x1b5   : > { %2758 = vrot.lane.b32.xlu1 %v6418_v59, %s6846_s15  ;;  %v2728_v5 = vrot.slane %v2727_v39, 4  ;;  %v1375_v41 = vrot.slane %v1373_v32, 1  ;;  %v1385_v52 = vshll.u32 %v1326_v23, 16  ;;  %v1184_v15 = vshrl.u32 %v6771_v11, 16 }
 0x1b6   : > { %v7575_v6 = vsel %vm6997_vm5, %v2674_v33, %v2678_v24  ;;  %v1371_v45 = vor.u32 %v1370_v61, %v1366_v55  ;;  %v1187_v24 = vshll.u32 %v6771_v11, 16  ;;  %v1191_v17 = vshrl.u32 %v6772_v20, 16 }
 0x1b7   : > { %v6419_v50 = vcombine.low %v7560_v22, %v7575_v6  ;;  %v7582_v26 = vsel %vm6997_vm5, %v2728_v5, %v2732_v13  ;;  %v1387_v14 = vrot.slane %v1385_v52, 1  ;;  %v1186_v54 = vrot.slane %v1184_v15, 7 }
 0x1b8   : > { %2824 = vrot.lane.b32.xlu0 %v6418_v59, %s6849_s18  ;;  %v7592_v59 = vsel %vm6946_vm2, 0, %v1182_v53  ;;  %v6437_v30 = vcombine.low %v7582_v26, %v7290_v31  ;;  %v1193_v39 = vrot.slane %v1191_v17, 7  ;;  %v1194_v43 = vshll.u32 %v6772_v20, 16 }
 0x1b9   : > { %2780 = vrot.lane.b32.xlu1 %v7515_v58, %s6845_s23  ;;  %v1380_v56 = vshll.u32 %v7592_v59, 16  ;;  %v1189_v31 = vor.u32 %v1187_v24, %v1186_v54  ;;  %v1327_v5 = vsel %vm6946_vm2, %v1186_v54, 0  ;;  %v1575_v53 = vrot.slane %v1326_v23, 1  ;;  %v6782_v54 = vld [vmem:[%s7082_s26 + $0x30] sm:$0xff]  }
 0x1ba   : > { %v1196_v48 = vor.u32 %v1194_v43, %v1193_v39  ;;  %v1397_v61 = vshll.u32 %v1327_v5, 16  ;;  %vm2051_vm5 = vcmask 916480  }
 0x1bb   : > { %v1382_v8 = vrot.slane %v1380_v56, 1  ;;  %v7629_v33 = vsel %vm6946_vm2, 0, %v1189_v31 }
 0x1bc   : > { %2810 = vrot.lane.b32.xlu0 %v6435_v46, %s6846_s15  ;;  %v1378_v46 = vshrl.u32 %v7592_v59, 16  ;;  %10309 = vst [vmem:[#allocation5_spill] sm:$0xff] %v7629_v33  ;;  %v7639_v13 = vsel %vm6946_vm2, 0, %v1196_v48  ;;  %v1399_v23 = vrot.slane %v1397_v61, 1  ;;  %v7674_v48 = vpop.permute.xlu1 %1662 }
 0x1bd   : > { %1632 = vrot.lane.b32.xlu1 %v7181_v60, %s6847_s16  ;;  %v1376_v60 = vsel %vm1340_vm8, %v1371_v45, %v1375_v41  ;;  %10310 = vst [vmem:[#allocation6_spill] sm:$0xff] %v7639_v13  ;;  %v1404_v32 = vshll.u32 %v7639_v13, 16  ;;  %v1328_v45 = vsel %vm6946_vm2, %v1193_v39, 0  ;;  %v1205_v39 = vshrl.u32 %v6782_v54, 16 }
 0x1be   : > { %v1383_v12 = vor.u32 %v1382_v8, %v1378_v46  ;;  %v1578_v46 = vrot.slane %v1327_v5, 1  ;;  %v1402_v8 = vshrl.u32 %v7639_v13, 16  ;;  %v1409_v11 = vshll.u32 %v1328_v45, 16 }
 0x1bf   : > { %v1406_v52 = vrot.slane %v1404_v32, 1  ;;  %v1208_v5 = vshll.u32 %v6782_v54, 16 }
 0x1c0   : > { %2826 = vrot.lane.b32.xlu0 %v6419_v50, %s6849_s18  ;;  %v1388_v21 = vsel %vm1340_vm8, %v1383_v12, %v1387_v14  ;;  %v1411_v20 = vrot.slane %v1409_v11, 1 }
 0x1c1   : > { %2760 = vrot.lane.b32.xlu1 %v6419_v50, %s6846_s15  ;;  %v1390_v50 = vshrl.u32 %v7629_v33, 16  ;;  %v1407_v15 = vor.u32 %v1406_v52, %v1402_v8 }
 0x1c3   : > { %v1412_v24 = vsel %vm1340_vm8, %v1407_v15, %v1411_v20 }
 0x1c4   : > { %1822 = vrot.lane.b32.xlu0 %v1376_v60, %s6851_s27 }
 0x1c5   : > { %1696 = vrot.lane.b32.xlu1 %v7190_v63, %s6848_s17 }
 0x1c8   : > { %2828 = vrot.lane.b32.xlu0 %v6437_v30, %s6849_s18  ;;  %v6774_v30 = vld [vmem:[%s7082_s26 + $0x28] sm:$0xff]  }
 0x1c9   : > { %1760 = vrot.lane.b32.xlu1 %v7227_v18, %s6850_s22  ;;  %v1201_v31 = vshll.u32 %v6774_v30, 16 }
 0x1cc   : > { %1664 = vrot.lane.b32.xlu0 %v7195_v2, %s6846_s15  ;;  %v1392_v2 = vshll.u32 %v7629_v33, 16 }
 0x1cd   : > { %1824 = vrot.lane.b32.xlu1 %v1388_v21, %s6851_s27 }
 0x1ce   : > { %v1394_v55 = vrot.slane %v1392_v2, 1  ;;  %v1207_v2 = vrot.slane %v1205_v39, 7 }
 0x1d0   : > { %1728 = vrot.lane.b32.xlu0 %v1376_v60, %s6845_s23  ;;  %v1395_v56 = vor.u32 %v1394_v55, %v1390_v50  ;;  %v7686_v50 = vpop.permute.xlu1 %1726 }
 0x1d1   : > { %1666 = vrot.lane.b32.xlu1 %v7227_v18, %s6846_s15  ;;  %v1574_v18 = vrot.slane %v7592_v59, 1 }
 0x1d2   : > { %v1400_v12 = vsel %vm1340_vm8, %v1395_v56, %v1399_v23  ;;  %v7696_v56 = vpop.permute.xlu0 %1630  ;;  %v1580_v23 = vrot.slane %v7639_v13, 1 }
 0x1d3   : > { %v7652_v41 = vsel %vm1564_vm7, %v1574_v18, %v1575_v53  ;;  %v1210_v53 = vor.u32 %v1208_v5, %v1207_v2 }
 0x1d4   : > { %1792 = vrot.lane.b32.xlu0 %v7592_v59, %s6849_s18 }
 0x1d5   : > { %1730 = vrot.lane.b32.xlu1 %v1388_v21, %s6845_s23  ;;  %v7693_v32 = vsel %vm6946_vm2, 0, %v1210_v53 }
 0x1d6   : > { %v1428_v11 = vshll.u32 %v7693_v32, 16  ;;  %v7716_v54 = vpop.permute.xlu0 %1694 }
 0x1d8   : > { %1634 = vrot.lane.b32.xlu0 %v1376_v60, %s6847_s16  ;;  %v1577_v60 = vrot.slane %v7629_v33, 1  ;;  %v1430_v39 = vrot.slane %v1428_v11, 1 }
 0x1d9   : > { %1794 = vrot.lane.b32.xlu1 %v7629_v33, %s6849_s18 }
 0x1da   : > { %v7664_v14 = vsel %vm1564_vm7, %v1577_v60, %v1578_v46  ;;  %v1581_v60 = vrot.slane %v1328_v45, 1 }
 0x1dc   : > { %1698 = vrot.lane.b32.xlu0 %v7592_v59, %s6848_s17  ;;  %v7712_v45 = vsel %vm1564_vm7, %v1580_v23, %v1581_v60  ;;  %v6803_v60 = vld [vmem:[%s7082_s26 + $0x40] sm:$0xff]  }
 0x1dd   : > { %1636 = vrot.lane.b32.xlu1 %v1388_v21, %s6847_s16  ;;  %v1198_v21 = vshrl.u32 %v6774_v30, 16  ;;  %v7703_v30 = vpop.permute.xlu1 %1790 }
 0x1df   : > { %v1200_v17 = vrot.slane %v1198_v21, 7 }
 0x1e0   : > { %1762 = vrot.lane.b32.xlu0 %v7652_v41, %s6850_s22 }
 0x1e1   : > { %1700 = vrot.lane.b32.xlu1 %v7629_v33, %s6848_s17  ;;  %v1203_v43 = vor.u32 %v1201_v31, %v1200_v17  ;;  %v1329_v61 = vsel %vm6946_vm2, %v1200_v17, 0  ;;  %v1426_v31 = vshrl.u32 %v7693_v32, 16  ;;  %v6804_v33 = vld [vmem:[%s7082_s26 + $0x48] sm:$0xff]  }
 0x1e2   : > { %v1421_v52 = vshll.u32 %v1329_v61, 16  ;;  %v1584_v17 = vrot.slane %v1329_v61, 1 }
 0x1e3   : > { %v7681_v18 = vsel %vm6946_vm2, 0, %v1203_v43 }
 0x1e4   : > { %1826 = vrot.lane.b32.xlu0 %v1400_v12, %s6851_s27  ;;  %10311 = vst [vmem:[#allocation7_spill] sm:$0xff] %v7681_v18  ;;  %v1416_v55 = vshll.u32 %v7681_v18, 16  ;;  %v1414_v46 = vshrl.u32 %v7681_v18, 16  ;;  %v1423_v20 = vrot.slane %v1421_v52, 1  ;;  %v1583_v21 = vrot.slane %v7681_v18, 1 }
 0x1e5   : > { %1764 = vrot.lane.b32.xlu1 %v7664_v14, %s6850_s22 }
 0x1e6   : > { %v1418_v8 = vrot.slane %v1416_v55, 1  ;;  %v7729_v53 = vsel %vm1564_vm7, %v1583_v21, %v1584_v17  ;;  %v1431_v55 = vor.u32 %v1430_v39, %v1426_v31  ;;  %v1222_v39 = vshll.u32 %v6803_v60, 16 }
 0x1e7   : > { %10312 = vst [vmem:[#allocation8_spill] sm:$0xff] %v7729_v53 }
 0x1e8   : > { %1668 = vrot.lane.b32.xlu0 %v7652_v41, %s6846_s15  ;;  %v1419_v15 = vor.u32 %v1418_v8, %v1414_v46  ;;  %v7733_v46 = vpop.permute.xlu0 %1758 }
 0x1e9   : > { %1828 = vrot.lane.b32.xlu1 %v1412_v24, %s6851_s27 }
 0x1ea   : > { %v1424_v5 = vsel %vm1340_vm8, %v1419_v15, %v1423_v20  ;;  %v1219_v20 = vshrl.u32 %v6803_v60, 16 }
 0x1ec   : > { %1732 = vrot.lane.b32.xlu0 %v1400_v12, %s6845_s23  ;;  %v1221_v31 = vrot.slane %v1219_v20, 7 }
 0x1ed   : > { %1670 = vrot.lane.b32.xlu1 %v7664_v14, %s6846_s15 }
 0x1f0   : > { %1796 = vrot.lane.b32.xlu0 %v7639_v13, %s6849_s18 }
 0x1f1   : > { %1734 = vrot.lane.b32.xlu1 %v1412_v24, %s6845_s23 }
 0x1f4   : > { %1638 = vrot.lane.b32.xlu0 %v1400_v12, %s6847_s16  ;;  %v7707_v12 = vsel %vm6946_vm2, %v1207_v2, 0  ;;  %v6801_v2 = vld [vmem:[%s7082_s26 + $0x38] sm:$0xff]  }
 0x1f5   : > { %1798 = vrot.lane.b32.xlu1 %v7681_v18, %s6849_s18  ;;  %v1433_v43 = vshll.u32 %v7707_v12, 16  ;;  %v1212_v23 = vshrl.u32 %v6801_v2, 16  ;;  %v1215_v11 = vshll.u32 %v6801_v2, 16 }
 0x1f7   : > { %v1435_v61 = vrot.slane %v1433_v43, 1  ;;  %v1214_v52 = vrot.slane %v1212_v23, 7 }
 0x1f8   : > { %1702 = vrot.lane.b32.xlu0 %v7639_v13, %s6848_s17 }
 0x1f9   : > { %1640 = vrot.lane.b32.xlu1 %v1412_v24, %s6847_s16  ;;  %v1436_v8 = vsel %vm1340_vm8, %v1431_v55, %v1435_v61  ;;  %v1217_v17 = vor.u32 %v1215_v11, %v1214_v52  ;;  %v1224_v55 = vor.u32 %v1222_v39, %v1221_v31  ;;  %v1331_v60 = vsel %vm6946_vm2, %v1214_v52, 0 }
 0x1fa   : > { %v1587_v39 = vrot.slane %v7707_v12, 1  ;;  %v1445_v42 = vshll.u32 %v1331_v60, 16  ;;  %v6412_v12 = vcombine.low %v7206_v7, %v7259_v9 }
 0x1fb   : > { %v7748_v2 = vsel %vm6946_vm2, 0, %v1217_v17  ;;  %v7760_v20 = vsel %vm6946_vm2, 0, %v1224_v55  ;;  %v1586_v17 = vrot.slane %v7693_v32, 1  ;;  %v7773_v55 = vsel %vm6946_vm2, %v1221_v31, 0 }
 0x1fc   : > { %1766 = vrot.lane.b32.xlu0 %v7712_v45, %s6850_s22  ;;  %v7726_v24 = vpop.permute.xlu1 %2786  ;;  %v1440_v61 = vshll.u32 %v7748_v2, 16  ;;  %v1438_v62 = vshrl.u32 %v7748_v2, 16  ;;  %v1452_v52 = vshll.u32 %v7760_v20, 16  ;;  %v1447_v1 = vrot.slane %v1445_v42, 1 }
 0x1fd   : > { %1704 = vrot.lane.b32.xlu1 %v7681_v18, %s6848_s17  ;;  %v1589_v49 = vrot.slane %v7748_v2, 1  ;;  %v1590_v31 = vrot.slane %v1331_v60, 1  ;;  %v1450_v13 = vshrl.u32 %v7760_v20, 16  ;;  %v1457_v9 = vshll.u32 %v7773_v55, 16 }
 0x1fe   : > { %v1442_v16 = vrot.slane %v1440_v61, 1  ;;  %v7782_v61 = vsel %vm1564_vm7, %v1586_v17, %v1587_v39  ;;  %v1454_v7 = vrot.slane %v1452_v52, 1 }
 0x1ff   : > { %v7803_v60 = vsel %vm1564_vm7, %v1589_v49, %v1590_v31  ;;  %v1459_v52 = vrot.slane %v1457_v9, 1 }
 0x200   : > { %1830 = vrot.lane.b32.xlu0 %v1424_v5, %s6851_s27  ;;  %v2775_v15 = vpop.permute.xlu1 %2774  ;;  %v1443_v57 = vor.u32 %v1442_v16, %v1438_v62  ;;  %v10313_v62 = vcombine.low %v7394_v37, %v7469_v28  ;;  %v1455_v39 = vor.u32 %v1454_v7, %v1450_v13 }
 0x201   : > { %1768 = vrot.lane.b32.xlu1 %v7729_v53, %s6850_s22 }
 0x202   : > { %v1460_v13 = vsel %vm1340_vm8, %v1455_v39, %v1459_v52  ;;  %v10314_v52 = vcombine.low %v7481_v51, %v7524_v44 }
 0x204   : > { %1672 = vrot.lane.b32.xlu0 %v7712_v45, %s6846_s15  ;;  %v2805_v21 = vpop.permute.xlu0 %2804 }
 0x205   : > { %1832 = vrot.lane.b32.xlu1 %v1436_v8, %s6851_s27  ;;  %v2865_v42 = vsel %vm1887_vm0, %v10313_v62, %v2805_v21  ;;  %v1229_v21 = vshll.u32 %v6804_v33, 16 }
 0x206   : > { %v7742_v0 = vpop.permute.xlu1 %2788 }
 0x208   : > { %1736 = vrot.lane.b32.xlu0 %v1424_v5, %s6845_s23  ;;  %v2814_v43 = vpop.permute.xlu0 %2813 }
 0x209   : > { %1674 = vrot.lane.b32.xlu1 %v7729_v53, %s6846_s15 }
 0x20c   : > { %1800 = vrot.lane.b32.xlu0 %v7693_v32, %s6849_s18 }
 0x20d   : > { %1738 = vrot.lane.b32.xlu1 %v1436_v8, %s6845_s23  ;;  %v7754_v23 = vpop.permute.xlu0 %2806 }
 0x20f   : > { %v2755_v11 = vpop.permute.xlu1 %2754 }
 0x210   : > { %1642 = vrot.lane.b32.xlu0 %v1424_v5, %s6847_s16  ;;  %v2833_v18 = vsel %vm1887_vm0, %v6412_v12, %v2755_v11  ;;  %v2876_v11 = vsel %vm809_vm6, %v2865_v42, %v2814_v43  ;;  %v1226_v12 = vshrl.u32 %v6804_v33, 16 }
 0x211   : > { %1802 = vrot.lane.b32.xlu1 %v7748_v2, %s6849_s18  ;;  %v7777_v5 = vpop.permute.xlu0 %2815  ;;  %v2844_v16 = vsel %vm809_vm6, %v2833_v18, %v2775_v15  ;;  %v6802_v18 = vld [vmem:[%s10233_s6 + $0x88] sm:$0xff]  }
 0x212   : > { %v1228_v15 = vrot.slane %v1226_v12, 7 }
 0x213   : > { %v7769_v27 = vpop.permute.xlu1 %2776 }
 0x214   : > { %1706 = vrot.lane.b32.xlu0 %v7693_v32, %s6848_s17  ;;  %v1231_v7 = vor.u32 %v1229_v21, %v1228_v15 }
 0x215   : > { %1644 = vrot.lane.b32.xlu1 %v1436_v8, %s6847_s16  ;;  %v1448_v8 = vsel %vm1340_vm8, %v1443_v57, %v1447_v1  ;;  %v6805_v1 = vld [vmem:[%s7082_s26 + $0x50] sm:$0xff]   ;;  %v2852_v57 = vsel %vm2018_vm1, %v2844_v16, %v7726_v24 }
 0x216   : > { %v1233_v31 = vshrl.u32 %v6805_v1, 16  ;;  %v1236_v42 = vshll.u32 %v6805_v1, 16 }
 0x217   : > { %v7790_v53 = vpop.permute.xlu1 %2790 }
 0x218   : > { %1770 = vrot.lane.b32.xlu0 %v7782_v61, %s6850_s22  ;;  %v1235_v62 = vrot.slane %v1233_v31, 7 }
 0x219   : > { %1708 = vrot.lane.b32.xlu1 %v7748_v2, %s6848_s17 }
 0x21a   : > { %v2823_v17 = vpop.permute.xlu0 %2822 }
 0x21b   : > { %v2884_v37 = vsel %vm2018_vm1, %v2876_v11, %v2823_v17  ;;  %v2757_v28 = vpop.permute.xlu1 %2756  ;;  %v7835_v11 = vsel %vm6946_vm2, 0, %v1231_v7 }
 0x21c   : > { %3090 = vmatprep.mubr.bf16.mxu0 %v2884_v37  ;;  %1834 = vrot.lane.b32.xlu0 %v1448_v8, %s6851_s27  ;;  %v2836_v33 = vsel %vm1887_vm0, %v7329_v19, %v2757_v28  ;;  %v2868_v19 = vsel %vm1887_vm0, %v10314_v52, %v7754_v23  ;;  %v1464_v37 = vshll.u32 %v7835_v11, 16  ;;  %v1462_v21 = vshrl.u32 %v7835_v11, 16  ;;  %v6806_v52 = vld [vmem:[%s7082_s26 + $0x58] sm:$0xff]  }
 0x21d   : > { %3091 = vmatmul.mubr.bf16.vlgmr.msra.gmra.mrb[16].mxu0 %v2852_v57  ;;  %1772 = vrot.lane.b32.xlu1 %v7803_v60, %s6850_s22  ;;  %v2846_v12 = vsel %vm809_vm6, %v2836_v33, %v7769_v27  ;;  %v1592_v57 = vrot.slane %v7760_v20, 1 }
 0x21e   : > { %v2809_v49 = vpop.permute.xlu0 %2808  ;;  %6658 = vmatpush3.bf16.msra.mxu0 %v7600_v25  ;;  %v1856_v25 = vsel %vm1854_vm12, %v6954_v4, %v7696_v56  ;;  %v1238_v56 = vor.u32 %v1236_v42, %v1235_v62  ;;  %v2855_v23 = vsel %vm2018_vm1, %v2846_v12, %v7742_v0  ;;  %v1466_v31 = vrot.slane %v1464_v37, 1 }
 0x21f   : > { %v2779_v43 = vpop.permute.xlu1 %2778  ;;  %6659 = vmatprep.subr.bf16.mxu0 %v6802_v18  ;;  %v1889_v17 = vsel %vm1887_vm0, %v1856_v25, %v7674_v48  ;;  %v1333_v48 = vsel %vm6946_vm2, %v1228_v15, 0  ;;  %v7876_v42 = vsel %vm6946_vm2, %v1235_v62, 0 }
 0x220   : > { %1676 = vrot.lane.b32.xlu0 %v7782_v61, %s6846_s15  ;;  %v1922_v28 = vsel %vm1920_vm3, %v1889_v17, %v7716_v54  ;;  %v7859_v27 = vsel %vm6946_vm2, 0, %v1238_v56  ;;  %v1593_v54 = vrot.slane %v7773_v55, 1  ;;  %v1469_v15 = vshll.u32 %v1333_v48, 16 }
 0x221   : > { %1836 = vrot.lane.b32.xlu1 %v1460_v13, %s6851_s27  ;;  %v1476_v7 = vshll.u32 %v7859_v27, 16  ;;  %v1596_v17 = vrot.slane %v1333_v48, 1  ;;  %v1467_v62 = vor.u32 %v1466_v31, %v1462_v21  ;;  %v1474_v37 = vshrl.u32 %v7859_v27, 16 }
 0x222   : > { %v2818_v24 = vpop.permute.xlu0 %2817  ;;  %6660 = vmatpush3.bf16.msra.mxu0 %v6802_v18  ;;  %v2878_v18 = vsel %vm809_vm6, %v2868_v19, %v7777_v5  ;;  %v1954_v5 = vsel %vm809_vm6, %v1922_v28, %v7686_v50  ;;  %v7883_v25 = vsel %vm1564_vm7, %v1592_v57, %v1593_v54  ;;  %v1471_v33 = vrot.slane %v1469_v15, 1 }
 0x223   : > { %v7821_v9 = vpop.permute.xlu1 %2792  ;;  %v1987_v50 = vsel %vm1985_vm4, %v1954_v5, %v7733_v46  ;;  %v1595_v46 = vrot.slane %v7835_v11, 1  ;;  %v1478_v28 = vrot.slane %v1476_v7, 1  ;;  %v1481_v48 = vshll.u32 %v7876_v42, 16  ;;  %v6807_v5 = vld [vmem:[%s7082_s26 + $0x60] sm:$0xff]  }
 0x224   : > { %1740 = vrot.lane.b32.xlu0 %v1448_v8, %s6845_s23  ;;  %v10316_v57 = vcombine.low %v7575_v6, %v7582_v26 }
 0x225   : > { %1678 = vrot.lane.b32.xlu1 %v7803_v60, %s6846_s15 }
 0x226   : > { %v7831_v16 = vpop.permute.xlu0 %2819 }
 0x227   : > { %v2759_v39 = vpop.permute.xlu1 %2758 }
 0x228   : > { %1804 = vrot.lane.b32.xlu0 %v7760_v20, %s6849_s18  ;;  %v2839_v0 = vsel %vm1887_vm0, %v7397_v38, %v2759_v39  ;;  %v10315_v38 = vcombine.low %v7534_v47, %v7560_v22 }
 0x229   : > { %1742 = vrot.lane.b32.xlu1 %v1460_v13, %s6845_s23  ;;  %v2848_v56 = vsel %vm809_vm6, %v2839_v0, %v2779_v43  ;;  %v1472_v43 = vsel %vm1340_vm8, %v1467_v62, %v1471_v33  ;;  %v1243_v0 = vshll.u32 %v6806_v52, 16 }
 0x22a   : > { %v2825_v1 = vpop.permute.xlu0 %2824  ;;  %v2871_v39 = vsel %vm1887_vm0, %v10315_v38, %v2809_v49  ;;  %v2858_v49 = vsel %vm2018_vm1, %v2848_v56, %v7790_v53  ;;  %v7909_v53 = vsel %vm1564_vm7, %v1595_v46, %v1596_v17  ;;  %v1250_v56 = vshll.u32 %v6807_v5, 16 }
 0x22b   : > { %v2887_v51 = vsel %vm2018_vm1, %v2878_v18, %v2825_v1  ;;  %v2781_v44 = vpop.permute.xlu1 %2780  ;;  %v2880_v19 = vsel %vm809_vm6, %v2871_v39, %v2818_v24  ;;  %v1240_v24 = vshrl.u32 %v6806_v52, 16 }
 0x22c   : > { %3098 = vmatprep.mubr.bf16.mxu0 %v2887_v51  ;;  %1646 = vrot.lane.b32.xlu0 %v1448_v8, %s6847_s16  ;;  %v1479_v51 = vor.u32 %v1478_v28, %v1474_v37 }
 0x22d   : > { %3099 = vmatmul.mubr.bf16.gmra.mrb[20].mxu0 %v2855_v23  ;;  %1806 = vrot.lane.b32.xlu1 %v7835_v11, %s6849_s18  ;;  %v1483_v23 = vrot.slane %v1481_v48, 1  ;;  %v1242_v31 = vrot.slane %v1240_v24, 7 }
 0x22e   : > { %v2811_v8 = vpop.permute.xlu0 %2810 }
 0x22f   : > { %v1633_v55 = vpop.permute.xlu1 %1632  ;;  %v1484_v26 = vsel %vm1340_vm8, %v1479_v51, %v1483_v23  ;;  %v1245_v33 = vor.u32 %v1243_v0, %v1242_v31  ;;  %v1335_v37 = vsel %vm6946_vm2, %v1242_v31, 0 }
 0x230   : > { %1710 = vrot.lane.b32.xlu0 %v7760_v20, %s6848_s17  ;;  %v1493_v24 = vshll.u32 %v1335_v37, 16 }
 0x231   : > { %1648 = vrot.lane.b32.xlu1 %v1460_v13, %s6847_s16  ;;  %v2020_v13 = vsel %vm2018_vm1, %v1987_v50, %v7703_v30  ;;  %v2874_v30 = vsel %vm1887_vm0, %v10316_v57, %v2811_v8  ;;  %v1247_v50 = vshrl.u32 %v6807_v5, 16  ;;  %v10317_v57 = vcombine.low %v7528_v34, %v7263_v10  ;;  %v6808_v10 = vld [vmem:[%s7082_s26 + $0x68] sm:$0xff]  }
 0x232   : > { %v2827_v12 = vpop.permute.xlu0 %2826  ;;  %v2882_v6 = vsel %vm809_vm6, %v2874_v30, %v7831_v16  ;;  %v1495_v30 = vrot.slane %v1493_v24, 1 }
 0x233   : > { %v2890_v47 = vsel %vm2018_vm1, %v2880_v19, %v2827_v12  ;;  %v2761_v22 = vpop.permute.xlu1 %2760  ;;  %v1249_v39 = vrot.slane %v1247_v50, 7 }
 0x234   : > { %3106 = vmatprep.mubr.bf16.mxu0 %v2890_v47  ;;  %1774 = vrot.lane.b32.xlu0 %v7883_v25, %s6850_s22  ;;  %v2842_v18 = vsel %vm1887_vm0, %v7457_v36, %v2761_v22  ;;  %v1599_v22 = vrot.slane %v7876_v42, 1 }
 0x235   : > { %3107 = vmatmul.mubr.bf16.gmra.mrb[24].mxu0 %v2858_v49  ;;  %1712 = vrot.lane.b32.xlu1 %v7835_v11, %s6848_s17  ;;  %v2850_v36 = vsel %vm809_vm6, %v2842_v18, %v2781_v44  ;;  %v1252_v46 = vor.u32 %v1250_v56, %v1249_v39  ;;  %v1598_v49 = vrot.slane %v7859_v27, 1  ;;  %v7976_v51 = vsel %vm6946_vm2, %v1249_v39, 0 }
 0x236   : > { %v1823_v1 = vpop.permute.xlu0 %1822  ;;  %v2861_v44 = vsel %vm2018_vm1, %v2850_v36, %v7821_v9 }
 0x237   : > { %v2053_v54 = vsel %vm2051_vm5, %v2020_v13, %v1823_v1  ;;  %v1697_v15 = vpop.permute.xlu1 %1696  ;;  %v7960_v47 = vsel %vm6946_vm2, 0, %v1252_v46 }
 0x238   : > { %2260 = vmatmul.mubr.bf16.vlgmr.msra.gmra.mrb[0].mxu1 %v2053_v54  ;;  %1838 = vrot.lane.b32.xlu0 %v1472_v43, %s6851_s27  ;;  %v1500_v1 = vshll.u32 %v7960_v47, 16  ;;  %v1602_v54 = vrot.slane %v1335_v37, 1  ;;  %v1498_v36 = vshrl.u32 %v7960_v47, 16 }
 0x239   : > { %6362 = vmatprep.mubr.msk.bf16.mxu1 %vm1854_vm12, %v7652_v41  ;;  %1776 = vrot.lane.b32.xlu1 %v7909_v53, %s6850_s22  ;;  %v1858_v41 = vsel %vm1854_vm12, %v7163_v40, %v1633_v55  ;;  %v7943_v40 = vsel %vm6946_vm2, 0, %v1245_v33 }
 0x23a   : > { %v2829_v21 = vpop.permute.xlu0 %2828  ;;  %v1488_v52 = vshll.u32 %v7943_v40, 16  ;;  %v1601_v23 = vrot.slane %v7943_v40, 1 }
 0x23b   : > { %v2893_v8 = vsel %vm2018_vm1, %v2882_v6, %v2829_v21  ;;  %v1761_v7 = vpop.permute.xlu1 %1760  ;;  %v1502_v21 = vrot.slane %v1500_v1, 1  ;;  %v1505_v6 = vshll.u32 %v7976_v51, 16 }
 0x23c   : > { %3114 = vmatprep.mubr.bf16.mxu0 %v2893_v8  ;;  %1680 = vrot.lane.b32.xlu0 %v7883_v25, %s6846_s15  ;;  %v1490_v13 = vrot.slane %v1488_v52, 1 }
 0x23d   : > { %3115 = vmatmul.mubr.bf16.gmra.mrb[28].mxu0 %v2861_v44  ;;  %1840 = vrot.lane.b32.xlu1 %v1484_v26, %s6851_s27  ;;  %v1503_v50 = vor.u32 %v1502_v21, %v1498_v36  ;;  %v1507_v44 = vrot.slane %v1505_v6, 1  ;;  %v10318_v6 = vld [vmem:[#allocation8_spill] sm:$0xff] }
 0x23e   : > { %v1665_v16 = vpop.permute.xlu0 %1664  ;;  %6661 = vmatprep.mubr.msk.bf16.mxu0 %vm1887_vm0, %v7389_v35 }
 0x23f   : > { %v1891_v17 = vsel %vm1887_vm0, %v1858_v41, %v1665_v16  ;;  %v1825_v38 = vpop.permute.xlu1 %1824  ;;  %v1254_v41 = vshrl.u32 %v6808_v10, 16  ;;  %v1508_v56 = vsel %vm1340_vm8, %v1503_v50, %v1507_v44 }
 0x240   : > { %1744 = vrot.lane.b32.xlu0 %v1472_v43, %s6845_s23  ;;  %v1924_v9 = vsel %vm1920_vm3, %v1891_v17, %v1697_v15  ;;  %v6809_v17 = vld [vmem:[%s7082_s26 + $0x70] sm:$0xff]  }
 0x241   : > { %1682 = vrot.lane.b32.xlu1 %v7909_v53, %s6846_s15  ;;  %v1261_v46 = vshrl.u32 %v6809_v17, 16 }
 0x242   : > { %v1729_v62 = vpop.permute.xlu0 %1728 }
 0x243   : > { %v1956_v35 = vsel %vm809_vm6, %v1924_v9, %v1729_v62  ;;  %v1667_v55 = vpop.permute.xlu1 %1666  ;;  %v1256_v9 = vrot.slane %v1254_v41, 7  ;;  %v1257_v62 = vshll.u32 %v6808_v10, 16 }
 0x244   : > { %1808 = vrot.lane.b32.xlu0 %v7859_v27, %s6849_s18  ;;  %v1989_v19 = vsel %vm1985_vm4, %v1956_v35, %v1761_v7 }
 0x245   : > { %6662 = vmatmul.mubr.msk.bf16.vlgmr.msra.gmra.mrb[32].mxu0 %vm1887_vm0, %v7454_v29  ;;  %1746 = vrot.lane.b32.xlu1 %v1484_v26, %s6845_s23 }
 0x246   : > { %v1793_v12 = vpop.permute.xlu0 %1792  ;;  %6665 = vmatprep.mubr.msk.bf16.mxu0 %vm1887_vm0, %v7515_v58  ;;  %v1486_v58 = vshrl.u32 %v7943_v40, 16 }
 0x247   : > { %v2022_v28 = vsel %vm2018_vm1, %v1989_v19, %v1793_v12  ;;  %v1731_v48 = vpop.permute.xlu1 %1730  ;;  %v1259_v12 = vor.u32 %v1257_v62, %v1256_v9 }
 0x248   : > { %v2056_v29 = vsel %vm2051_vm5, %v2022_v28, %v1825_v38  ;;  %1650 = vrot.lane.b32.xlu0 %v1472_v43, %s6847_s16 }
 0x249   : > { %2268 = vmatmul.mubr.bf16.gmra.mrb[4].mxu1 %v2056_v29  ;;  %1810 = vrot.lane.b32.xlu1 %v7943_v40, %s6849_s18  ;;  %v1264_v29 = vshll.u32 %v6809_v17, 16 }
 0x24a   : > { %v1635_v18 = vpop.permute.xlu0 %1634  ;;  %6363 = vmatprep.mubr.msk.bf16.mxu1 %vm1854_vm12, %v7664_v14  ;;  %v7986_v14 = vsel %vm1564_vm7, %v1598_v49, %v1599_v22 }
 0x24b   : > { %v1860_v43 = vsel %vm1854_vm12, %v7190_v63, %v1635_v18  ;;  %v1795_v42 = vpop.permute.xlu1 %1794  ;;  %v1491_v63 = vor.u32 %v1490_v13, %v1486_v58 }
 0x24c   : > { %1714 = vrot.lane.b32.xlu0 %v7859_v27, %s6848_s17  ;;  %v1893_v15 = vsel %vm1887_vm0, %v1860_v43, %v1667_v55  ;;  %v1337_v43 = vsel %vm6946_vm2, %v1256_v9, 0  ;;  %v6810_v9 = vld [vmem:[%s7082_s26 + $0x78] sm:$0xff]  }
 0x24d   : > { %6666 = vmatmul.mubr.msk.bf16.gmra.mrb[36].mxu0 %vm1887_vm0, %v10317_v57  ;;  %1652 = vrot.lane.b32.xlu1 %v1484_v26, %s6847_s16  ;;  %v1496_v0 = vsel %vm1340_vm8, %v1491_v63, %v1495_v30  ;;  %v8000_v26 = vsel %vm1564_vm7, %v1601_v23, %v1602_v54  ;;  %v1604_v30 = vrot.slane %v7960_v47, 1  ;;  %v1605_v54 = vrot.slane %v7976_v51, 1 }
 0x24e   : > { %v1699_v5 = vpop.permute.xlu0 %1698  ;;  %v1517_v36 = vshll.u32 %v1337_v43, 16  ;;  %v1608_v41 = vrot.slane %v1337_v43, 1 }
 0x24f   : > { %v1926_v34 = vsel %vm1920_vm3, %v1893_v15, %v1699_v5  ;;  %v1637_v31 = vpop.permute.xlu1 %1636 }
 0x250   : > { %1778 = vrot.lane.b32.xlu0 %v7986_v14, %s6850_s22  ;;  %v1958_v8 = vsel %vm809_vm6, %v1926_v34, %v1731_v48  ;;  %v1862_v52 = vsel %vm1854_vm12, %v7592_v59, %v1637_v31  ;;  %v1263_v48 = vrot.slane %v1261_v46, 7  ;;  %v10319_v34 = vld [vmem:[#allocation5_spill] sm:$0xff]  ;;  %v1519_v50 = vrot.slane %v1517_v36, 1 }
 0x251   : > { %1716 = vrot.lane.b32.xlu1 %v7943_v40, %s6848_s17 }
 0x252   : > { %v1763_v7 = vpop.permute.xlu0 %1762  ;;  %v1266_v13 = vor.u32 %v1264_v29, %v1263_v48  ;;  %v8054_v51 = vsel %vm6946_vm2, %v1263_v48, 0 }
 0x253   : > { %v1991_v16 = vsel %vm1985_vm4, %v1958_v8, %v1763_v7  ;;  %v1701_v33 = vpop.permute.xlu1 %1700  ;;  %v8059_v8 = vsel %vm1564_vm7, %v1604_v30, %v1605_v54 }
 0x254   : > { %1842 = vrot.lane.b32.xlu0 %v1496_v0, %s6851_s27  ;;  %v2024_v38 = vsel %vm2018_vm1, %v1991_v16, %v1795_v42  ;;  %v8038_v57 = vsel %vm6946_vm2, 0, %v1266_v13 }
 0x255   : > { %1780 = vrot.lane.b32.xlu1 %v8000_v26, %s6850_s22  ;;  %v1524_v10 = vshll.u32 %v8038_v57, 16  ;;  %v1522_v17 = vshrl.u32 %v8038_v57, 16 }
 0x256   : > { %v1827_v39 = vpop.permute.xlu0 %1826 }
 0x257   : > { %v2059_v35 = vsel %vm2051_vm5, %v2024_v38, %v1827_v39  ;;  %v1765_v55 = vpop.permute.xlu1 %1764  ;;  %v1526_v38 = vrot.slane %v1524_v10, 1  ;;  %v1529_v39 = vshll.u32 %v8054_v51, 16 }
 0x258   : > { %2276 = vmatmul.mubr.bf16.gmra.mrb[8].mxu1 %v2059_v35  ;;  %1684 = vrot.lane.b32.xlu0 %v7986_v14, %s6846_s15 }
 0x259   : > { %6364 = vmatprep.mubr.msk.bf16.mxu1 %vm1854_vm12, %v7712_v45  ;;  %1844 = vrot.lane.b32.xlu1 %v1508_v56, %s6851_s27  ;;  %v8025_v45 = vsel %vm6946_vm2, 0, %v1259_v12  ;;  %v1531_v12 = vrot.slane %v1529_v39, 1 }
 0x25a   : > { %v1669_v19 = vpop.permute.xlu0 %1668  ;;  %v1512_v24 = vshll.u32 %v8025_v45, 16  ;;  %v1510_v15 = vshrl.u32 %v8025_v45, 16  ;;  %v1607_v44 = vrot.slane %v8025_v45, 1 }
 0x25b   : > { %v1895_v37 = vsel %vm1887_vm0, %v1862_v52, %v1669_v19  ;;  %v1829_v28 = vpop.permute.xlu1 %1828  ;;  %v1527_v19 = vor.u32 %v1526_v38, %v1522_v17  ;;  %v10321_v17 = vld [vmem:[#allocation7_spill] sm:$0xff] }
 0x25c   : > { %1748 = vrot.lane.b32.xlu0 %v1496_v0, %s6845_s23  ;;  %v1928_v59 = vsel %vm1920_vm3, %v1895_v37, %v1701_v33  ;;  %v1514_v5 = vrot.slane %v1512_v24, 1  ;;  %v1268_v37 = vshrl.u32 %v6810_v9, 16 }
 0x25d   : > { %1686 = vrot.lane.b32.xlu1 %v8000_v26, %s6846_s15 }
 0x25e   : > { %v1733_v22 = vpop.permute.xlu0 %1732  ;;  %v1515_v7 = vor.u32 %v1514_v5, %v1510_v15 }
 0x25f   : > { %v1960_v49 = vsel %vm809_vm6, %v1928_v59, %v1733_v22  ;;  %v1671_v58 = vpop.permute.xlu1 %1670  ;;  %v1532_v22 = vsel %vm1340_vm8, %v1527_v19, %v1531_v12 }
 0x260   : > { %1812 = vrot.lane.b32.xlu0 %v7960_v47, %s6849_s18  ;;  %v1993_v18 = vsel %vm1985_vm4, %v1960_v49, %v1765_v55  ;;  %v8074_v55 = vsel %vm1564_vm7, %v1607_v44, %v1608_v41  ;;  %v1270_v49 = vrot.slane %v1268_v37, 7 }
 0x261   : > { %1750 = vrot.lane.b32.xlu1 %v1508_v56, %s6845_s23 }
 0x262   : > { %v1797_v1 = vpop.permute.xlu0 %1796  ;;  %v1339_v10 = vsel %vm6946_vm2, %v1270_v49, 0 }
 0x263   : > { %v2026_v42 = vsel %vm2018_vm1, %v1993_v18, %v1797_v1  ;;  %v1735_v23 = vpop.permute.xlu1 %1734  ;;  %v10320_v18 = vld [vmem:[#allocation6_spill] sm:$0xff] }
 0x264   : > { %v2062_v63 = vsel %vm2051_vm5, %v2026_v42, %v1829_v28  ;;  %1654 = vrot.lane.b32.xlu0 %v1496_v0, %s6847_s16 }
 0x265   : > { %2284 = vmatmul.mubr.bf16.gmra.mrb[12].mxu1 %v2062_v63  ;;  %1814 = vrot.lane.b32.xlu1 %v8025_v45, %s6849_s18 }
 0x266   : > { %v1639_v21 = vpop.permute.xlu0 %1638  ;;  %6365 = vmatprep.mubr.msk.bf16.mxu1 %vm1854_vm12, %v10318_v6 }
 0x267   : > { %v1864_v31 = vsel %vm1854_vm12, %v10319_v34, %v1639_v21  ;;  %v1799_v0 = vpop.permute.xlu1 %1798 }
 0x268   : > { %1718 = vrot.lane.b32.xlu0 %v7960_v47, %s6848_s17  ;;  %v1897_v16 = vsel %vm1887_vm0, %v1864_v31, %v1671_v58  ;;  %v1271_v58 = vshll.u32 %v6810_v9, 16 }
 0x269   : > { %1656 = vrot.lane.b32.xlu1 %v1508_v56, %s6847_s16  ;;  %v1520_v56 = vsel %vm1340_vm8, %v1515_v7, %v1519_v50  ;;  %v1611_v7 = vrot.slane %v8054_v51, 1  ;;  %v1610_v50 = vrot.slane %v8038_v57, 1 }
 0x26a   : > { %v1703_v33 = vpop.permute.xlu0 %1702  ;;  %v1273_v42 = vor.u32 %v1271_v58, %v1270_v49 }
 0x26b   : > { %v1930_v62 = vsel %vm1920_vm3, %v1897_v16, %v1703_v33  ;;  %v1641_v35 = vpop.permute.xlu1 %1640  ;;  %v1621_v16 = vshll.u32 %v1339_v10, 16  ;;  %v8119_v51 = vsel %vm1564_vm7, %v1610_v50, %v1611_v7 }
 0x26c   : > { %1782 = vrot.lane.b32.xlu0 %v8059_v8, %s6850_s22  ;;  %v1962_v46 = vsel %vm809_vm6, %v1930_v62, %v1735_v23  ;;  %v1866_v1 = vsel %vm1854_vm12, %v10320_v18, %v1641_v35  ;;  %v1322_v15 = vsel %vm6946_vm2, 0, %v1273_v42  ;;  %v10322_v18 = vld [vmem:[#allocation4_spill] sm:$0xff] }
 0x26d   : > { %1720 = vrot.lane.b32.xlu1 %v8025_v45, %s6848_s17  ;;  %v1616_v36 = vshll.u32 %v1322_v15, 16  ;;  %v1614_v44 = vshrl.u32 %v1322_v15, 16  ;;  %v1623_v35 = vrot.slane %v1621_v16, 1 }
 0x26e   : > { %v1767_v52 = vpop.permute.xlu0 %1766 }
 0x26f   : > { %v1995_v28 = vsel %vm1985_vm4, %v1962_v46, %v1767_v52  ;;  %v1705_v48 = vpop.permute.xlu1 %1704  ;;  %v1618_v41 = vrot.slane %v1616_v36, 1  ;;  %v1627_v46 = vrot.slane %v1322_v15, 1  ;;  %v1628_v52 = vrot.slane %v1339_v10, 1 }
 0x270   : > { %1846 = vrot.lane.b32.xlu0 %v1520_v56, %s6851_s27  ;;  %v2028_v29 = vsel %vm2018_vm1, %v1995_v28, %v1799_v0 }
 0x271   : > { %1784 = vrot.lane.b32.xlu1 %v8074_v55, %s6850_s22  ;;  %v1619_v62 = vor.u32 %v1618_v41, %v1614_v44 }
 0x272   : > { %v1831_v59 = vpop.permute.xlu0 %1830 }
 0x273   : > { %v2065_v13 = vsel %vm2051_vm5, %v2028_v29, %v1831_v59  ;;  %v1769_v24 = vpop.permute.xlu1 %1768  ;;  %v1624_v37 = vsel %vm1340_vm8, %v1619_v62, %v1623_v35 }
 0x274   : > { %2292 = vmatmul.mubr.bf16.gmra.mrb[16].mxu1 %v2065_v13  ;;  %1688 = vrot.lane.b32.xlu0 %v8059_v8, %s6846_s15 }
 0x275   : > { %6366 = vmatprep.mubr.msk.bf16.mxu1 %vm1854_vm12, %v7782_v61  ;;  %1848 = vrot.lane.b32.xlu1 %v1532_v22, %s6851_s27 }
 0x276   : > { %v1673_v43 = vpop.permute.xlu0 %1672 }
 0x277   : > { %v1899_v23 = vsel %vm1887_vm0, %v1866_v1, %v1673_v43  ;;  %v1833_v63 = vpop.permute.xlu1 %1832 }
 0x278   : > { %1752 = vrot.lane.b32.xlu0 %v1520_v56, %s6845_s23  ;;  %v1932_v30 = vsel %vm1920_vm3, %v1899_v23, %v1705_v48  ;;  %v8129_v48 = vsel %vm1564_vm7, %v1627_v46, %v1628_v52 }
 0x279   : > { %1690 = vrot.lane.b32.xlu1 %v8074_v55, %s6846_s15 }
 0x27a   : > { %v1737_v54 = vpop.permute.xlu0 %1736 }
 0x27b   : > { %v1964_v61 = vsel %vm809_vm6, %v1932_v30, %v1737_v54  ;;  %v1675_v5 = vpop.permute.xlu1 %1674  ;;  %v10323_v54 = vld [vmem:[#allocation3_spill] sm:$0xff] }
 0x27c   : > { %1816 = vrot.lane.b32.xlu0 %v8038_v57, %s6849_s18  ;;  %v1997_v21 = vsel %vm1985_vm4, %v1964_v61, %v1769_v24 }
 0x27d   : > { %1754 = vrot.lane.b32.xlu1 %v1532_v22, %s6845_s23 }
 0x27e   : > { %v1801_v6 = vpop.permute.xlu0 %1800 }
 0x27f   : > { %v2030_v34 = vsel %vm2018_vm1, %v1997_v21, %v1801_v6  ;;  %v1739_v31 = vpop.permute.xlu1 %1738 }
 0x280   : > { %v2068_v0 = vsel %vm2051_vm5, %v2030_v34, %v1833_v63  ;;  %1658 = vrot.lane.b32.xlu0 %v1520_v56, %s6847_s16 }
 0x281   : > { %2300 = vmatmul.mubr.bf16.gmra.mrb[20].mxu1 %v2068_v0  ;;  %1818 = vrot.lane.b32.xlu1 %v1322_v15, %s6849_s18 }
 0x282   : > { %v1643_v33 = vpop.permute.xlu0 %1642  ;;  %6367 = vmatprep.mubr.msk.bf16.mxu1 %vm1854_vm12, %v7803_v60 }
 0x283   : > { %v1868_v38 = vsel %vm1854_vm12, %v10321_v17, %v1643_v33  ;;  %v1803_v39 = vpop.permute.xlu1 %1802 }
 0x284   : > { %v1901_v9 = vsel %vm1887_vm0, %v1868_v38, %v1675_v5  ;;  %1722 = vrot.lane.b32.xlu0 %v8038_v57, %s6848_s17 }
 0x285   : > { %1660 = vrot.lane.b32.xlu1 %v1532_v22, %s6847_s16 }
 0x286   : > { %v1707_v56 = vpop.permute.xlu0 %1706 }
 0x287   : > { %v1934_v60 = vsel %vm1920_vm3, %v1901_v9, %v1707_v56  ;;  %v1645_v19 = vpop.permute.xlu1 %1644 }
 0x288   : > { %v1966_v12 = vsel %vm809_vm6, %v1934_v60, %v1739_v31  ;;  %1786 = vrot.lane.b32.xlu0 %v8119_v51, %s6850_s22  ;;  %v1870_v24 = vsel %vm1854_vm12, %v7693_v32, %v1645_v19 }
 0x289   : > { %1724 = vrot.lane.b32.xlu1 %v1322_v15, %s6848_s17 }
 0x28a   : > { %v1771_v28 = vpop.permute.xlu0 %1770 }
 0x28b   : > { %v1999_v29 = vsel %vm1985_vm4, %v1966_v12, %v1771_v28  ;;  %v1709_v59 = vpop.permute.xlu1 %1708 }
 0x28c   : > { %v2032_v22 = vsel %vm2018_vm1, %v1999_v29, %v1803_v39  ;;  %1850 = vrot.lane.b32.xlu0 %v1624_v37, %s6851_s27 }
 0x28d   : > { %1788 = vrot.lane.b32.xlu1 %v8129_v48, %s6850_s22 }
 0x28e   : > { %v1835_v49 = vpop.permute.xlu0 %1834 }
 0x28f   : > { %v2071_v58 = vsel %vm2051_vm5, %v2032_v22, %v1835_v49  ;;  %v1773_v13 = vpop.permute.xlu1 %1772 }
 0x290   : > { %2308 = vmatmul.mubr.bf16.gmra.mrb[24].mxu1 %v2071_v58  ;;  %1692 = vrot.lane.b32.xlu0 %v8119_v51, %s6846_s15 }
 0x291   : > { %6368 = vmatprep.mubr.msk.bf16.mxu1 %vm1854_vm12, %v7883_v25  ;;  %1852 = vrot.lane.b32.xlu1 %v10322_v18, %s6851_s27 }
 0x292   : > { %v1677_v1 = vpop.permute.xlu0 %1676 }
 0x293   : > { %v1903_v43 = vsel %vm1887_vm0, %v1870_v24, %v1677_v1  ;;  %v1837_v42 = vpop.permute.xlu1 %1836 }
 0x294   : > { %v1936_v23 = vsel %vm1920_vm3, %v1903_v43, %v1709_v59  ;;  %1756 = vrot.lane.b32.xlu0 %v1624_v37, %s6845_s23 }
 0x295   : > { %4320 = vrot.lane.b32.xlu1 %v10322_v18, %s6846_s15 }
 0x296   : > { %v1741_v32 = vpop.permute.xlu0 %1740 }
 0x297   : > { %v1968_v63 = vsel %vm809_vm6, %v1936_v23, %v1741_v32  ;;  %v1679_v30 = vpop.permute.xlu1 %1678 }
 0x298   : > { %v2001_v25 = vsel %vm1985_vm4, %v1968_v63, %v1773_v13  ;;  %1820 = vrot.lane.b32.xlu0 %v6954_v4, %s6849_s18 }
 0x299   : > { %4352 = vrot.lane.b32.xlu1 %v10323_v54, %s6845_s23 }
 0x29a   : > { %v1805_v15 = vpop.permute.xlu0 %1804 }
 0x29b   : > { %v2034_v61 = vsel %vm2018_vm1, %v2001_v25, %v1805_v15  ;;  %v1743_v5 = vpop.permute.xlu1 %1742 }
 0x29c   : > { %v2074_v36 = vsel %vm2051_vm5, %v2034_v61, %v1837_v42 }
 0x29d   : > { %2316 = vmatmul.mubr.bf16.gmra.mrb[28].mxu1 %v2074_v36 }
 0x29e   : > { %v1647_v21 = vpop.permute.xlu0 %1646  ;;  %6369 = vmatprep.mubr.msk.bf16.mxu1 %vm1854_vm12, %v7909_v53 }
 0x29f   : > { %v1872_v6 = vsel %vm1854_vm12, %v7748_v2, %v1647_v21  ;;  %v1807_v10 = vpop.permute.xlu1 %1806 }
 0x2a0   : > { %v1905_v34 = vsel %vm1887_vm0, %v1872_v6, %v1679_v30 }
 0x2a2   : > { %v1711_v31 = vpop.permute.xlu0 %1710 }
 0x2a3   : > { %v1938_v0 = vsel %vm1920_vm3, %v1905_v34, %v1711_v31  ;;  %v1649_v7 = vpop.permute.xlu1 %1648 }
 0x2a4   : > { %v1970_v50 = vsel %vm809_vm6, %v1938_v0, %v1743_v5  ;;  %v1874_v2 = vsel %vm1854_vm12, %v7760_v20, %v1649_v7 }
 0x2a6   : > { %v1775_v44 = vpop.permute.xlu0 %1774 }
 0x2a7   : > { %v2003_v41 = vsel %vm1985_vm4, %v1970_v50, %v1775_v44  ;;  %v1713_v16 = vpop.permute.xlu1 %1712 }
 0x2a8   : > { %v2036_v33 = vsel %vm2018_vm1, %v2003_v41, %v1807_v10 }
 0x2aa   : > { %v1839_v17 = vpop.permute.xlu0 %1838 }
 0x2ab   : > { %v2077_v53 = vsel %vm2051_vm5, %v2036_v33, %v1839_v17  ;;  %v1777_v38 = vpop.permute.xlu1 %1776 }
 0x2ac   : > { %2324 = vmatmul.mubr.bf16.gmra.mrb[32].mxu1 %v2077_v53 }
 0x2ad   : > { %6370 = vmatprep.mubr.msk.bf16.mxu1 %vm1854_vm12, %v7986_v14 }
 0x2ae   : > { %v1681_v39 = vpop.permute.xlu0 %1680 }
 0x2af   : > { %v1907_v9 = vsel %vm1887_vm0, %v1874_v2, %v1681_v39  ;;  %v1841_v62 = vpop.permute.xlu1 %1840 }
 0x2b0   : > { %v1940_v35 = vsel %vm1920_vm3, %v1907_v9, %v1713_v16 }
 0x2b2   : > { %v1745_v56 = vpop.permute.xlu0 %1744 }
 0x2b3   : > { %v1972_v46 = vsel %vm809_vm6, %v1940_v35, %v1745_v56  ;;  %v1683_v52 = vpop.permute.xlu1 %1682 }
 0x2b4   : > { %v2005_v60 = vsel %vm1985_vm4, %v1972_v46, %v1777_v38 }
 0x2b6   : > { %v1809_v19 = vpop.permute.xlu0 %1808 }
 0x2b7   : > { %v2038_v12 = vsel %vm2018_vm1, %v2005_v60, %v1809_v19  ;;  %v1747_v20 = vpop.permute.xlu1 %1746 }
 0x2b8   : > { %v2080_v37 = vsel %vm2051_vm5, %v2038_v12, %v1841_v62 }
 0x2b9   : > { %2332 = vmatmul.mubr.bf16.gmra.mrb[36].mxu1 %v2080_v37 }
 0x2ba   : > { %v1651_v14 = vpop.permute.xlu0 %1650  ;;  %6371 = vmatprep.mubr.msk.bf16.mxu1 %vm1854_vm12, %v8000_v26 }
 0x2bb   : > { %v1876_v28 = vsel %vm1854_vm12, %v7835_v11, %v1651_v14  ;;  %v1811_v29 = vpop.permute.xlu1 %1810 }
 0x2bc   : > { %v1909_v59 = vsel %vm1887_vm0, %v1876_v28, %v1683_v52 }
 0x2be   : > { %v1715_v22 = vpop.permute.xlu0 %1714 }
 0x2bf   : > { %v1942_v49 = vsel %vm1920_vm3, %v1909_v59, %v1715_v22  ;;  %v1653_v58 = vpop.permute.xlu1 %1652 }
 0x2c0   : > { %v1974_v13 = vsel %vm809_vm6, %v1942_v49, %v1747_v20  ;;  %v1878_v11 = vsel %vm1854_vm12, %v7859_v27, %v1653_v58 }
 0x2c2   : > { %v1779_v24 = vpop.permute.xlu0 %1778 }
 0x2c3   : > { %v2007_v1 = vsel %vm1985_vm4, %v1974_v13, %v1779_v24  ;;  %v1717_v43 = vpop.permute.xlu1 %1716 }
 0x2c4   : > { %v2040_v42 = vsel %vm2018_vm1, %v2007_v1, %v1811_v29 }
 0x2c6   : > { %v1843_v23 = vpop.permute.xlu0 %1842 }
 0x2c7   : > { %v2083_v26 = vsel %vm2051_vm5, %v2040_v42, %v1843_v23  ;;  %v1781_v32 = vpop.permute.xlu1 %1780 }
 0x2c8   : > { %2340 = vmatmul.mubr.bf16.gmra.mrb[40].mxu1 %v2083_v26 }
 0x2c9   : > { %6372 = vmatprep.mubr.msk.bf16.mxu1 %vm1854_vm12, %v8059_v8 }
 0x2ca   : > { %v1685_v63 = vpop.permute.xlu0 %1684 }
 0x2cb   : > { %v1911_v30 = vsel %vm1887_vm0, %v1878_v11, %v1685_v63  ;;  %v1845_v25 = vpop.permute.xlu1 %1844 }
 0x2cc   : > { %v1944_v15 = vsel %vm1920_vm3, %v1911_v30, %v1717_v43 }
 0x2ce   : > { %v1749_v61 = vpop.permute.xlu0 %1748 }
 0x2cf   : > { %v1976_v5 = vsel %vm809_vm6, %v1944_v15, %v1749_v61  ;;  %v1687_v36 = vpop.permute.xlu1 %1686 }
 0x2d0   : > { %v2009_v21 = vsel %vm1985_vm4, %v1976_v5, %v1781_v32 }
 0x2d2   : > { %v1813_v6 = vpop.permute.xlu0 %1812 }
 0x2d3   : > { %v2042_v10 = vsel %vm2018_vm1, %v2009_v21, %v1813_v6  ;;  %v1751_v34 = vpop.permute.xlu1 %1750 }
 0x2d4   : > { %v2086_v27 = vsel %vm2051_vm5, %v2042_v10, %v1845_v25 }
 0x2d5   : > { %2348 = vmatmul.mubr.bf16.gmra.mrb[44].mxu1 %v2086_v27 }
 0x2d6   : > { %v1655_v8 = vpop.permute.xlu0 %1654  ;;  %6373 = vmatprep.mubr.msk.bf16.mxu1 %vm1854_vm12, %v8074_v55 }
 0x2d7   : > { %v1880_v31 = vsel %vm1854_vm12, %v7943_v40, %v1655_v8  ;;  %v1815_v44 = vpop.permute.xlu1 %1814 }
 0x2d8   : > { %v1913_v0 = vsel %vm1887_vm0, %v1880_v31, %v1687_v36  ;;  %v8241_v31 = vld [vmem:[%s10232_s5] ss:$0 sm:$0xff] }
 0x2da   : > { %v1719_v7 = vpop.permute.xlu0 %1718 }
 0x2db   : > { %v1946_v50 = vsel %vm1920_vm3, %v1913_v0, %v1719_v7  ;;  %v1657_v53 = vpop.permute.xlu1 %1656 }
 0x2dc   : > { %v1978_v41 = vsel %vm809_vm6, %v1946_v50, %v1751_v34  ;;  %v1882_v40 = vsel %vm1854_vm12, %v7960_v47, %v1657_v53 }
 0x2de   : > { %v1783_v16 = vpop.permute.xlu0 %1782 }
 0x2df   : > { %v2011_v33 = vsel %vm1985_vm4, %v1978_v41, %v1783_v16  ;;  %v1721_v9 = vpop.permute.xlu1 %1720  ;;  %v8246_v41 = vld [vmem:[%s10234_s7] ss:$0 sm:$0xff] }
 0x2e0   : > { %v2044_v17 = vsel %vm2018_vm1, %v2011_v33, %v1815_v44 }
 0x2e2   : > { %v1847_v38 = vpop.permute.xlu0 %1846 }
 0x2e3   : > { %v2089_v55 = vsel %vm2051_vm5, %v2044_v17, %v1847_v38  ;;  %v1785_v46 = vpop.permute.xlu1 %1784 }
 0x2e4   : > { %2356 = vmatmul.mubr.bf16.gmra.mrb[48].mxu1 %v2089_v55 }
 0x2e5   : > { %6374 = vmatprep.mubr.msk.bf16.mxu1 %vm1854_vm12, %v8119_v51 }
 0x2e6   : > { %v1689_v2 = vpop.permute.xlu0 %1688 }
 0x2e7   : > { %v1915_v39 = vsel %vm1887_vm0, %v1882_v40, %v1689_v2  ;;  %v1849_v14 = vpop.permute.xlu1 %1848 }
 0x2e8   : > { %v1948_v62 = vsel %vm1920_vm3, %v1915_v39, %v1721_v9 }
 0x2ea   : > { %v1753_v35 = vpop.permute.xlu0 %1752 }
 0x2eb   : > { %v1980_v56 = vsel %vm809_vm6, %v1948_v62, %v1753_v35  ;;  %v1691_v49 = vpop.permute.xlu1 %1690 }
 0x2ec   : > { %v2013_v60 = vsel %vm1985_vm4, %v1980_v56, %v1785_v46 }
 0x2ee   : > { %v1817_v20 = vpop.permute.xlu0 %1816 }
 0x2ef   : > { %v2046_v47 = vsel %vm2018_vm1, %v2013_v60, %v1817_v20  ;;  %v1755_v1 = vpop.permute.xlu1 %1754 }
 0x2f0   : > { %v6587_v52 = vpop.f32.mrb[16].mxu0  ;;  %v2092_v29 = vsel %vm2051_vm5, %v2046_v47, %v1849_v14 }
 0x2f1   : > { %v6588_v19 = vpop.f32.mrb[17].mxu0  ;;  %2364 = vmatmul.mubr.bf16.gmra.mrb[52].mxu1 %v2092_v29 }
 0x2f2   : > { %v8216_v12 = vadd.f32 %v6588_v19, %v6587_v52  ;;  %v6590_v51 = vpop.f32.mrb[18].mxu0  ;;  %v1659_v59 = vpop.permute.xlu0 %1658  ;;  %6375 = vmatprep.mubr.msk.bf16.mxu1 %vm1854_vm12, %v8129_v48 }
 0x2f3   : > { %v6591_v37 = vpop.f32.mrb[19].mxu0  ;;  %v1884_v22 = vsel %vm1854_vm12, %v8025_v45, %v1659_v59  ;;  %v1819_v26 = vpop.permute.xlu1 %1818 }
 0x2f4   : > { %v8219_v28 = vadd.f32 %v6591_v37, %v6590_v51  ;;  %v1917_v58 = vsel %vm1887_vm0, %v1884_v22, %v1691_v49 }
 0x2f6   : > { %v1723_v13 = vpop.permute.xlu0 %1722 }
 0x2f7   : > { %v1950_v24 = vsel %vm1920_vm3, %v1917_v58, %v1723_v13  ;;  %v1661_v61 = vpop.permute.xlu1 %1660 }
 0x2f8   : > { %v1982_v43 = vsel %vm809_vm6, %v1950_v24, %v1755_v1  ;;  %v1886_v36 = vsel %vm1854_vm12, %v8038_v57, %v1661_v61 }
 0x2fa   : > { %v1787_v42 = vpop.permute.xlu0 %1786 }
 0x2fb   : > { %v2015_v23 = vsel %vm1985_vm4, %v1982_v43, %v1787_v42  ;;  %v1725_v10 = vpop.permute.xlu1 %1724  ;;  %v3093_v42 = vadd.f32 %v8216_v12, %v8246_v41 }
 0x2fc   : > { %v2048_v11 = vsel %vm2018_vm1, %v2015_v23, %v1819_v26 }
 0x2fe   : > { %v1851_v25 = vpop.permute.xlu0 %1850 }
 0x2ff   : > { %v2095_v48 = vsel %vm2051_vm5, %v2048_v11, %v1851_v25  ;;  %v1789_v55 = vpop.permute.xlu1 %1788 }
 0x300   : > { %v6593_v32 = vpop.f32.mrb[20].mxu0  ;;  %2372 = vmatmul.mubr.bf16.gmra.mrb[56].mxu1 %v2095_v48 }
 0x301   : > { %v6594_v45 = vpop.f32.mrb[21].mxu0  ;;  %6376 = vmatprep.mubr.msk.bf16.mxu1 %vm1854_vm12, %v10323_v54 }
 0x302   : > { %v6595_v63 = vadd.f32 %v6594_v45, %v6593_v32  ;;  %v6596_v30 = vpop.f32.mrb[22].mxu0  ;;  %v1693_v21 = vpop.permute.xlu0 %1692 }
 0x303   : > { %v6597_v15 = vpop.f32.mrb[23].mxu0  ;;  %v1919_v6 = vsel %vm1887_vm0, %v1886_v36, %v1693_v21  ;;  %v1853_v19 = vpop.permute.xlu1 %1852 }
 0x304   : > { %v6598_v5 = vadd.f32 %v6597_v15, %v6596_v30  ;;  %v1952_v34 = vsel %vm1920_vm3, %v1919_v6, %v1725_v10  ;;  %v3101_v13 = vadd.f32 %v6595_v63, %v8246_v41  ;;  %v3096_v63 = vadd.f32 %v8219_v28, %v8246_v41 }
 0x306   : > { %v1757_v57 = vpop.permute.xlu0 %1756  ;;  %v3104_v32 = vadd.f32 %v6598_v5, %v8246_v41 }
 0x307   : > { %v1984_v16 = vsel %vm809_vm6, %v1952_v34, %v1757_v57 }
 0x308   : > { %v6599_v27 = vpop.f32.mrb[24].mxu0  ;;  %v2017_v2 = vsel %vm1985_vm4, %v1984_v16, %v1789_v55  ;;  %v6852_v55 = vmov 1966171168  }
 0x309   : > { %v6600_v8 = vpop.f32.mrb[25].mxu0 }
 0x30a   : > { %v6601_v0 = vadd.f32 %v6600_v8, %v6599_v27  ;;  %v6602_v7 = vpop.f32.mrb[26].mxu0  ;;  %v1821_v35 = vpop.permute.xlu0 %1820 }
 0x30b   : > { %v2261_v50 = vpop.f32.mrb[0].mxu1  ;;  %v6603_v44 = vpop.f32.mrb[27].mxu0  ;;  %v2050_v56 = vsel %vm2018_vm1, %v2017_v2, %v1821_v35  ;;  %v3208_v2 = vlaneseq }
 0x30c   : > { %v2262_v33 = vadd.f32 %v8241_v31, %v2261_v50  ;;  %v6604_v17 = vadd.f32 %v6603_v44, %v6602_v7  ;;  %v2263_v53 = vpop.f32.mrb[1].mxu1  ;;  %v3109_v38 = vadd.f32 %v6601_v0, %v8246_v41  ;;  %v2098_v20 = vsel %vm2051_vm5, %v2050_v56, %v1853_v19 }
 0x30d   : > { %v2264_v40 = vpop.f32.mrb[2].mxu1  ;;  %2380 = vmatmul.mubr.bf16.gmra.mrb[60].mxu1 %v2098_v20 }
 0x30e   : > { %v2265_v39 = vadd.f32 %v8241_v31, %v2264_v40  ;;  %v2266_v9 = vpop.f32.mrb[3].mxu1  ;;  %v8254_v62 = vadd.f32 %v6604_v17, %v8246_v41  ;;  %v2388_v46 = vmax.f32 %v2262_v33, 0.0  ;;  %v3206_v40 = vunpack.c.l.s4 %v6852_v55 }
 0x310   : > { %v2389_v52 = vmax.f32 %v2265_v39, 0.0  ;;  %v6605_v60 = vpop.f32.mrb[28].mxu0 }
 0x311   : > { %v6606_v51 = vpop.f32.mrb[29].mxu0 }
 0x312   : > { %v3848_v37 = vpack.c.bf16 %v2389_v52, %v2388_v46  ;;  %v6607_v47 = vadd.f32 %v6606_v51, %v6605_v60  ;;  %v6608_v14 = vpop.f32.mrb[30].mxu0  ;;  %v3207_v46 = vunpack.c.0.s8 %v3206_v40  ;;  %v3209_v52 = vshrl.u32 %v3208_v2, 7 }
 0x313   : > { %v6609_v29 = vpop.f32.mrb[31].mxu0 }
 0x314   : > { %v3865_v59 = vshrl.u32 %v3848_v37, 16  ;;  %v8258_v22 = vadd.f32 %v6609_v29, %v6608_v14  ;;  %v3868_v58 = vshll.u32 %v3848_v37, 16  ;;  %v3117_v7 = vadd.f32 %v6607_v47, %v8246_v41 }
 0x315   : > { %v8286_v60 = vsub.s32 %v3207_v46, %v3209_v52 }
 0x316   : > { %v3867_v49 = vrot.slane %v3865_v59, 7 }
 0x318   : > { %v3870_v24 = vor.u32 %v3868_v58, %v3867_v49  ;;  %v8263_v1 = vsel %vm6946_vm2, %v3867_v49, 0  ;;  %v6663_v43 = vpop.f32.mrb[32].mxu0 }
 0x319   : > { %v3166_v23 = vadd.f32 %v6663_v43, %v3101_v13  ;;  %v3157_v26 = vpop.f32.mrb[33].mxu0  ;;  %v4259_v48 = vrot.slane %v8263_v1, 1 }
 0x31a   : > { %v8270_v11 = vsel %vm6946_vm2, 0, %v3870_v24  ;;  %v3158_v45 = vadd.f32 %v3157_v26, %v3093_v42  ;;  %v6664_v30 = vpop.f32.mrb[34].mxu0  ;;  %v4056_v42 = vshll.u32 %v8263_v1, 16 }
 0x31b   : > { %10324 = vst [vmem:[#allocation8_spill] sm:$0xff] %v8270_v11  ;;  %v3169_v25 = vadd.f32 %v6664_v30, %v3104_v32  ;;  %v3160_v15 = vpop.f32.mrb[35].mxu0  ;;  %v4258_v61 = vrot.slane %v8270_v11, 1  ;;  %v3190_v21 = vmax.f32 %v3166_v23, 0.0  ;;  %v4051_v51 = vshll.u32 %v8270_v11, 16 }
 0x31c   : > { %v3161_v12 = vadd.f32 %v3160_v15, %v3096_v63  ;;  %v2269_v36 = vpop.f32.mrb[4].mxu1  ;;  %v3188_v27 = vmax.f32 %v3158_v45, 0.0  ;;  %v4049_v43 = vshrl.u32 %v8270_v11, 16 }
 0x31d   : > { %v3191_v6 = vmax.f32 %v3169_v25, 0.0  ;;  %v2271_v5 = vpop.f32.mrb[5].mxu1  ;;  %v8277_v10 = vsel %vm1564_vm7, %v4258_v61, %v4259_v48  ;;  %v4053_v29 = vrot.slane %v4051_v51, 1  ;;  %v2270_v24 = vadd.f32 %v8241_v31, %v2269_v36 }
 0x31e   : > { %v3189_v34 = vmax.f32 %v3161_v12, 0.0  ;;  %4416 = vrot.lane.b32.xlu0 %v8277_v10, %s6846_s15  ;;  %v2272_v28 = vpop.f32.mrb[6].mxu1  ;;  %v4058_v61 = vrot.slane %v4056_v42, 1  ;;  %v8311_v48 = vsub.s32 0, %v3209_v52  ;;  %v3120_v36 = vadd.f32 %v8258_v22, %v8246_v41 }
 0x31f   : > { %v3197_v8 = vpack.c.bf16 %v3191_v6, %v3190_v21  ;;  %v2274_v0 = vpop.f32.mrb[7].mxu1  ;;  %v6463_v19 = vpack.c.bf16 %v3191_v6, %v3191_v6  ;;  %v2273_v14 = vadd.f32 %v8241_v31, %v2272_v28  ;;  %v4054_v30 = vor.u32 %v4053_v29, %v4049_v43 }
 0x320   : > { %v3196_v57 = vpack.c.bf16 %v3189_v34, %v3188_v27  ;;  %v6667_v50 = vpop.f32.mrb[36].mxu0  ;;  %v6462_v23 = vpack.c.bf16 %v3189_v34, %v3189_v34  ;;  %v2390_v15 = vmax.f32 %v2270_v24, 0.0 }
 0x321   : > { %v8282_v44 = vadd.f32 %v6667_v50, %v3117_v7  ;;  %v3173_v16 = vpop.f32.mrb[37].mxu0  ;;  %v3260_v20 = vrot.slane %v3197_v8, %v8286_v60  ;;  %v2391_v45 = vmax.f32 %v2273_v14, 0.0  ;;  %v8330_v27 = vsel %vm1340_vm8, %v4054_v30, %v4058_v61 }
 0x322   : > { %v8284_v33 = vadd.f32 %v3173_v16, %v3109_v38  ;;  %v6668_v17 = vpop.f32.mrb[38].mxu0  ;;  %v3267_v38 = vrot.slane %v6463_v19, %v8286_v60  ;;  %v8314_v1 = vrot.slane %v3196_v57, %v8286_v60  ;;  %v8317_v12 = vrot.slane %v6462_v23, %v8286_v60  ;;  %10325 = vst [vmem:[#allocation5_spill] sm:$0xff] %v8330_v27 }
 0x323   : > { %v3176_v53 = vpop.f32.mrb[39].mxu0  ;;  %v3268_v49 = vcombine.high %v3260_v20, %v3260_v20  ;;  %v8300_v26 = vrot.slane %v3260_v20, %v8286_v60  ;;  %v3849_v5 = vpack.c.bf16 %v2391_v45, %v2390_v15  ;;  %v3185_v22 = vadd.f32 %v6668_v17, %v3120_v36 }
 0x324   : > { %v3269_v13 = vcombine.high %v3267_v38, %v3267_v38  ;;  %v8303_v32 = vrot.slane %v3267_v38, %v8286_v60  ;;  %v3177_v7 = vadd.f32 %v3176_v53, %v8254_v62  ;;  %v3194_v16 = vmax.f32 %v8282_v44, 0.0 }
 0x325   : > { %v8306_v63 = vrot.slane %v3268_v49, %v8286_v60  ;;  %v8323_v21 = vcombine.high %v8300_v26, %v8300_v26  ;;  %v3417_v28 = vunpack.i.h.s16 %v8300_v26  ;;  %v3872_v0 = vshrl.u32 %v3849_v5, 16 }
 0x326   : > { %v8309_v25 = vrot.slane %v3269_v13, %v8286_v60  ;;  %v8327_v6 = vcombine.high %v8303_v32, %v8303_v32  ;;  %v3425_v41 = vunpack.i.h.s16 %v8303_v32  ;;  %v8346_v55 = vmax.f32 %v3185_v22, 0.0 }
 0x327   : > { %v8334_v34 = vcombine.high %v8306_v63, %v8306_v63  ;;  %v3419_v50 = vunpack.i.h.s16 %v8306_v63  ;;  %v8349_v2 = vrot.slane %v3872_v0, 7  ;;  %v3875_v17 = vshll.u32 %v3849_v5, 16 }
 0x328   : > { %v8340_v8 = vcombine.high %v8309_v25, %v8309_v25  ;;  %v3421_v46 = vunpack.i.h.s16 %v8323_v21  ;;  %v8356_v62 = vpack.c.bf16 %v8346_v55, %v3194_v16  ;;  %v3427_v44 = vunpack.i.h.s16 %v8309_v25 }
 0x329   : > { %v3877_v19 = vor.u32 %v3875_v17, %v8349_v2  ;;  %v3423_v20 = vunpack.i.h.s16 %v8334_v34  ;;  %v3429_v38 = vunpack.i.h.s16 %v8327_v6  ;;  %v3481_v49 = vpack.i.b16 %v3417_v28, %v3417_v28 }
 0x32a   : > { %v8375_v13 = vrot.slane %v8314_v1, %v8286_v60  ;;  %v3431_v42 = vunpack.i.h.s16 %v8340_v8  ;;  %v6474_v23 = vpack.i.b16 %v8300_v26, %v8300_v26  ;;  %v3485_v45 = vpack.i.b16 %v3421_v46, %v3421_v46 }
 0x32b   : > { %v2277_v39 = vpop.f32.mrb[8].mxu1  ;;  %v8379_v24 = vsel %vm6946_vm2, 0, %v3877_v19  ;;  %v3489_v30 = vpack.i.b16 %v3425_v41, %v3425_v41  ;;  %v6475_v15 = vpack.i.b16 %v8306_v63, %v8306_v63  ;;  %v6476_v61 = vpack.i.b16 %v8323_v21, %v8323_v21 }
 0x32c   : > { %v2279_v9 = vpop.f32.mrb[9].mxu1  ;;  %v2278_v57 = vadd.f32 %v8241_v31, %v2277_v39  ;;  %10326 = vst [vmem:[#allocation6_spill] sm:$0xff] %v8379_v24  ;;  %4448 = vrot.lane.b32.xlu1 %v8379_v24, %s6845_s23  ;;  %v3491_v36 = vpack.i.b16 %v3427_v44, %v3427_v44  ;;  %v6477_v5 = vpack.i.b16 %v8334_v34, %v8334_v34 }
 0x32d   : > { %v2280_v35 = vpop.f32.mrb[10].mxu1  ;;  %v3192_v9 = vmax.f32 %v8284_v33, 0.0  ;;  %v3487_v28 = vpack.i.b16 %v3423_v20, %v3423_v20  ;;  %v6479_v26 = vpack.i.b16 %v8309_v25, %v8309_v25  ;;  %v3493_v41 = vpack.i.b16 %v3429_v38, %v3429_v38 }
 0x32e   : > { %v2282_v56 = vpop.f32.mrb[11].mxu1  ;;  %v2281_v40 = vadd.f32 %v8241_v31, %v2280_v35  ;;  %v2392_v53 = vmax.f32 %v2278_v57, 0.0  ;;  %v3219_v35 = vcombine.high %v8314_v1, %v8314_v1  ;;  %v6478_v1 = vpack.i.b16 %v8303_v32, %v8303_v32 }
 0x32f   : > { %v8352_v56 = vmax.f32 %v3177_v7, 0.0  ;;  %v6480_v22 = vpack.i.b16 %v8327_v6, %v8327_v6  ;;  %v6481_v63 = vpack.i.b16 %v8340_v8, %v8340_v8  ;;  %v3599_v21 = vrot.slane %v3481_v49, %v8311_v48 }
 0x330   : > { %v2393_v39 = vmax.f32 %v2281_v40, 0.0  ;;  %v3495_v32 = vpack.i.b16 %v3431_v42, %v3431_v42  ;;  %v3595_v7 = vrot.slane %v6474_v23, %v8311_v48  ;;  %v3615_v34 = vrot.slane %v3485_v45, %v8311_v48  ;;  %4384 = vrot.lane.b32.xlu1 %v8270_v11, %s6849_s18 }
 0x331   : > { %v3198_v33 = vpack.c.bf16 %v8352_v56, %v3192_v9  ;;  %v3631_v57 = vrot.slane %v3489_v30, %v8311_v48  ;;  %v3603_v25 = vrot.slane %v6475_v15, %v8311_v48  ;;  %v3611_v6 = vrot.slane %v6476_v61, %v8311_v48 }
 0x332   : > { %v8369_v14 = vpack.c.bf16 %v2393_v39, %v2392_v53  ;;  %v3639_v8 = vrot.slane %v3491_v36, %v8311_v48  ;;  %v3619_v16 = vrot.slane %v6477_v5, %v8311_v48  ;;  %v3623_v40 = vrot.slane %v3487_v28, %v8311_v48 }
 0x333   : > { %v3627_v17 = vrot.slane %v6478_v1, %v8311_v48  ;;  %v3647_v9 = vrot.slane %v3493_v41, %v8311_v48  ;;  %v3635_v46 = vrot.slane %v6479_v26, %v8311_v48  ;;  %v3643_v53 = vrot.slane %v6480_v22, %v8311_v48 }
 0x334   : > { %v8418_v39 = vcombine.low %v3595_v7, %v3599_v21  ;;  %v3655_v19 = vrot.slane %v3495_v32, %v8311_v48  ;;  %v3309_v20 = vrot.slane %v3198_v33, %v8286_v60  ;;  %4322 = vrot.lane.b32.xlu1 %v8330_v27, %s6846_s15  ;;  %v8434_v49 = vrot.slane %v8317_v12, %v8286_v60 }
 0x335   : > { %v8430_v38 = vcombine.low %v3635_v46, %v3639_v8  ;;  %v3651_v42 = vrot.slane %v6481_v63, %v8311_v48  ;;  %v8440_v23 = vcombine.low %v3619_v16, %v3623_v40  ;;  %v8442_v45 = vcombine.low %v3643_v53, %v3647_v9 }
 0x336   : > { %v8445_v33 = vrot.slane %v3219_v35, %v8286_v60  ;;  %v8456_v1 = vcombine.high %v8375_v13, %v8375_v13  ;;  %v3317_v26 = vcombine.high %v3309_v20, %v3309_v20  ;;  %v3325_v63 = vrot.slane %v3309_v20, %v8286_v60 }
 0x337   : > { %v8462_v5 = vcombine.low %v3651_v42, %v3655_v19  ;;  %v8476_v32 = vcombine.high %v8434_v49, %v8434_v49 }
 0x338   : > { %v8291_v37 = vpop.f32.mrb[12].mxu1  ;;  %4354 = vrot.lane.b32.xlu1 %v8277_v10, %s6845_s23  ;;  %v8480_v7 = vcombine.high %v8445_v33, %v8445_v33  ;;  %v3347_v46 = vcombine.high %v3325_v63, %v3325_v63  ;;  %v3433_v20 = vunpack.i.h.s16 %v3325_v63  ;;  %v6482_v28 = vpack.i.b16 %v3325_v63, %v3325_v63 }
 0x339   : > { %v2287_v47 = vpop.f32.mrb[13].mxu1  ;;  %v8494_v16 = vadd.f32 %v8241_v31, %v8291_v37 }
 0x33a   : > { %v8294_v59 = vpop.f32.mrb[14].mxu1  ;;  %v3220_v47 = vcombine.high %v8317_v12, %v8317_v12  ;;  %v3497_v41 = vpack.i.b16 %v3433_v20, %v3433_v20  ;;  %v3659_v4 = vrot.slane %v6482_v28, %v8311_v48 }
 0x33b   : > { %v2290_v58 = vpop.f32.mrb[15].mxu1  ;;  %v8498_v40 = vadd.f32 %v8241_v31, %v8294_v59 }
 0x33c   : > { %v3483_v58 = vpack.i.b16 %v3419_v50, %v3419_v50  ;;  %v6464_v50 = vpack.c.bf16 %v8352_v56, %v8352_v56  ;;  %v8425_v56 = vcombine.low %v3627_v17, %v3631_v57  ;;  %v8452_v61 = vrot.slane %v3220_v47, %v8286_v60  ;;  %4386 = vrot.lane.b32.xlu1 %v8379_v24, %s6849_s18 }
 0x33d   : > { %v8505_v17 = vsel %vm6946_vm2, %v8349_v2, 0  ;;  %v6484_v2 = vpack.i.b16 %v3347_v46, %v3347_v46  ;;  %v3663_v63 = vrot.slane %v3497_v41, %v8311_v48 }
 0x33e   : > { %v3607_v0 = vrot.slane %v3483_v58, %v8311_v48  ;;  %v3316_v58 = vrot.slane %v6464_v50, %v8286_v60  ;;  %v3339_v50 = vrot.slane %v3317_v26, %v8286_v60 }
 0x340   : > { %v8420_v44 = vcombine.low %v3603_v25, %v3607_v0  ;;  %v3318_v22 = vcombine.high %v3316_v58, %v3316_v58  ;;  %v3332_v21 = vrot.slane %v3316_v58, %v8286_v60  ;;  %v3349_v19 = vcombine.high %v3339_v50, %v3339_v50 }
 0x341   : > { %v3435_v37 = vunpack.i.h.s16 %v3339_v50  ;;  %v6483_v0 = vpack.i.b16 %v3339_v50, %v3339_v50 }
 0x342   : > { %v3346_v9 = vrot.slane %v3318_v22, %v8286_v60  ;;  %v3348_v53 = vcombine.high %v3332_v21, %v3332_v21  ;;  %v3441_v58 = vunpack.i.h.s16 %v3332_v21  ;;  %v6485_v8 = vpack.i.b16 %v3349_v19, %v3349_v19 }
 0x343   : > { %v3499_v12 = vpack.i.b16 %v3435_v37, %v3435_v37  ;;  %v3667_v50 = vrot.slane %v6483_v0, %v8311_v48 }
 0x344   : > { %v3350_v42 = vcombine.high %v3346_v9, %v3346_v9  ;;  %v3443_v59 = vunpack.i.h.s16 %v3346_v9  ;;  %v3445_v26 = vunpack.i.h.s16 %v3348_v53  ;;  %v3505_v25 = vpack.i.b16 %v3441_v58, %v3441_v58 }
 0x345   : > { %v6487_v57 = vpack.i.b16 %v3346_v9, %v3346_v9  ;;  %v6488_v54 = vpack.i.b16 %v3348_v53, %v3348_v53  ;;  %v3683_v53 = vrot.slane %v6485_v8, %v8311_v48 }
 0x346   : > { %v3447_v15 = vunpack.i.h.s16 %v3350_v42  ;;  %v3507_v10 = vpack.i.b16 %v3443_v59, %v3443_v59  ;;  %v3509_v18 = vpack.i.b16 %v3445_v26, %v3445_v26  ;;  %v6489_v11 = vpack.i.b16 %v3350_v42, %v3350_v42 }
 0x347   : > { %v8358_v52 = vpop.f32.mrb[16].mxu1  ;;  %v3695_v28 = vrot.slane %v3505_v25, %v8311_v48  ;;  %v3699_v58 = vrot.slane %v6487_v57, %v8311_v48  ;;  %v8528_v59 = vcombine.low %v3659_v4, %v3663_v63  ;;  %v6466_v4 = vpack.i.b16 %v8375_v13, %v8375_v13 }
 0x348   : > { %v2295_v51 = vpop.f32.mrb[17].mxu1  ;;  %v3511_v27 = vpack.i.b16 %v3447_v15, %v3447_v15  ;;  %v3703_v0 = vrot.slane %v3507_v10, %v8311_v48  ;;  %v3711_v42 = vrot.slane %v3509_v18, %v8311_v48  ;;  %v3413_v18 = vunpack.i.h.s16 %v8476_v32 }
 0x349   : > { %v8371_v29 = vpop.f32.mrb[18].mxu1  ;;  %v8423_v51 = vcombine.low %v3611_v6, %v3615_v34  ;;  %v8485_v34 = vcombine.high %v8452_v61, %v8452_v61  ;;  %v6486_v6 = vpack.i.b16 %v3332_v21, %v3332_v21  ;;  %v3879_v63 = vshrl.u32 %v8369_v14, 16 }
 0x34a   : > { %v2298_v43 = vpop.f32.mrb[19].mxu1  ;;  %v3719_v8 = vrot.slane %v3511_v27, %v8311_v48  ;;  %v8538_v10 = vcombine.low %v3699_v58, %v3703_v0  ;;  %v10327_v27 = vunpack.i.h.s16 %v8375_v13  ;;  %v2297_v0 = vadd.f32 %v8241_v31, %v8371_v29 }
 0x34b   : > { %v3691_v15 = vrot.slane %v6486_v6, %v8311_v48  ;;  %v3881_v13 = vrot.slane %v3879_v63, 7 }
 0x34d   : > { %v8536_v57 = vcombine.low %v3691_v15, %v3695_v28  ;;  %v2395_v15 = vmax.f32 %v8498_v40, 0.0  ;;  %v4061_v28 = vshrl.u32 %v8379_v24, 16  ;;  %v6469_v40 = vpack.i.b16 %v8480_v7, %v8480_v7 }
 0x354   : > { %v8437_v43 = vpop.f32.mrb[20].mxu1 }
 0x355   : > { %v2303_v30 = vpop.f32.mrb[21].mxu1 }
 0x356   : > { %v8458_v36 = vpop.f32.mrb[22].mxu1  ;;  %v3437_v30 = vunpack.i.h.s16 %v3347_v46  ;;  %v3671_v46 = vrot.slane %v3499_v12, %v8311_v48  ;;  %v3707_v12 = vrot.slane %v6488_v54, %v8311_v48  ;;  %v3407_v54 = vunpack.i.h.s16 %v8480_v7 }
 0x357   : > { %v2306_v47 = vpop.f32.mrb[23].mxu1 }
 0x358   : > { %v3439_v47 = vunpack.i.h.s16 %v3349_v19  ;;  %v3501_v35 = vpack.i.b16 %v3437_v30, %v3437_v30  ;;  %v3675_v19 = vrot.slane %v6484_v2, %v8311_v48  ;;  %v3715_v30 = vrot.slane %v6489_v11, %v8311_v48 }
 0x359   : > { %v8530_v6 = vcombine.low %v3667_v50, %v3671_v46  ;;  %v8551_v2 = vpack.i.b16 %v10327_v27, %v10327_v27  ;;  %v3415_v50 = vunpack.i.h.s16 %v8485_v34  ;;  %v10328_v46 = vunpack.i.h.s16 %v8445_v33 }
 0x35a   : > { %v3503_v22 = vpack.i.b16 %v3439_v47, %v3439_v47  ;;  %v3679_v21 = vrot.slane %v3501_v35, %v8311_v48  ;;  %v8542_v47 = vcombine.low %v3707_v12, %v3711_v42  ;;  %v8544_v11 = vcombine.low %v3715_v30, %v3719_v8 }
 0x35b   : > { %v6468_v12 = vpack.i.b16 %v8456_v1, %v8456_v1  ;;  %v10329_v42 = vunpack.i.h.s16 %v8456_v1  ;;  %v8581_v30 = vpack.i.b16 %v3407_v54, %v3407_v54  ;;  %v2302_v54 = vadd.f32 %v8241_v31, %v8437_v43 }
 0x35c   : > { %v3687_v37 = vrot.slane %v3503_v22, %v8311_v48  ;;  %v8532_v25 = vcombine.low %v3675_v19, %v3679_v21  ;;  %v6467_v22 = vpack.i.b16 %v8445_v33, %v8445_v33  ;;  %v8560_v19 = vpack.i.b16 %v10328_v46, %v10328_v46 }
 0x35d   : > { %v4063_v21 = vshll.u32 %v8379_v24, 16  ;;  %v2294_v33 = vadd.f32 %v8241_v31, %v8358_v52  ;;  %v2397_v46 = vmax.f32 %v2297_v0, 0.0  ;;  %v6470_v43 = vpack.i.b16 %v8434_v49, %v8434_v49 }
 0x35e   : > { %v8534_v26 = vcombine.low %v3683_v53, %v3687_v37  ;;  %v3882_v53 = vshll.u32 %v8369_v14, 16  ;;  %v2394_v37 = vmax.f32 %v8494_v16, 0.0  ;;  %v8577_v14 = vpack.i.b16 %v10329_v42, %v10329_v42 }
 0x35f   : > { %v4065_v58 = vrot.slane %v4063_v21, 1  ;;  %v2396_v63 = vmax.f32 %v2294_v33, 0.0  ;;  %v4262_v0 = vrot.slane %v8505_v17, 1 }
 0x360   : > { %v3884_v16 = vor.u32 %v3882_v53, %v3881_v13  ;;  %v4261_v53 = vrot.slane %v8379_v24, 1 }
 0x361   : > { %v4066_v8 = vor.u32 %v4065_v58, %v4061_v28  ;;  %v8604_v58 = vpack.c.bf16 %v2397_v46, %v2396_v63 }
 0x362   : > { %v8585_v29 = vsel %vm6946_vm2, 0, %v3884_v16 }
 0x363   : > { %v8510_v20 = vpop.f32.mrb[24].mxu1  ;;  %10330 = vst [vmem:[#allocation7_spill] sm:$0xff] %v8585_v29  ;;  %v4075_v7 = vshll.u32 %v8585_v29, 16 }
 0x364   : > { %v2311_v9 = vpop.f32.mrb[25].mxu1 }
 0x365   : > { %v8520_v41 = vpop.f32.mrb[26].mxu1  ;;  %v4068_v9 = vshll.u32 %v8505_v17, 16  ;;  %v4077_v42 = vrot.slane %v4075_v7, 1  ;;  %v6472_v17 = vpack.i.b16 %v8476_v32, %v8476_v32  ;;  %v3479_v32 = vpack.i.b16 %v3415_v50, %v3415_v50 }
 0x366   : > { %v2314_v35 = vpop.f32.mrb[27].mxu1  ;;  %v3547_v50 = vrot.slane %v6468_v12, %v8311_v48 }
 0x367   : > { %v3851_v35 = vpack.c.bf16 %v2395_v15, %v2394_v37  ;;  %v4070_v52 = vrot.slane %v4068_v9, 1  ;;  %v8598_v37 = vsel %vm6946_vm2, %v3881_v13, 0  ;;  %v2305_v13 = vadd.f32 %v8241_v31, %v8458_v36 }
 0x368   : > { %v8628_v36 = vsel %vm1564_vm7, %v4261_v53, %v4262_v0  ;;  %v4080_v7 = vshll.u32 %v8598_v37, 16  ;;  %v3531_v53 = vrot.slane %v6466_v4, %v8311_v48  ;;  %v3535_v0 = vrot.slane %v8551_v2, %v8311_v48 }
 0x369   : > { %v3886_v27 = vshrl.u32 %v3851_v35, 16  ;;  %v8590_v21 = vsel %vm1340_vm8, %v4066_v8, %v4070_v52  ;;  %v3889_v28 = vshll.u32 %v3851_v35, 16  ;;  %v10331_v8 = vunpack.i.h.s16 %v8434_v49  ;;  %10333 = vst [vmem:[#allocation9_spill] sm:$0xff] %v8628_v36 }
 0x36a   : > { %4480 = vrot.lane.b32.xlu0 %v8590_v21, %s6849_s18  ;;  %4324 = vrot.lane.b32.xlu1 %v8590_v21, %s6846_s15  ;;  %v6471_v52 = vpack.i.b16 %v8452_v61, %v8452_v61  ;;  %v4073_v49 = vshrl.u32 %v8585_v29, 16  ;;  %v3551_v4 = vrot.slane %v8577_v14, %v8311_v48  ;;  %v4082_v2 = vrot.slane %v4080_v7, 1 }
 0x36b   : > { %v3888_v15 = vrot.slane %v3886_v27, 7  ;;  %v8616_v35 = vpack.i.b16 %v10331_v8, %v10331_v8  ;;  %v10332_v27 = vunpack.i.h.s16 %v8452_v61  ;;  %v2398_v61 = vmax.f32 %v2302_v54, 0.0 }
 0x36c   : > { %v4078_v8 = vor.u32 %v4077_v42, %v4073_v49  ;;  %v3543_v54 = vrot.slane %v8560_v19, %v8311_v48  ;;  %v3555_v42 = vrot.slane %v6469_v40, %v8311_v48  ;;  %v3571_v12 = vrot.slane %v6471_v52, %v8311_v48 }
 0x36d   : > { %v8623_v63 = vpack.i.b16 %v10332_v27, %v10332_v27  ;;  %v3891_v46 = vor.u32 %v3889_v28, %v3888_v15  ;;  %v2399_v28 = vmax.f32 %v2305_v13, 0.0  ;;  %v3893_v27 = vshrl.u32 %v8604_v58, 16 }
 0x36e   : > { %4418 = vrot.lane.b32.xlu0 %v8628_v36, %s6846_s15  ;;  %4356 = vrot.lane.b32.xlu1 %v8628_v36, %s6845_s23  ;;  %v3563_v13 = vrot.slane %v6470_v43, %v8311_v48  ;;  %v3567_v19 = vrot.slane %v8616_v35, %v8311_v48  ;;  %v8666_v14 = vsel %vm1340_vm8, %v4078_v8, %v4082_v2  ;;  %v4264_v52 = vrot.slane %v8585_v29, 1 }
 0x36f   : > { %v8647_v24 = vpack.c.bf16 %v2399_v28, %v2398_v61  ;;  %v3579_v43 = vrot.slane %v6472_v17, %v8311_v48  ;;  %v3895_v49 = vrot.slane %v3893_v27, 7  ;;  %v4945_v61 = vrot.slane %v8440_v23, %v8286_v60 }
 0x370   : > { %v8587_v1 = vpop.f32.mrb[28].mxu1  ;;  %v3591_v28 = vrot.slane %v3479_v32, %v8311_v48  ;;  %v8680_v8 = vcombine.low %v3531_v53, %v3535_v0  ;;  %v4265_v23 = vrot.slane %v8598_v37, 1 }
 0x371   : > { %v2319_v9 = vpop.f32.mrb[29].mxu1 }
 0x372   : > { %v8606_v33 = vpop.f32.mrb[30].mxu1  ;;  %v3477_v9 = vpack.i.b16 %v3413_v18, %v3413_v18  ;;  %v3539_v18 = vrot.slane %v6467_v22, %v8311_v48  ;;  %v3559_v22 = vrot.slane %v8581_v30, %v8311_v48  ;;  %4450 = vrot.lane.b32.xlu0 %v8585_v29, %s6845_s23  ;;  %4388 = vrot.lane.b32.xlu1 %v8585_v29, %s6849_s18 }
 0x373   : > { %v2322_v16 = vpop.f32.mrb[31].mxu1  ;;  %v3575_v30 = vrot.slane %v8623_v63, %v8311_v48  ;;  %v8684_v63 = vsel %vm6946_vm2, %v3888_v15, 0  ;;  %v3358_v15 = vrot.slane %v8356_v62, %v8286_v60  ;;  %v8713_v62 = vcombine.low %v3563_v13, %v3567_v19 }
 0x374   : > { %v6473_v16 = vpack.i.b16 %v8485_v34, %v8485_v34  ;;  %v8645_v34 = vsel %vm6946_vm2, 0, %v3891_v46  ;;  %v6465_v46 = vpack.c.bf16 %v8346_v55, %v8346_v55  ;;  %v3583_v7 = vrot.slane %v3477_v9, %v8311_v48 }
 0x375   : > { %10334 = vst [vmem:[#allocation10_spill] sm:$0xff] %v8645_v34  ;;  %v4087_v40 = vshll.u32 %v8645_v34, 16  ;;  %v3896_v55 = vshll.u32 %v8604_v58, 16  ;;  %v8691_v17 = vcombine.low %v3539_v18, %v3543_v54  ;;  %v8693_v9 = vcombine.low %v3547_v50, %v3551_v4 }
 0x376   : > { %v3587_v35 = vrot.slane %v6473_v16, %v8311_v48  ;;  %4482 = vrot.lane.b32.xlu0 %v8666_v14, %s6849_s18  ;;  %4326 = vrot.lane.b32.xlu1 %v8666_v14, %s6846_s15  ;;  %v8696_v32 = vcombine.low %v3555_v42, %v3559_v22  ;;  %v3365_v53 = vrot.slane %v6465_v46, %v8286_v60  ;;  %v4085_v27 = vshrl.u32 %v8645_v34, 16 }
 0x377   : > { %v4089_v16 = vrot.slane %v4087_v40, 1  ;;  %v3898_v0 = vor.u32 %v3896_v55, %v3895_v49  ;;  %v8702_v58 = vsel %vm1564_vm7, %v4264_v52, %v4265_v23  ;;  %v4092_v18 = vshll.u32 %v8684_v63, 16 }
 0x378   : > { %10335 = vst [vmem:[#allocation11_spill] sm:$0xff] %v8702_v58  ;;  %v10336_v54 = vrot.slane %v8423_v51, %v8286_v60  ;;  %v8715_v2 = vcombine.low %v3571_v12, %v3575_v30  ;;  %v8723_v22 = vcombine.low %v3579_v43, %v3583_v7  ;;  %v10337_v46 = vrot.slane %v8420_v44, %v8286_v60 }
 0x379   : > { %v4090_v40 = vor.u32 %v4089_v16, %v4085_v27  ;;  %v10338_v13 = vrot.slane %v8418_v39, %v8286_v60  ;;  %v8733_v30 = vcombine.low %v3587_v35, %v3591_v28  ;;  %v3366_v52 = vcombine.high %v3358_v15, %v3358_v15 }
 0x37a   : > { %v4947_v37 = vcombine.low %v10336_v54, %v4945_v61  ;;  %4420 = vrot.lane.b32.xlu0 %v8702_v58, %s6846_s15  ;;  %4358 = vrot.lane.b32.xlu1 %v8702_v58, %s6845_s23  ;;  %v3367_v61 = vcombine.high %v3365_v53, %v3365_v53  ;;  %v8737_v55 = vsel %vm6946_vm2, 0, %v3898_v0  ;;  %v4840_v7 = vrot.slane %v8693_v9, %v8286_v60 }
 0x37b   : > { %v4946_v19 = vcombine.low %v10338_v13, %v10337_v46  ;;  %v4094_v23 = vrot.slane %v4092_v18, 1  ;;  %v4994_v39 = vrot.slane %v8462_v5, %v8286_v60  ;;  %v8747_v28 = vrot.slane %v3358_v15, %v8286_v60 }
 0x37c   : > { %v4961_v44 = vrot.slane %v4947_v37, %v8286_v60  ;;  %v8750_v16 = vrot.slane %v3365_v53, %v8286_v60  ;;  %v4099_v0 = vshll.u32 %v8737_v55, 16  ;;  %v8766_v27 = vrot.slane %v3366_v52, %v8286_v60 }
 0x37d   : > { %v8759_v5 = vsel %vm1340_vm8, %v4090_v40, %v4094_v23  ;;  %v4954_v15 = vrot.slane %v4946_v19, %v8286_v60  ;;  %v8769_v18 = vrot.slane %v3367_v61, %v8286_v60  ;;  %v4267_v54 = vrot.slane %v8645_v34, 1 }
 0x37e   : > { %4452 = vrot.lane.b32.xlu0 %v8645_v34, %s6845_s23  ;;  %4390 = vrot.lane.b32.xlu1 %v8645_v34, %s6849_s18  ;;  %v8774_v37 = vsel %vm6946_vm2, %v3895_v49, 0  ;;  %v10339_v46 = vrot.slane %v8442_v45, %v8286_v60  ;;  %v8782_v19 = vcombine.high %v8747_v28, %v8747_v28  ;;  %v8786_v52 = vcombine.high %v8750_v16, %v8750_v16 }
 0x37f   : > { %v8709_v50 = vpop.f32.mrb[32].mxu1  ;;  %v4962_v40 = vcombine.low %v4954_v15, %v4961_v44  ;;  %v4268_v49 = vrot.slane %v8684_v63, 1  ;;  %v2310_v45 = vadd.f32 %v8241_v31, %v8510_v20  ;;  %v3449_v61 = vunpack.i.h.s16 %v8747_v28 }
 0x380   : > { %v2327_v42 = vpop.f32.mrb[33].mxu1  ;;  %v4996_v13 = vcombine.low %v10339_v46, %v4994_v39  ;;  %v4101_v23 = vrot.slane %v4099_v0, 1  ;;  %v10340_v44 = vrot.slane %v8430_v38, %v8286_v60  ;;  %v10341_v39 = vrot.slane %v8425_v56, %v8286_v60 }
 0x381   : > { %v8731_v12 = vpop.f32.mrb[34].mxu1  ;;  %v3900_v42 = vshrl.u32 %v8647_v24, 16  ;;  %v8804_v63 = vsel %vm1564_vm7, %v4267_v54, %v4268_v49  ;;  %v4104_v46 = vshll.u32 %v8774_v37, 16  ;;  %v4847_v20 = vrot.slane %v8696_v32, %v8286_v60 }
 0x382   : > { %v2330_v43 = vpop.f32.mrb[35].mxu1  ;;  %4484 = vrot.lane.b32.xlu0 %v8759_v5, %s6849_s18  ;;  %4328 = vrot.lane.b32.xlu1 %v8759_v5, %s6846_s15  ;;  %v4995_v15 = vcombine.low %v10341_v39, %v10340_v44  ;;  %10342 = vst [vmem:[#allocation12_spill] sm:$0xff] %v8804_v63  ;;  %v2313_v35 = vadd.f32 %v8241_v31, %v8520_v41  ;;  %v4097_v38 = vshrl.u32 %v8737_v55, 16  ;;  %v5223_v9 = vshrl.u32 %v4962_v40, 16 }
 0x383   : > { %v8813_v0 = vrot.slane %v3900_v42, 7  ;;  %v5010_v56 = vrot.slane %v4996_v13, %v8286_v60  ;;  %v8819_v54 = vcombine.high %v8766_v27, %v8766_v27  ;;  %v2400_v42 = vmax.f32 %v2310_v45, 0.0 }
 0x384   : > { %v8833_v13 = vcombine.high %v8769_v18, %v8769_v18  ;;  %v3903_v39 = vshll.u32 %v8647_v24, 16  ;;  %v5003_v32 = vrot.slane %v4995_v15, %v8286_v60  ;;  %v3451_v41 = vunpack.i.h.s16 %v8766_v27 }
 0x385   : > { %v4106_v4 = vrot.slane %v4104_v46, 1  ;;  %v4849_v51 = vcombine.low %v4840_v7, %v4847_v20  ;;  %v2401_v58 = vmax.f32 %v2313_v35, 0.0  ;;  %v8839_v45 = vrot.slane %v5223_v9, 7 }
 0x386   : > { %4422 = vrot.lane.b32.xlu0 %v8804_v63, %s6846_s15  ;;  %4360 = vrot.lane.b32.xlu1 %v8804_v63, %s6845_s23  ;;  %v3905_v63 = vor.u32 %v3903_v39, %v8813_v0  ;;  %v5011_v36 = vcombine.low %v5003_v32, %v5010_v56  ;;  %v4896_v34 = vrot.slane %v8733_v30, %v8286_v60  ;;  %v3453_v29 = vunpack.i.h.s16 %v8782_v19 }
 0x387   : > { %v3459_v24 = vunpack.i.h.s16 %v8769_v18  ;;  %v10343_v7 = vrot.slane %v8691_v17, %v8286_v60  ;;  %v10344_v35 = vrot.slane %v8680_v8, %v8286_v60  ;;  %v3461_v30 = vunpack.i.h.s16 %v8786_v52 }
 0x388   : > { %v5226_v15 = vshll.u32 %v4962_v40, 16  ;;  %v2318_v46 = vadd.f32 %v8241_v31, %v8587_v1  ;;  %v8863_v20 = vpack.i.b16 %v3449_v61, %v3449_v61  ;;  %v6491_v17 = vpack.i.b16 %v8766_v27, %v8766_v27 }
 0x389   : > { %v4848_v9 = vcombine.low %v10344_v35, %v10343_v7  ;;  %v4863_v8 = vrot.slane %v4849_v51, %v8286_v60  ;;  %v5230_v56 = vshrl.u32 %v5011_v36, 16  ;;  %v10345_v40 = vrot.slane %v8723_v22, %v8286_v60 }
 0x38a   : > { %4454 = vrot.lane.b32.xlu0 %v8737_v55, %s6845_s23  ;;  %4392 = vrot.lane.b32.xlu1 %v8737_v55, %s6849_s18  ;;  %v3455_v61 = vunpack.i.h.s16 %v8819_v54  ;;  %v2402_v32 = vmax.f32 %v2318_v46, 0.0  ;;  %v10346_v39 = vrot.slane %v8715_v2, %v8286_v60  ;;  %v5029_v35 = vrot.slane %v8530_v6, %v8286_v60 }
 0x38b   : > { %v4898_v1 = vcombine.low %v10345_v40, %v4896_v34  ;;  %v4856_v51 = vrot.slane %v4848_v9, %v8286_v60  ;;  %v4271_v34 = vrot.slane %v8774_v37, 1  ;;  %v8910_v46 = vpack.i.b16 %v3453_v29, %v3453_v29 }
 0x38c   : > { %v8811_v43 = vpop.f32.mrb[36].mxu1  ;;  %v5233_v29 = vshll.u32 %v5011_v36, 16 }
 0x38d   : > { %v2335_v44 = vpop.f32.mrb[37].mxu1  ;;  %v4912_v2 = vrot.slane %v4898_v1, %v8286_v60  ;;  %v5036_v1 = vrot.slane %v8532_v25, %v8286_v60  ;;  %v6495_v25 = vpack.i.b16 %v8769_v18, %v8769_v18 }
 0x38e   : > { %v8829_v49 = vpop.f32.mrb[38].mxu1  ;;  %v4102_v44 = vor.u32 %v4101_v23, %v4097_v38  ;;  %v4270_v38 = vrot.slane %v8737_v55, 1 }
 0x38f   : > { %v2338_v53 = vpop.f32.mrb[39].mxu1 }
 0x390   : > { %v8855_v53 = vpack.c.bf16 %v2401_v58, %v2400_v42  ;;  %v8859_v23 = vsel %vm1340_vm8, %v4102_v44, %v4106_v4  ;;  %v8871_v58 = vsel %vm6946_vm2, 0, %v3905_v63  ;;  %v5228_v4 = vor.u32 %v5226_v15, %v8839_v45 }
 0x391   : > { %4486 = vrot.lane.b32.xlu0 %v8859_v23, %s6849_s18  ;;  %4330 = vrot.lane.b32.xlu1 %v8859_v23, %s6846_s15  ;;  %v2321_v63 = vadd.f32 %v8241_v31, %v8606_v33  ;;  %v8885_v42 = vpack.i.b16 %v3451_v41, %v3451_v41  ;;  %v10347_v44 = vrot.slane %v8713_v62, %v8286_v60  ;;  %v4111_v9 = vshll.u32 %v8871_v58, 16 }
 0x392   : > { %v4864_v31 = vcombine.low %v4856_v51, %v4863_v8  ;;  %v8900_v41 = vsel %vm1564_vm7, %v4270_v38, %v4271_v34  ;;  %v8904_v37 = vsel %vm6946_vm2, 0, %v5228_v4  ;;  %v8906_v15 = vrot.slane %v5230_v56, 7 }
 0x393   : > { %v4897_v7 = vcombine.low %v10347_v44, %v10346_v39  ;;  %v2403_v33 = vmax.f32 %v2321_v63, 0.0  ;;  %10348 = vst [vmem:[#allocation13_spill] sm:$0xff] %v8900_v41  ;;  %v3463_v62 = vunpack.i.h.s16 %v8833_v13  ;;  %v5022_v8 = vrot.slane %v8528_v59, %v8286_v60 }
 0x394   : > { %v4029_v4 = vsel %vm6946_vm2, %v8813_v0, 0  ;;  %v4273_v51 = vrot.slane %v8871_v58, 1  ;;  %v4113_v63 = vrot.slane %v4111_v9, 1  ;;  %v5235_v39 = vor.u32 %v5233_v29, %v8906_v15 }
 0x395   : > { %4424 = vrot.lane.b32.xlu0 %v8900_v41, %s6846_s15  ;;  %5508 = vrot.lane.b32.xlu1 %v8904_v37, %s6845_s23  ;;  %v8918_v38 = vpack.c.bf16 %v2403_v33, %v2402_v32  ;;  %v4905_v56 = vrot.slane %v4897_v7, %v8286_v60  ;;  %v5209_v32 = vshrl.u32 %v4864_v31, 16  ;;  %v5043_v44 = vrot.slane %v8534_v26, %v8286_v60 }
 0x396   : > { %v5044_v0 = vcombine.low %v5022_v8, %v5029_v35  ;;  %v10349_v7 = vunpack.i.h.s16 %v8750_v16  ;;  %v4274_v9 = vrot.slane %v4029_v4, 1  ;;  %v4109_v26 = vshrl.u32 %v8871_v58, 16 }
 0x397   : > { %v4913_v59 = vcombine.low %v4905_v56, %v4912_v2  ;;  %v3519_v2 = vpack.i.b16 %v3455_v61, %v3455_v61  ;;  %v8951_v8 = vpack.i.b16 %v3459_v24, %v3459_v24  ;;  %v4116_v29 = vshll.u32 %v4029_v4, 16 }
 0x398   : > { %v8939_v33 = vpack.i.b16 %v10349_v7, %v10349_v7  ;;  %v5045_v56 = vcombine.low %v5036_v1, %v5043_v44  ;;  %v8956_v7 = vsel %vm1564_vm7, %v4273_v51, %v4274_v9  ;;  %v4114_v6 = vor.u32 %v4113_v63, %v4109_v26 }
 0x399   : > { %4456 = vrot.lane.b32.xlu0 %v8871_v58, %s6845_s23  ;;  %5476 = vrot.lane.b32.xlu1 %v8904_v37, %s6849_s18  ;;  %10350 = vst [vmem:[#allocation14_spill] sm:$0xff] %v8956_v7  ;;  %v8958_v22 = vrot.slane %v5209_v32, 7  ;;  %v5216_v61 = vshrl.u32 %v4913_v59, 16  ;;  %v5052_v18 = vrot.slane %v5044_v0, %v8286_v60  ;;  %v6496_v4 = vpack.i.b16 %v8786_v52, %v8786_v52 }
 0x39a   : > { %v5059_v24 = vrot.slane %v5045_v56, %v8286_v60  ;;  %v5085_v1 = vrot.slane %v8542_v47, %v8286_v60  ;;  %v4118_v51 = vrot.slane %v4116_v29, 1  ;;  %v5212_v63 = vshll.u32 %v4864_v31, 16 }
 0x39b   : > { %v8926_v40 = vpop.f32.mrb[40].mxu1  ;;  %v6497_v47 = vpack.i.b16 %v8833_v13, %v8833_v13  ;;  %v3527_v44 = vpack.i.b16 %v3463_v62, %v3463_v62  ;;  %v8991_v26 = vrot.slane %v5216_v61, 7  ;;  %v3731_v13 = vrot.slane %v6491_v17, %v8311_v48 }
 0x39c   : > { %v2343_v34 = vpop.f32.mrb[41].mxu1  ;;  %v8976_v32 = vcombine.low %v5052_v18, %v5059_v24  ;;  %v8988_v9 = vsel %vm1340_vm8, %v4114_v6, %v4118_v51  ;;  %v5214_v31 = vor.u32 %v5212_v63, %v8958_v22  ;;  %v3735_v62 = vrot.slane %v8885_v42, %v8311_v48 }
 0x39d   : > { %v8934_v36 = vpop.f32.mrb[42].mxu1  ;;  %v5078_v34 = vrot.slane %v8538_v10, %v8286_v60  ;;  %v5071_v10 = vrot.slane %v8536_v57, %v8286_v60  ;;  %4426 = vrot.lane.b32.xlu0 %v8956_v7, %s6846_s15  ;;  %v8983_v57 = vpack.i.b16 %v3461_v30, %v3461_v30  ;;  %v3727_v30 = vrot.slane %v8863_v20, %v8311_v48 }
 0x39e   : > { %v2346_v35 = vpop.f32.mrb[43].mxu1  ;;  %v5219_v6 = vshll.u32 %v4913_v59, 16  ;;  %v10352_v20 = vpack.i.b16 %v8782_v19, %v8782_v19  ;;  %v3751_v17 = vrot.slane %v3519_v2, %v8311_v48  ;;  %v5331_v61 = vshll.u32 %v8904_v37, 16 }
 0x39f   : > { %v8962_v35 = vsel %vm6946_vm2, 0, %v5235_v39  ;;  %v5092_v39 = vrot.slane %v8544_v11, %v8286_v60  ;;  %v5093_v0 = vcombine.low %v5071_v10, %v5078_v34  ;;  %v10351_v11 = vpack.i.b16 %v8747_v28, %v8747_v28 }
 0x3a0   : > { %5510 = vrot.lane.b32.xlu1 %v8962_v35, %s6845_s23  ;;  %v3739_v27 = vrot.slane %v10352_v20, %v8311_v48  ;;  %v5290_v34 = vsel %vm6946_vm2, %v8839_v45, 0  ;;  %v9024_v42 = vsel %vm6946_vm2, 0, %v5214_v31  ;;  %v5422_v59 = vrot.slane %v8904_v37, 1 }
 0x3a1   : > { %v5094_v29 = vcombine.low %v5085_v1, %v5092_v39  ;;  %v3723_v52 = vrot.slane %v10351_v11, %v8311_v48  ;;  %4488 = vrot.lane.b32.xlu0 %v8988_v9, %s6849_s18  ;;  %v5101_v28 = vrot.slane %v5093_v0, %v8286_v60  ;;  %v5221_v24 = vor.u32 %v5219_v6, %v8991_v26 }
 0x3a2   : > { %v3743_v2 = vrot.slane %v8910_v46, %v8311_v48  ;;  %v10353_v45 = vpack.i.b16 %v8819_v54, %v8819_v54  ;;  %v3759_v51 = vrot.slane %v8939_v33, %v8311_v48  ;;  %v3763_v39 = vrot.slane %v6495_v25, %v8311_v48  ;;  %v9132_v33 = vpop.permute.xlu1 %4320 }
 0x3a3   : > { %v5108_v56 = vrot.slane %v5094_v29, %v8286_v60  ;;  %v3767_v46 = vrot.slane %v8951_v8, %v8311_v48  ;;  %v5110_v0 = vcombine.low %v3723_v52, %v3727_v30  ;;  %v5423_v31 = vrot.slane %v5290_v34, 1 }
 0x3a4   : > { %5478 = vrot.lane.b32.xlu1 %v8962_v35, %s6849_s18  ;;  %v3747_v1 = vrot.slane %v10353_v45, %v8311_v48  ;;  %v3771_v29 = vrot.slane %v6496_v4, %v8311_v48  ;;  %v3783_v11 = vrot.slane %v3527_v44, %v8311_v48  ;;  %v5343_v25 = vshll.u32 %v8962_v35, 16 }
 0x3a5   : > { %v9028_v19 = vcombine.low %v5101_v28, %v5108_v56  ;;  %5504 = vrot.lane.b32.xlu0 %v9024_v42, %s6845_s23  ;;  %v5333_v28 = vrot.slane %v5331_v61, 1  ;;  %v5111_v56 = vcombine.low %v3731_v13, %v3735_v62  ;;  %v9050_v20 = vsel %vm1564_vm7, %v5422_v59, %v5423_v31 }
 0x3a6   : > { %v5113_v6 = vcombine.low %v3747_v1, %v3751_v17  ;;  %10354 = vst [vmem:[#allocation15_spill] sm:$0xff] %v9050_v20  ;;  %v3775_v8 = vrot.slane %v8983_v57, %v8311_v48  ;;  %v5112_v52 = vcombine.low %v3739_v27, %v3743_v2  ;;  %v5329_v4 = vshrl.u32 %v8904_v37, 16  ;;  %v9072_v57 = vld [vmem:[%s10232_s5] ss:$0 sm:$0xff] }
 0x3a7   : > { %v5336_v44 = vshll.u32 %v5290_v34, 16  ;;  %v3779_v30 = vrot.slane %v6497_v47, %v8311_v48  ;;  %v5120_v13 = vrot.slane %v5110_v0, %v8286_v60  ;;  %v5291_v62 = vsel %vm6946_vm2, %v8906_v15, 0 }
 0x3a8   : > { %v9020_v18 = vpop.f32.mrb[44].mxu1  ;;  %5472 = vrot.lane.b32.xlu1 %v9024_v42, %s6849_s18  ;;  %v2326_v27 = vadd.f32 %v9072_v57, %v8709_v50  ;;  %v5425_v17 = vrot.slane %v8962_v35, 1  ;;  %v5334_v61 = vor.u32 %v5333_v28, %v5329_v4  ;;  %v5141_v34 = vrot.slane %v5113_v6, %v8286_v60 }
 0x3a9   : > { %v2351_v10 = vpop.f32.mrb[45].mxu1  ;;  %5492 = vrot.lane.b32.xlu0 %v9050_v20, %s6846_s15  ;;  %v2329_v47 = vadd.f32 %v9072_v57, %v8731_v12  ;;  %v5127_v59 = vrot.slane %v5111_v56, %v8286_v60  ;;  %v5345_v15 = vrot.slane %v5343_v25, 1  ;;  %v5134_v45 = vrot.slane %v5112_v52, %v8286_v60 }
 0x3aa   : > { %v9042_v63 = vpop.f32.mrb[46].mxu1  ;;  %v9054_v10 = vsel %vm6946_vm2, 0, %v5221_v24  ;;  %v5162_v24 = vcombine.low %v3779_v30, %v3783_v11  ;;  %v2404_v2 = vmax.f32 %v2326_v27, 0.0  ;;  %v5426_v1 = vrot.slane %v5291_v62, 1 }
 0x3ab   : > { %v2354_v54 = vpop.f32.mrb[47].mxu1  ;;  %v5338_v50 = vrot.slane %v5336_v44, 1  ;;  %v2405_v0 = vmax.f32 %v2329_v47, 0.0  ;;  %v5341_v31 = vshrl.u32 %v8962_v35, 16  ;;  %v2334_v12 = vadd.f32 %v9072_v57, %v8811_v43 }
 0x3ac   : > { %5506 = vrot.lane.b32.xlu1 %v9054_v10, %s6845_s23  ;;  %v5348_v54 = vshll.u32 %v5291_v62, 16  ;;  %v2337_v11 = vadd.f32 %v9072_v57, %v8829_v49  ;;  %v9092_v6 = vsel %vm1564_vm7, %v5425_v17, %v5426_v1  ;;  %v5143_v56 = vcombine.low %v5134_v45, %v5141_v34 }
 0x3ad   : > { %5460 = vrot.lane.b32.xlu0 %v9050_v20, %s6845_s23  ;;  %10355 = vst [vmem:[#allocation16_spill] sm:$0xff] %v9092_v6  ;;  %v9095_v28 = vsel %vm1340_vm8, %v5334_v61, %v5338_v50  ;;  %v9097_v25 = vpack.c.bf16 %v2405_v0, %v2404_v2  ;;  %v5346_v52 = vor.u32 %v5345_v15, %v5341_v31  ;;  %v5319_v4 = vshll.u32 %v9054_v10, 16 }
 0x3ae   : > { %v2406_v44 = vmax.f32 %v2334_v12, 0.0  ;;  %v2407_v30 = vmax.f32 %v2337_v11, 0.0  ;;  %v10356_v43 = vpack.i.b16 %v8750_v16, %v8750_v16  ;;  %v5160_v49 = vcombine.low %v3763_v39, %v3767_v46 }
 0x3af   : > { %v5142_v27 = vcombine.low %v5120_v13, %v5127_v59  ;;  %v5161_v17 = vcombine.low %v3771_v29, %v3775_v8  ;;  %v5350_v61 = vrot.slane %v5348_v54, 1  ;;  %v5289_v34 = vsel %vm6946_vm2, %v8991_v26, 0 }
 0x3b0   : > { %5474 = vrot.lane.b32.xlu1 %v9054_v10, %s6849_s18  ;;  %v3755_v62 = vrot.slane %v10356_v43, %v8311_v48  ;;  %v9111_v47 = vpack.c.bf16 %v2407_v30, %v2406_v44  ;;  %v9119_v39 = vsel %vm6946_vm2, %v8958_v22, 0  ;;  %v5157_v46 = vrot.slane %v5143_v56, %v8286_v60 }
 0x3b1   : > { %5494 = vrot.lane.b32.xlu0 %v9092_v6, %s6846_s15  ;;  %v5416_v8 = vrot.slane %v9024_v42, 1  ;;  %v9124_v13 = vsel %vm1340_vm8, %v5346_v52, %v5350_v61  ;;  %v5321_v26 = vrot.slane %v5319_v4, 1  ;;  %v5190_v59 = vrot.slane %v5162_v24, %v8286_v60 }
 0x3b2   : > { %v5159_v16 = vcombine.low %v3755_v62, %v3759_v51  ;;  %v5176_v48 = vrot.slane %v5160_v49, %v8286_v60  ;;  %v5324_v22 = vshll.u32 %v5289_v34, 16  ;;  %v5150_v51 = vrot.slane %v5142_v27, %v8286_v60  ;;  %v9156_v49 = vpop.permute.xlu1 %4352 }
 0x3b3   : > { %v2342_v45 = vadd.f32 %v9072_v57, %v8926_v40  ;;  %v5183_v24 = vrot.slane %v5161_v17, %v8286_v60  ;;  %v5417_v50 = vrot.slane %v9119_v39, 1  ;;  %v5317_v0 = vshrl.u32 %v9054_v10, 16 }
 0x3b4   : > { %5524 = vrot.lane.b32.xlu1 %v9095_v28, %s6849_s18  ;;  %v2345_v31 = vadd.f32 %v9072_v57, %v8934_v36  ;;  %v5169_v54 = vrot.slane %v5159_v16, %v8286_v60  ;;  %v5158_v12 = vcombine.low %v5150_v51, %v5157_v46  ;;  %v2350_v56 = vadd.f32 %v9072_v57, %v9020_v18 }
 0x3b5   : > { %5462 = vrot.lane.b32.xlu0 %v9092_v6, %s6845_s23  ;;  %v2408_v11 = vmax.f32 %v2342_v45, 0.0  ;;  %v9146_v52 = vsel %vm1564_vm7, %v5416_v8, %v5417_v50  ;;  %v5322_v40 = vor.u32 %v5321_v26, %v5317_v0  ;;  %v5192_v4 = vcombine.low %v5183_v24, %v5190_v59 }
 0x3b6   : > { %10357 = vst [vmem:[#allocation17_spill] sm:$0xff] %v9146_v52  ;;  %v2409_v44 = vmax.f32 %v2345_v31, 0.0  ;;  %v5326_v36 = vrot.slane %v5324_v22, 1  ;;  %v5191_v30 = vcombine.low %v5169_v54, %v5176_v48  ;;  %v2410_v62 = vmax.f32 %v2350_v56, 0.0 }
 0x3b7   : > { %v2357_v15 = vpop.f32.mrb[48].mxu1  ;;  %v2353_v18 = vadd.f32 %v9072_v57, %v9042_v63  ;;  %v5251_v27 = vshrl.u32 %v5158_v12, 16  ;;  %v5419_v16 = vrot.slane %v9054_v10, 1  ;;  %v5420_v59 = vrot.slane %v5289_v34, 1 }
 0x3b8   : > { %v2359_v29 = vpop.f32.mrb[49].mxu1  ;;  %5526 = vrot.lane.b32.xlu1 %v9124_v13, %s6849_s18  ;;  %v9152_v43 = vpack.c.bf16 %v2409_v44, %v2408_v11  ;;  %v2358_v17 = vadd.f32 %v9072_v57, %v2357_v15  ;;  %v9162_v46 = vsel %vm1340_vm8, %v5322_v40, %v5326_v36  ;;  %v5199_v15 = vrot.slane %v5191_v30, %v8286_v60 }
 0x3b9   : > { %v2360_v2 = vpop.f32.mrb[50].mxu1  ;;  %5488 = vrot.lane.b32.xlu0 %v9146_v52, %s6846_s15  ;;  %v5206_v29 = vrot.slane %v5192_v4, %v8286_v60  ;;  %v2411_v8 = vmax.f32 %v2353_v18, 0.0  ;;  %v9172_v48 = vrot.slane %v5251_v27, 7  ;;  %v9177_v51 = vsel %vm1564_vm7, %v5419_v16, %v5420_v59  ;;  %v9184_v60 = vpop.permute.xlu1 %4448 }
 0x3ba   : > { %v2362_v1 = vpop.f32.mrb[51].mxu1  ;;  %v2361_v61 = vadd.f32 %v9072_v57, %v2360_v2  ;;  %v2412_v63 = vmax.f32 %v2358_v17, 0.0  ;;  %10358 = vst [vmem:[#allocation18_spill] sm:$0xff] %v9177_v51  ;;  %v5254_v34 = vshll.u32 %v5158_v12, 16  ;;  %v5307_v50 = vshll.u32 %v9024_v42, 16 }
 0x3bb   : > { %v9170_v2 = vpack.c.bf16 %v2411_v8, %v2410_v62  ;;  %v5207_v45 = vcombine.low %v5199_v15, %v5206_v29  ;;  %v3907_v1 = vshrl.u32 %v8855_v53, 16  ;;  %v3910_v54 = vshll.u32 %v8855_v53, 16 }
 0x3bc   : > { %4362 = vrot.lane.b32.xlu1 %v8900_v41, %s6845_s23  ;;  %v2413_v26 = vmax.f32 %v2361_v61, 0.0  ;;  %v5256_v24 = vor.u32 %v5254_v34, %v9172_v48  ;;  %v5309_v4 = vrot.slane %v5307_v50, 1  ;;  %v5237_v53 = vshrl.u32 %v8976_v32, 16 }
 0x3bd   : > { %5456 = vrot.lane.b32.xlu0 %v9146_v52, %s6845_s23  ;;  %v5258_v0 = vshrl.u32 %v5207_v45, 16  ;;  %v3909_v31 = vrot.slane %v3907_v1, 7  ;;  %v9198_v44 = vpop.permute.xlu1 %4384  ;;  %v5305_v61 = vshrl.u32 %v9024_v42, 16  ;;  %v5312_v16 = vshll.u32 %v9119_v39, 16 }
 0x3be   : > { %v9174_v22 = vpack.c.bf16 %v2413_v26, %v2412_v63  ;;  %v9196_v40 = vsel %vm6946_vm2, 0, %v5256_v24  ;;  %v5261_v29 = vshll.u32 %v5207_v45, 16  ;;  %v9211_v59 = vrot.slane %v5237_v53, 7 }
 0x3bf   : > { %10359 = vst [vmem:[#allocation19_spill] sm:$0xff] %v9196_v40  ;;  %v9200_v30 = vrot.slane %v5258_v0, 7  ;;  %v3912_v17 = vor.u32 %v3910_v54, %v3909_v31  ;;  %v5310_v63 = vor.u32 %v5309_v4, %v5305_v61  ;;  %v5314_v1 = vrot.slane %v5312_v16, 1 }
 0x3c0   : > { %5522 = vrot.lane.b32.xlu1 %v9162_v46, %s6849_s18  ;;  %v5240_v45 = vshll.u32 %v8976_v32, 16 }
 0x3c1   : > { %5490 = vrot.lane.b32.xlu0 %v9177_v51, %s6846_s15  ;;  %v5263_v26 = vor.u32 %v5261_v29, %v9200_v30  ;;  %v9221_v34 = vsel %vm6946_vm2, 0, %v3912_v17  ;;  %v9223_v39 = vpop.permute.xlu1 %4322  ;;  %v9227_v24 = vsel %vm1340_vm8, %v5310_v63, %v5314_v1 }
 0x3c2   : > { %10360 = vst [vmem:[#allocation20_spill] sm:$0xff] %v9221_v34  ;;  %v5242_v0 = vor.u32 %v5240_v45, %v9211_v59  ;;  %v4123_v54 = vshll.u32 %v9221_v34, 16 }
 0x3c3   : > { %v9231_v50 = vsel %vm6946_vm2, 0, %v5263_v26 }
 0x3c4   : > { %4394 = vrot.lane.b32.xlu1 %v8871_v58, %s6849_s18  ;;  %v2365_v11 = vpop.f32.mrb[52].mxu1  ;;  %10361 = vst [vmem:[#allocation21_spill] sm:$0xff] %v9231_v50 }
 0x3c5   : > { %5458 = vrot.lane.b32.xlu0 %v9177_v51, %s6845_s23  ;;  %v2366_v56 = vadd.f32 %v9072_v57, %v2365_v11  ;;  %v2367_v12 = vpop.f32.mrb[53].mxu1  ;;  %v5244_v11 = vshrl.u32 %v9028_v19, 16  ;;  %v9243_v4 = vpop.permute.xlu1 %4354 }
 0x3c6   : > { %v2368_v36 = vpop.f32.mrb[54].mxu1  ;;  %v4121_v12 = vshrl.u32 %v9221_v34, 16 }
 0x3c7   : > { %v2414_v62 = vmax.f32 %v2366_v56, 0.0  ;;  %v2369_v18 = vadd.f32 %v9072_v57, %v2368_v36  ;;  %v2370_v27 = vpop.f32.mrb[55].mxu1  ;;  %v4030_v56 = vsel %vm6946_vm2, %v3909_v31, 0 }
 0x3c8   : > { %4332 = vrot.lane.b32.xlu1 %v8988_v9, %s6846_s15  ;;  %v4128_v31 = vshll.u32 %v4030_v56, 16  ;;  %v9250_v27 = vrot.slane %v5244_v11, 7 }
 0x3c9   : > { %5444 = vrot.lane.b32.xlu0 %v9095_v28, %s6846_s15  ;;  %v2415_v8 = vmax.f32 %v2369_v18, 0.0  ;;  %v4125_v18 = vrot.slane %v4123_v54, 1  ;;  %v9264_v54 = vpop.permute.xlu1 %4386 }
 0x3ca   : > { %v4130_v1 = vrot.slane %v4128_v31, 1 }
 0x3cb   : > { %v9213_v15 = vpack.c.bf16 %v2415_v8, %v2414_v62  ;;  %v9248_v62 = vsel %vm6946_vm2, 0, %v5242_v0  ;;  %v5247_v8 = vshll.u32 %v9028_v19, 16  ;;  %v4126_v26 = vor.u32 %v4125_v18, %v4121_v12  ;;  %v10362_v19 = vld [vmem:[#allocation2_spill] sm:$0xff] }
 0x3cc   : > { %5516 = vrot.lane.b32.xlu1 %v9196_v40, %s6845_s23  ;;  %v5379_v0 = vshll.u32 %v9196_v40, 16  ;;  %v4513_v12 = vsel %vm1887_vm0, %v10362_v19, %v9132_v33  ;;  %v9276_v18 = vsel %vm6946_vm2, %v9172_v48, 0  ;;  %v5391_v33 = vshll.u32 %v9231_v50, 16 }
 0x3cd   : > { %5446 = vrot.lane.b32.xlu0 %v9124_v13, %s6846_s15  ;;  %v5249_v45 = vor.u32 %v5247_v8, %v9250_v27  ;;  %v9279_v31 = vsel %vm1340_vm8, %v4126_v26, %v4130_v1  ;;  %v9294_v8 = vsel %vm809_vm6, %v4513_v12, %v9156_v49  ;;  %v3917_v1 = vshll.u32 %v8918_v38, 16 }
 0x3ce   : > { %v9312_v12 = vsel %vm6946_vm2, %v9200_v30, 0 }
 0x3d0   : > { %5484 = vrot.lane.b32.xlu1 %v9196_v40, %s6849_s18 }
 0x3d1   : > { %5520 = vrot.lane.b32.xlu0 %v9227_v24, %s6849_s18 }
 0x3d3   : > { %v2373_v32 = vpop.f32.mrb[56].mxu1 }
 0x3d4   : > { %5518 = vrot.lane.b32.xlu1 %v9231_v50, %s6845_s23  ;;  %v2374_v36 = vadd.f32 %v9072_v57, %v2373_v32  ;;  %v2375_v53 = vpop.f32.mrb[57].mxu1  ;;  %v4417_v32 = vpop.permute.xlu0 %4416 }
 0x3d5   : > { %v2376_v17 = vpop.f32.mrb[58].mxu1  ;;  %5440 = vrot.lane.b32.xlu0 %v9227_v24, %s6846_s15  ;;  %v4276_v53 = vrot.slane %v9221_v34, 1 }
 0x3d6   : > { %v2416_v61 = vmax.f32 %v2374_v36, 0.0  ;;  %v2377_v16 = vadd.f32 %v9072_v57, %v2376_v17  ;;  %v2378_v29 = vpop.f32.mrb[59].mxu1  ;;  %v3914_v36 = vshrl.u32 %v8918_v38, 16  ;;  %v4277_v17 = vrot.slane %v4030_v56, 1 }
 0x3d7   : > { %v10364_v29 = vld [vmem:[#allocation5_spill] sm:$0xff]  ;;  %v5377_v56 = vshrl.u32 %v9196_v40, 16  ;;  %v4577_v38 = vsel %vm2018_vm1, %v9294_v8, %v9198_v44  ;;  %v5389_v44 = vshrl.u32 %v9231_v50, 16 }
 0x3d8   : > { %5512 = vrot.lane.b32.xlu1 %v9248_v62, %s6845_s23  ;;  %v2417_v63 = vmax.f32 %v2377_v16, 0.0  ;;  %v5381_v16 = vrot.slane %v5379_v0, 1  ;;  %v4626_v48 = vsel %vm1887_vm0, %v10364_v29, %v4417_v32  ;;  %v9298_v26 = vrot.slane %v3914_v36, 7 }
 0x3d9   : > { %4458 = vrot.lane.b32.xlu0 %v9221_v34, %s6845_s23  ;;  %v9307_v29 = vsel %vm1564_vm7, %v4276_v53, %v4277_v17 }
 0x3da   : > { %v9266_v11 = vpack.c.bf16 %v2417_v63, %v2416_v61  ;;  %v9283_v61 = vsel %vm6946_vm2, 0, %v5249_v45  ;;  %v5384_v63 = vshll.u32 %v9276_v18, 16  ;;  %v4673_v45 = vsel %vm809_vm6, %v4626_v48, %v9184_v60  ;;  %10365 = vst [vmem:[#allocation5_spill] sm:$0xff] %v9307_v29 }
 0x3db   : > { %10363 = vst [vmem:[#allocation2_spill] sm:$0xff] %v9283_v61  ;;  %v5382_v49 = vor.u32 %v5381_v16, %v5377_v56  ;;  %v5393_v60 = vrot.slane %v5391_v33, 1  ;;  %v5355_v48 = vshll.u32 %v9248_v62, 16  ;;  %v3919_v6 = vor.u32 %v3917_v1, %v9298_v26 }
 0x3dc   : > { %5480 = vrot.lane.b32.xlu1 %v9248_v62, %s6849_s18  ;;  %v4481_v0 = vpop.permute.xlu0 %4480  ;;  %v9303_v41 = vpop.permute.xlu1 %4324  ;;  %v5386_v30 = vrot.slane %v5384_v63, 1 }
 0x3dd   : > { %4490 = vrot.lane.b32.xlu0 %v9279_v31, %s6849_s18  ;;  %v4705_v32 = vsel %vm2018_vm1, %v4673_v45, %v4481_v0  ;;  %v5396_v0 = vshll.u32 %v9312_v12, 16  ;;  %v5357_v20 = vrot.slane %v5355_v48, 1 }
 0x3de   : > { %5945 = vmatprep.subr.bf16.mxu0 %v4705_v32  ;;  %v9335_v63 = vsel %vm1340_vm8, %v5382_v49, %v5386_v30  ;;  %v5434_v49 = vrot.slane %v9196_v40, 1 }
 0x3df   : > { %5946 = vmatpush1.bf16.xpose.msra.mxu0 %v4577_v38  ;;  %10366 = vst [vmem:[#allocation22_spill] sm:$0xff] %v9335_v63  ;;  %v5398_v1 = vrot.slane %v5396_v0, 1 }
 0x3e0   : > { %5514 = vrot.lane.b32.xlu1 %v9283_v61, %s6845_s23  ;;  %v2381_v36 = vpop.f32.mrb[60].mxu1  ;;  %v4419_v56 = vpop.permute.xlu0 %4418 }
 0x3e1   : > { %4428 = vrot.lane.b32.xlu0 %v9307_v29, %s6846_s15  ;;  %v2382_v53 = vadd.f32 %v9072_v57, %v2381_v36  ;;  %v2383_v17 = vpop.f32.mrb[61].mxu1  ;;  %v9323_v45 = vpop.permute.xlu1 %4356  ;;  %v5292_v36 = vsel %vm6946_vm2, %v9211_v59, 0  ;;  %v4629_v30 = vsel %vm1887_vm0, %v8590_v21, %v4419_v56  ;;  %v5428_v56 = vrot.slane %v9248_v62, 1 }
 0x3e2   : > { %v2384_v16 = vpop.f32.mrb[62].mxu1  ;;  %v5394_v17 = vor.u32 %v5393_v60, %v5389_v44  ;;  %v5360_v52 = vshll.u32 %v5292_v36, 16  ;;  %v5435_v44 = vrot.slane %v9276_v18, 1 }
 0x3e3   : > { %v2418_v32 = vmax.f32 %v2382_v53, 0.0  ;;  %v2385_v33 = vadd.f32 %v9072_v57, %v2384_v16  ;;  %v2386_v38 = vpop.f32.mrb[63].mxu1  ;;  %v5353_v16 = vshrl.u32 %v9248_v62, 16 }
 0x3e4   : > { %5482 = vrot.lane.b32.xlu1 %v9283_v61, %s6849_s18  ;;  %v4451_v57 = vpop.permute.xlu0 %4450  ;;  %v9344_v38 = vsel %vm6946_vm2, 0, %v3919_v6  ;;  %v9350_v60 = vsel %vm1340_vm8, %v5394_v17, %v5398_v1  ;;  %v10369_v6 = vld [vmem:[#allocation8_spill] sm:$0xff]  ;;  %v5362_v40 = vrot.slane %v5360_v52, 1  ;;  %v9365_v21 = vsel %vm1564_vm7, %v5434_v49, %v5435_v44 }
 0x3e5   : > { %5442 = vrot.lane.b32.xlu0 %v9162_v46, %s6846_s15  ;;  %v2419_v51 = vmax.f32 %v2385_v33, 0.0  ;;  %v4389_v53 = vpop.permute.xlu1 %4388  ;;  %10367 = vst [vmem:[#allocation23_spill] sm:$0xff] %v9344_v38  ;;  %10368 = vst [vmem:[#allocation24_spill] sm:$0xff] %v9350_v60  ;;  %v5358_v48 = vor.u32 %v5357_v20, %v5353_v16  ;;  %v4675_v0 = vsel %vm809_vm6, %v4629_v30, %v4451_v57  ;;  %v5429_v57 = vrot.slane %v5292_v36, 1  ;;  %v10372_v36 = vld [vmem:[#allocation6_spill] sm:$0xff] }
 0x3e6   : > { %10370 = vst [vmem:[#allocation8_spill] sm:$0xff] %v9365_v21  ;;  %v5293_v49 = vsel %vm6946_vm2, %v9250_v27, 0  ;;  %v4517_v44 = vsel %vm1887_vm0, %v10372_v36, %v9303_v41  ;;  %v5365_v27 = vshrl.u32 %v9283_v61, 16  ;;  %v4133_v36 = vshrl.u32 %v9344_v38, 16 }
 0x3e7   : > { %v9340_v59 = vpack.c.bf16 %v2419_v51, %v2418_v32  ;;  %v4515_v51 = vsel %vm1887_vm0, %v10369_v6, %v9223_v39  ;;  %v9372_v39 = vsel %vm1340_vm8, %v5358_v48, %v5362_v40  ;;  %v9383_v16 = vsel %vm1564_vm7, %v5428_v56, %v5429_v57 }
 0x3e8   : > { %5532 = vrot.lane.b32.xlu1 %v9335_v63, %s6849_s18  ;;  %v4483_v32 = vpop.permute.xlu0 %4482  ;;  %v4547_v20 = vsel %vm809_vm6, %v4515_v51, %v9243_v4  ;;  %10371 = vst [vmem:[#allocation25_spill] sm:$0xff] %v9383_v16 }
 0x3e9   : > { %4460 = vrot.lane.b32.xlu0 %v9344_v38, %s6845_s23  ;;  %v4327_v33 = vpop.permute.xlu1 %4326  ;;  %v4708_v17 = vsel %vm2018_vm1, %v4675_v0, %v4483_v32  ;;  %v4580_v18 = vsel %vm2018_vm1, %v4547_v20, %v9264_v54  ;;  %v5367_v54 = vshll.u32 %v9283_v61, 16  ;;  %v5372_v32 = vshll.u32 %v5293_v49, 16 }
 0x3ea   : > { %5947 = vmatprep.subr.bf16.mxu0 %v4708_v17  ;;  %v4549_v20 = vsel %vm809_vm6, %v4517_v44, %v9323_v45  ;;  %v5431_v17 = vrot.slane %v9283_v61, 1 }
 0x3eb   : > { %5948 = vmatpush1.bf16.xpose.msra.mxu0 %v4580_v18  ;;  %v5369_v48 = vrot.slane %v5367_v54, 1  ;;  %v4583_v18 = vsel %vm2018_vm1, %v4549_v20, %v4389_v53  ;;  %v5374_v45 = vrot.slane %v5372_v32, 1  ;;  %v4031_v53 = vsel %vm6946_vm2, %v9298_v26, 0 }
 0x3ec   : > { %5534 = vrot.lane.b32.xlu1 %v9350_v60, %s6849_s18  ;;  %v4421_v52 = vpop.permute.xlu0 %4420 }
 0x3ed   : > { %5500 = vrot.lane.b32.xlu0 %v9365_v21, %s6846_s15  ;;  %v4359_v4 = vpop.permute.xlu1 %4358  ;;  %v4632_v30 = vsel %vm1887_vm0, %v8666_v14, %v4421_v52  ;;  %v5370_v41 = vor.u32 %v5369_v48, %v5365_v27  ;;  %v5432_v52 = vrot.slane %v5293_v49, 1  ;;  %v10374_v27 = vld [vmem:[#allocation7_spill] sm:$0xff] }
 0x3ee   : > { %v4519_v32 = vsel %vm1887_vm0, %v10374_v27, %v4327_v33  ;;  %v4280_v27 = vrot.slane %v4031_v53, 1 }
 0x3ef   : > { %v9413_v57 = vsel %vm1564_vm7, %v5431_v17, %v5432_v52  ;;  %v9422_v49 = vsel %vm1340_vm8, %v5370_v41, %v5374_v45 }
 0x3f0   : > { %5528 = vrot.lane.b32.xlu1 %v9372_v39, %s6849_s18  ;;  %v4453_v1 = vpop.permute.xlu0 %4452  ;;  %10373 = vst [vmem:[#allocation6_spill] sm:$0xff] %v9413_v57 }
 0x3f1   : > { %5468 = vrot.lane.b32.xlu0 %v9365_v21, %s6845_s23  ;;  %v4391_v40 = vpop.permute.xlu1 %4390  ;;  %v4677_v6 = vsel %vm809_vm6, %v4632_v30, %v4453_v1  ;;  %v4135_v1 = vshll.u32 %v9344_v38, 16 }
 0x3f3   : > { %v4137_v44 = vrot.slane %v4135_v1, 1 }
 0x3f4   : > { %4364 = vrot.lane.b32.xlu1 %v8956_v7, %s6845_s23  ;;  %v4485_v51 = vpop.permute.xlu0 %4484  ;;  %v10382_v7 = vld [vmem:[#allocation4_spill] sm:$0xff] }
 0x3f5   : > { %5496 = vrot.lane.b32.xlu0 %v9383_v16, %s6846_s15  ;;  %v9398_v0 = vpop.permute.xlu1 %4328  ;;  %v4711_v14 = vsel %vm2018_vm1, %v4677_v6, %v4485_v51  ;;  %v4140_v6 = vshll.u32 %v4031_v53, 16  ;;  %v3921_v51 = vshrl.u32 %v9097_v25, 16  ;;  %v4138_v52 = vor.u32 %v4137_v44, %v4133_v36 }
 0x3f6   : > { %5949 = vmatprep.subr.bf16.mxu0 %v4711_v14  ;;  %v5437_v36 = vrot.slane %v9231_v50, 1 }
 0x3f7   : > { %5950 = vmatpush1.bf16.xpose.msra.mxu0 %v4583_v18  ;;  %v4551_v18 = vsel %vm809_vm6, %v4519_v32, %v4359_v4  ;;  %v4142_v45 = vrot.slane %v4140_v6, 1 }
 0x3f8   : > { %4396 = vrot.lane.b32.xlu1 %v9221_v34, %s6849_s18  ;;  %v4423_v56 = vpop.permute.xlu0 %4422  ;;  %v4586_v1 = vsel %vm2018_vm1, %v4551_v18, %v4391_v40 }
 0x3f9   : > { %5464 = vrot.lane.b32.xlu0 %v9383_v16, %s6845_s23  ;;  %v9410_v54 = vpop.permute.xlu1 %4360  ;;  %v4635_v26 = vsel %vm1887_vm0, %v8759_v5, %v4423_v56  ;;  %v3923_v5 = vrot.slane %v3921_v51, 7  ;;  %v3924_v56 = vshll.u32 %v9097_v25, 16  ;;  %v9450_v4 = vsel %vm1340_vm8, %v4138_v52, %v4142_v45  ;;  %v10378_v45 = vld [vmem:[#allocation10_spill] sm:$0xff] }
 0x3fa   : > { %v5438_v25 = vrot.slane %v9312_v12, 1  ;;  %v3928_v52 = vshrl.u32 %v9111_v47, 16 }
 0x3fb   : > { %v3926_v40 = vor.u32 %v3924_v56, %v3923_v5 }
 0x3fc   : > { %5486 = vrot.lane.b32.xlu1 %v9231_v50, %s6849_s18  ;;  %v4455_v48 = vpop.permute.xlu0 %4454  ;;  %v9461_v51 = vsel %vm1564_vm7, %v5437_v36, %v5438_v25 }
 0x3fd   : > { %5498 = vrot.lane.b32.xlu0 %v9413_v57, %s6846_s15  ;;  %v4393_v30 = vpop.permute.xlu1 %4392  ;;  %v4679_v20 = vsel %vm809_vm6, %v4635_v26, %v4455_v48  ;;  %10375 = vst [vmem:[#allocation7_spill] sm:$0xff] %v9461_v51  ;;  %v4279_v26 = vrot.slane %v9344_v38, 1  ;;  %v9468_v32 = vsel %vm6946_vm2, 0, %v3926_v40 }
 0x3fe   : > { %10376 = vst [vmem:[#allocation26_spill] sm:$0xff] %v9468_v32  ;;  %v4147_v53 = vshll.u32 %v9468_v32, 16 }
 0x3ff   : > { %v9479_v18 = vsel %vm1564_vm7, %v4279_v26, %v4280_v27 }
 0x400   : > { %5530 = vrot.lane.b32.xlu1 %v9422_v49, %s6849_s18  ;;  %10377 = vst [vmem:[#allocation27_spill] sm:$0xff] %v9479_v18  ;;  %v4149_v26 = vrot.slane %v4147_v53, 1 }
 0x401   : > { %5466 = vrot.lane.b32.xlu0 %v9413_v57, %s6845_s23 }
 0x403   : > { %v4487_v14 = vpop.permute.xlu0 %4486  ;;  %v9437_v17 = vpop.permute.xlu1 %4330 }
 0x404   : > { %4334 = vrot.lane.b32.xlu1 %v9279_v31, %s6846_s15  ;;  %v4714_v41 = vsel %vm2018_vm1, %v4679_v20, %v4487_v14  ;;  %v4032_v14 = vsel %vm6946_vm2, %v3923_v5, 0 }
 0x405   : > { %5452 = vrot.lane.b32.xlu0 %v9335_v63, %s6846_s15  ;;  %5951 = vmatprep.subr.bf16.mxu0 %v4714_v41  ;;  %v4152_v40 = vshll.u32 %v4032_v14, 16 }
 0x406   : > { %5952 = vmatpush1.bf16.xpose.msra.mxu0 %v4586_v1  ;;  %v4521_v1 = vsel %vm1887_vm0, %v10378_v45, %v9398_v0  ;;  %v3930_v0 = vrot.slane %v3928_v52, 7 }
 0x407   : > { %v4425_v33 = vpop.permute.xlu0 %4424  ;;  %v9447_v48 = vpop.permute.xlu1 %5508  ;;  %v4553_v25 = vsel %vm809_vm6, %v4521_v1, %v9410_v54  ;;  %v4154_v1 = vrot.slane %v4152_v40, 1 }
 0x408   : > { %4366 = vrot.lane.b32.xlu1 %v9307_v29, %s6845_s23  ;;  %v4638_v41 = vsel %vm1887_vm0, %v8859_v23, %v4425_v33  ;;  %v4145_v33 = vshrl.u32 %v9468_v32, 16  ;;  %v4589_v27 = vsel %vm2018_vm1, %v4553_v25, %v4393_v30 }
 0x409   : > { %4492 = vrot.lane.b32.xlu0 %v9450_v4, %s6849_s18 }
 0x40a   : > { %v4150_v45 = vor.u32 %v4149_v26, %v4145_v33  ;;  %v4283_v33 = vrot.slane %v4032_v14, 1 }
 0x40b   : > { %v4457_v44 = vpop.permute.xlu0 %4456  ;;  %v9458_v6 = vpop.permute.xlu1 %5476 }
 0x40c   : > { %4398 = vrot.lane.b32.xlu1 %v9344_v38, %s6849_s18  ;;  %v4681_v5 = vsel %vm809_vm6, %v4638_v41, %v4457_v44  ;;  %v3931_v44 = vshll.u32 %v9111_v47, 16  ;;  %v9518_v52 = vsel %vm1340_vm8, %v4150_v45, %v4154_v1  ;;  %v3938_v45 = vshll.u32 %v9152_v43, 16 }
 0x40d   : > { %5502 = vrot.lane.b32.xlu0 %v9461_v51, %s6846_s15  ;;  %10379 = vst [vmem:[#allocation10_spill] sm:$0xff] %v9518_v52 }
 0x40e   : > { %v3933_v30 = vor.u32 %v3931_v44, %v3930_v0 }
 0x40f   : > { %v9472_v12 = vpop.permute.xlu0 %4426 }
 0x410   : > { %5454 = vrot.lane.b32.xlu1 %v9350_v60, %s6846_s15 }
 0x411   : > { %4430 = vrot.lane.b32.xlu0 %v9479_v18, %s6846_s15 }
 0x412   : > { %v9474_v20 = vpop.permute.xlu1 %5510 }
 0x413   : > { %v4489_v56 = vpop.permute.xlu0 %4488 }
 0x414   : > { %5470 = vrot.lane.b32.xlu1 %v9461_v51, %s6845_s23  ;;  %v4717_v23 = vsel %vm2018_vm1, %v4681_v5, %v4489_v56  ;;  %v3935_v5 = vshrl.u32 %v9152_v43, 16  ;;  %v9527_v56 = vsel %vm6946_vm2, 0, %v3933_v30 }
 0x415   : > { %5448 = vrot.lane.b32.xlu0 %v9372_v39, %s6846_s15  ;;  %5953 = vmatprep.subr.bf16.mxu0 %v4717_v23  ;;  %10380 = vst [vmem:[#allocation28_spill] sm:$0xff] %v9527_v56  ;;  %v4282_v23 = vrot.slane %v9468_v32, 1  ;;  %v4159_v26 = vshll.u32 %v9527_v56, 16  ;;  %v4157_v14 = vshrl.u32 %v9527_v56, 16 }
 0x416   : > { %v9493_v36 = vpop.permute.xlu1 %5478  ;;  %5954 = vmatpush1.bf16.xpose.msra.mxu0 %v4589_v27  ;;  %v4033_v27 = vsel %vm6946_vm2, %v3930_v0, 0  ;;  %v3937_v44 = vrot.slane %v3935_v5, 7 }
 0x417   : > { %v9505_v41 = vpop.permute.xlu0 %5504  ;;  %v4164_v0 = vshll.u32 %v4033_v27, 16 }
 0x418   : > { %4336 = vrot.lane.b32.xlu1 %v9450_v4, %s6846_s15  ;;  %v3940_v5 = vor.u32 %v3938_v45, %v3937_v44 }
 0x419   : > { %4462 = vrot.lane.b32.xlu0 %v9468_v32, %s6845_s23  ;;  %v4166_v21 = vrot.slane %v4164_v0, 1  ;;  %v4034_v0 = vsel %vm6946_vm2, %v3937_v44, 0 }
 0x41a   : > { %v9507_v54 = vpop.permute.xlu1 %5472  ;;  %v4176_v44 = vshll.u32 %v4034_v0, 16 }
 0x41b   : > { %v9513_v53 = vpop.permute.xlu0 %5492 }
 0x41c   : > { %4368 = vrot.lane.b32.xlu1 %v9479_v18, %s6845_s23  ;;  %v4161_v18 = vrot.slane %v4159_v26, 1  ;;  %v4178_v38 = vrot.slane %v4176_v44, 1 }
 0x41d   : > { %4494 = vrot.lane.b32.xlu0 %v9518_v52, %s6849_s18 }
 0x41e   : > { %v9515_v47 = vpop.permute.xlu1 %5506  ;;  %v4162_v51 = vor.u32 %v4161_v18, %v4157_v14  ;;  %v4286_v18 = vrot.slane %v4033_v27, 1 }
 0x41f   : > { %v9529_v40 = vpop.permute.xlu0 %5460 }
 0x420   : > { %4400 = vrot.lane.b32.xlu1 %v9468_v32, %s6849_s18  ;;  %v9572_v57 = vsel %vm1340_vm8, %v4162_v51, %v4166_v21 }
 0x421   : > { %4478 = vrot.lane.b32.xlu0 %v10362_v19, %s6845_s23  ;;  %v9549_v19 = vsel %vm1564_vm7, %v4282_v23, %v4283_v33  ;;  %v3942_v23 = vshrl.u32 %v9170_v2, 16  ;;  %v9565_v33 = vsel %vm6946_vm2, 0, %v3940_v5  ;;  %10384 = vst [vmem:[#allocation30_spill] sm:$0xff] %v9572_v57  ;;  %v3945_v5 = vshll.u32 %v9170_v2, 16 }
 0x422   : > { %v9531_v25 = vpop.permute.xlu1 %5474  ;;  %10381 = vst [vmem:[#allocation29_spill] sm:$0xff] %v9549_v19  ;;  %10383 = vst [vmem:[#allocation4_spill] sm:$0xff] %v9565_v33  ;;  %v4171_v14 = vshll.u32 %v9565_v33, 16  ;;  %v4169_v51 = vshrl.u32 %v9565_v33, 16 }
 0x423   : > { %v9542_v1 = vpop.permute.xlu0 %5494  ;;  %v3944_v16 = vrot.slane %v3942_v23, 7 }
 0x424   : > { %4338 = vrot.lane.b32.xlu1 %v9518_v52, %s6846_s15  ;;  %v4173_v27 = vrot.slane %v4171_v14, 1  ;;  %v3952_v52 = vshll.u32 %v9174_v22, 16 }
 0x425   : > { %5450 = vrot.lane.b32.xlu0 %v9422_v49, %s6846_s15  ;;  %v3947_v23 = vor.u32 %v3945_v5, %v3944_v16 }
 0x426   : > { %v9544_v30 = vpop.permute.xlu1 %5524  ;;  %v4174_v60 = vor.u32 %v4173_v27, %v4169_v51  ;;  %v4288_v51 = vrot.slane %v9565_v33, 1  ;;  %v4289_v27 = vrot.slane %v4034_v0, 1 }
 0x427   : > { %v9554_v43 = vpop.permute.xlu0 %5462 }
 0x428   : > { %4370 = vrot.lane.b32.xlu1 %v9549_v19, %s6845_s23  ;;  %v9611_v5 = vsel %vm1340_vm8, %v4174_v60, %v4178_v38  ;;  %v9627_v38 = vsel %vm1564_vm7, %v4288_v51, %v4289_v27 }
 0x429   : > { %4510 = vrot.lane.b32.xlu0 %v10382_v7, %s6849_s18  ;;  %v4285_v7 = vrot.slane %v9527_v56, 1  ;;  %10387 = vst [vmem:[#allocation33_spill] sm:$0xff] %v9627_v38 }
 0x42a   : > { %v9556_v29 = vpop.permute.xlu1 %5526 }
 0x42b   : > { %v5489_v26 = vpop.permute.xlu0 %5488  ;;  %v9588_v21 = vsel %vm1564_vm7, %v4285_v7, %v4286_v18  ;;  %v9602_v7 = vsel %vm6946_vm2, 0, %v3947_v23 }
 0x42c   : > { %4402 = vrot.lane.b32.xlu1 %v9527_v56, %s6849_s18  ;;  %10385 = vst [vmem:[#allocation31_spill] sm:$0xff] %v9588_v21  ;;  %v4183_v44 = vshll.u32 %v9602_v7, 16  ;;  %v4181_v60 = vshrl.u32 %v9602_v7, 16 }
 0x42d   : > { %4432 = vrot.lane.b32.xlu0 %v9549_v19, %s6846_s15 }
 0x42e   : > { %v9567_v45 = vpop.permute.xlu1 %4362  ;;  %v4185_v0 = vrot.slane %v4183_v44, 1 }
 0x42f   : > { %v9581_v50 = vpop.permute.xlu0 %5456 }
 0x430   : > { %4340 = vrot.lane.b32.xlu1 %v9572_v57, %s6846_s15  ;;  %v4186_v51 = vor.u32 %v4185_v0, %v4181_v60  ;;  %v6813_v0 = vld [vmem:[%s10236_s9 + $0x4] ss:$12 sps:$4 sm:$0xff]  }
 0x431   : > { %4464 = vrot.lane.b32.xlu0 %v9527_v56, %s6845_s23  ;;  %v3949_v56 = vshrl.u32 %v9174_v22, 16  ;;  %5790 = vmatprep.mubr.bf16.mxu1 %v6813_v0 }
 0x432   : > { %v9583_v19 = vpop.permute.xlu1 %5522 }
 0x433   : > { %v5491_v2 = vpop.permute.xlu0 %5490  ;;  %v3951_v23 = vrot.slane %v3949_v56, 7 }
 0x434   : > { %4372 = vrot.lane.b32.xlu1 %v9588_v21, %s6845_s23 }
 0x435   : > { %4496 = vrot.lane.b32.xlu0 %v9572_v57, %s6849_s18  ;;  %v4035_v57 = vsel %vm6946_vm2, %v3944_v16, 0  ;;  %v3954_v56 = vor.u32 %v3952_v52, %v3951_v23 }
 0x436   : > { %v9593_v32 = vpop.permute.xlu1 %4394  ;;  %v4188_v16 = vshll.u32 %v4035_v57, 16  ;;  %v4292_v60 = vrot.slane %v4035_v57, 1 }
 0x437   : > { %v9604_v18 = vpop.permute.xlu0 %5458  ;;  %v9645_v52 = vsel %vm6946_vm2, 0, %v3954_v56  ;;  %v4036_v56 = vsel %vm6946_vm2, %v3951_v23, 0 }
 0x438   : > { %4404 = vrot.lane.b32.xlu1 %v9565_v33, %s6849_s18  ;;  %v4190_v27 = vrot.slane %v4188_v16, 1  ;;  %v5569_v16 = vsel %vm2018_vm1, %v9294_v8, %v9507_v54  ;;  %v4195_v57 = vshll.u32 %v9645_v52, 16  ;;  %v4193_v23 = vshrl.u32 %v9645_v52, 16 }
 0x439   : > { %4434 = vrot.lane.b32.xlu0 %v9588_v21, %s6846_s15 }
 0x43a   : > { %v9606_v14 = vpop.permute.xlu1 %4332 }
 0x43b   : > { %v9620_v61 = vpop.permute.xlu0 %5444 }
 0x43c   : > { %4342 = vrot.lane.b32.xlu1 %v9611_v5, %s6846_s15 }
 0x43d   : > { %4466 = vrot.lane.b32.xlu0 %v9565_v33, %s6845_s23  ;;  %v3956_v33 = vshrl.u32 %v9213_v15, 16 }
 0x43e   : > { %v9622_v21 = vpop.permute.xlu1 %5516 }
 0x43f   : > { %10386 = vst [vmem:[#allocation32_spill] sm:$0xff] %v9622_v21  ;;  %v9632_v22 = vpop.permute.xlu0 %5446  ;;  %v5610_v21 = vsel %vm1887_vm0, %v9227_v24, %v5489_v26  ;;  %v4291_v26 = vrot.slane %v9602_v7, 1 }
 0x440   : > { %4374 = vrot.lane.b32.xlu1 %v9627_v38, %s6845_s23 }
 0x441   : > { %4498 = vrot.lane.b32.xlu0 %v9611_v5, %s6849_s18 }
 0x442   : > { %v9634_v63 = vpop.permute.xlu1 %5484 }
 0x443   : > { %10388 = vst [vmem:[#allocation34_spill] sm:$0xff] %v9634_v63  ;;  %v5521_v44 = vpop.permute.xlu0 %5520  ;;  %v5633_v63 = vsel %vm809_vm6, %v5610_v21, %v9505_v41  ;;  %v5635_v41 = vsel %vm809_vm6, %v5610_v21, %v9515_v47 }
 0x444   : > { %4406 = vrot.lane.b32.xlu1 %v9602_v7, %s6849_s18  ;;  %v5657_v24 = vsel %vm2018_vm1, %v5633_v63, %v5521_v44  ;;  %v9664_v63 = vsel %vm1340_vm8, %v4186_v51, %v4190_v27  ;;  %v3958_v44 = vrot.slane %v3956_v33, 7  ;;  %v5613_v51 = vsel %vm1887_vm0, %v9162_v46, %v5491_v2 }
 0x445   : > { %5758 = vmatprep.subr.bf16.mxu1 %v5657_v24  ;;  %4436 = vrot.lane.b32.xlu0 %v9627_v38, %s6846_s15  ;;  %v3959_v24 = vshll.u32 %v9213_v15, 16  ;;  %v5660_v38 = vsel %vm2018_vm1, %v5635_v41, %v9583_v19  ;;  %v9683_v15 = vsel %vm1564_vm7, %v4291_v26, %v4292_v60  ;;  %v4197_v27 = vrot.slane %v4195_v57, 1 }
 0x446   : > { %v9649_v34 = vpop.permute.xlu1 %5518  ;;  %5759 = vmatpush1.bf16.xpose.msra.mxu1 %v5569_v16  ;;  %v4200_v16 = vshll.u32 %v4036_v56, 16  ;;  %v3963_v57 = vshrl.u32 %v9266_v11, 16 }
 0x447   : > { %v5441_v8 = vpop.permute.xlu0 %5440  ;;  %5760 = vmatprep.subr.bf16.mxu1 %v5660_v38  ;;  %v3961_v38 = vor.u32 %v3959_v24, %v3958_v44  ;;  %v4198_v60 = vor.u32 %v4197_v27, %v4193_v23  ;;  %v4294_v23 = vrot.slane %v9645_v52, 1  ;;  %v4295_v27 = vrot.slane %v4036_v56, 1 }
 0x448   : > { %4344 = vrot.lane.b32.xlu1 %v9664_v63, %s6846_s15  ;;  %v5537_v33 = vsel %vm1887_vm0, %v9024_v42, %v5441_v8  ;;  %v5636_v42 = vsel %vm809_vm6, %v5613_v51, %v9515_v47  ;;  %v4202_v41 = vrot.slane %v4200_v16, 1  ;;  %v5638_v56 = vsel %vm809_vm6, %v5613_v51, %v9447_v48 }
 0x449   : > { %4468 = vrot.lane.b32.xlu0 %v9602_v7, %s6845_s23  ;;  %v5553_v0 = vsel %vm809_vm6, %v5537_v33, %v9581_v50  ;;  %v4641_v50 = vsel %vm1887_vm0, %v8988_v9, %v9472_v12  ;;  %v5662_v47 = vsel %vm2018_vm1, %v5636_v42, %v9583_v19  ;;  %v9708_v24 = vsel %vm6946_vm2, 0, %v3961_v38 }
 0x44a   : > { %v9674_v21 = vpop.permute.xlu1 %5512  ;;  %v5571_v26 = vsel %vm2018_vm1, %v5553_v0, %v9507_v54  ;;  %v4523_v54 = vsel %vm1887_vm0, %v8737_v55, %v9437_v17  ;;  %v9725_v55 = vsel %vm1340_vm8, %v4198_v60, %v4202_v41  ;;  %v4207_v17 = vshll.u32 %v9708_v24, 16 }
 0x44b   : > { %v4459_v46 = vpop.permute.xlu0 %4458  ;;  %v4555_v19 = vsel %vm809_vm6, %v4523_v54, %v9567_v45  ;;  %v4037_v45 = vsel %vm6946_vm2, %v3958_v44, 0  ;;  %v3965_v38 = vrot.slane %v3963_v57, 7  ;;  %v4205_v44 = vshrl.u32 %v9708_v24, 16 }
 0x44c   : > { %4376 = vrot.lane.b32.xlu1 %v9683_v15, %s6845_s23  ;;  %v4683_v8 = vsel %vm809_vm6, %v4641_v50, %v4459_v46  ;;  %v4592_v16 = vsel %vm2018_vm1, %v4555_v19, %v9593_v32  ;;  %v3966_v46 = vshll.u32 %v9266_v11, 16  ;;  %v5574_v11 = vsel %vm2018_vm1, %v5553_v0, %v9531_v25 }
 0x44d   : > { %4500 = vrot.lane.b32.xlu0 %v9664_v63, %s6849_s18  ;;  %v4209_v60 = vrot.slane %v4207_v17, 1  ;;  %v4212_v41 = vshll.u32 %v4037_v45, 16  ;;  %v5665_v51 = vsel %vm2018_vm1, %v5638_v56, %v9544_v30 }
 0x44e   : > { %v9692_v2 = vpop.permute.xlu1 %5480  ;;  %5761 = vmatpush1.bf16.xpose.msra.mxu1 %v5571_v26  ;;  %v9740_v26 = vsel %vm1564_vm7, %v4294_v23, %v4295_v27  ;;  %v3968_v50 = vor.u32 %v3966_v46, %v3965_v38  ;;  %v4297_v27 = vrot.slane %v9708_v24, 1  ;;  %v4038_v46 = vsel %vm6946_vm2, %v3965_v38, 0 }
 0x44f   : > { %v4491_v9 = vpop.permute.xlu0 %4490  ;;  %5762 = vmatprep.subr.bf16.mxu1 %v5662_v47  ;;  %v4210_v0 = vor.u32 %v4209_v60, %v4205_v44 }
 0x450   : > { %4408 = vrot.lane.b32.xlu1 %v9645_v52, %s6849_s18  ;;  %v4720_v33 = vsel %vm2018_vm1, %v4683_v8, %v4491_v9  ;;  %v4214_v8 = vrot.slane %v4212_v41, 1  ;;  %v5616_v9 = vsel %vm1887_vm0, %v9095_v28, %v9513_v53 }
 0x451   : > { %4438 = vrot.lane.b32.xlu0 %v9683_v15, %s6846_s15  ;;  %5955 = vmatprep.subr.bf16.mxu0 %v4720_v33  ;;  %v5639_v53 = vsel %vm809_vm6, %v5616_v9, %v9447_v48  ;;  %v3970_v48 = vshrl.u32 %v9340_v59, 16 }
 0x452   : > { %v9714_v12 = vpop.permute.xlu1 %5514  ;;  %5956 = vmatpush1.bf16.xpose.msra.mxu0 %v4592_v16  ;;  %v4298_v16 = vrot.slane %v4037_v45, 1  ;;  %v5667_v45 = vsel %vm2018_vm1, %v5639_v53, %v9544_v30  ;;  %v4224_v30 = vshll.u32 %v4038_v46, 16  ;;  %v5619_v53 = vsel %vm1887_vm0, %v9124_v13, %v9542_v1 }
 0x453   : > { %v9733_v32 = vpop.permute.xlu0 %4428  ;;  %v3972_v41 = vrot.slane %v3970_v48, 7  ;;  %v5642_v48 = vsel %vm809_vm6, %v5619_v53, %v9474_v20 }
 0x454   : > { %4346 = vrot.lane.b32.xlu1 %v9725_v55, %s6846_s15 }
 0x455   : > { %4470 = vrot.lane.b32.xlu0 %v9645_v52, %s6845_s23 }
 0x456   : > { %v9737_v42 = vpop.permute.xlu1 %5482  ;;  %5763 = vmatpush1.bf16.xpose.msra.mxu1 %v5574_v11  ;;  %v9797_v11 = vsel %vm1564_vm7, %v4297_v27, %v4298_v16 }
 0x457   : > { %v5443_v57 = vpop.permute.xlu0 %5442  ;;  %5764 = vmatprep.subr.bf16.mxu1 %v5665_v51 }
 0x458   : > { %4378 = vrot.lane.b32.xlu1 %v9740_v26, %s6845_s23  ;;  %v5539_v47 = vsel %vm1887_vm0, %v9054_v10, %v5443_v57  ;;  %v9766_v10 = vsel %vm6946_vm2, 0, %v3968_v50  ;;  %v3973_v50 = vshll.u32 %v9340_v59, 16  ;;  %v5541_v59 = vsel %vm1887_vm0, %v8904_v37, %v9620_v61 }
 0x459   : > { %4502 = vrot.lane.b32.xlu0 %v9725_v55, %s6849_s18  ;;  %v5555_v19 = vsel %vm809_vm6, %v5539_v47, %v9604_v18  ;;  %v9780_v18 = vsel %vm1340_vm8, %v4210_v0, %v4214_v8  ;;  %v4219_v17 = vshll.u32 %v9766_v10, 16  ;;  %v4217_v38 = vshrl.u32 %v9766_v10, 16 }
 0x45a   : > { %v9753_v54 = vpop.permute.xlu1 %5532  ;;  %v5576_v28 = vsel %vm2018_vm1, %v5555_v19, %v9531_v25  ;;  %v5579_v57 = vsel %vm2018_vm1, %v5555_v19, %v9458_v6  ;;  %v5641_v47 = vsel %vm809_vm6, %v5616_v9, %v9474_v20  ;;  %v4226_v8 = vrot.slane %v4224_v30, 1 }
 0x45b   : > { %v9768_v33 = vpop.permute.xlu0 %4460  ;;  %v4221_v44 = vrot.slane %v4219_v17, 1  ;;  %v5670_v27 = vsel %vm2018_vm1, %v5641_v47, %v9556_v29  ;;  %v3975_v19 = vor.u32 %v3973_v50, %v3972_v41  ;;  %v5557_v17 = vsel %vm809_vm6, %v5541_v59, %v9529_v40 }
 0x45c   : > { %4410 = vrot.lane.b32.xlu1 %v9708_v24, %s6849_s18  ;;  %v5672_v40 = vsel %vm2018_vm1, %v5642_v48, %v9556_v29  ;;  %v4039_v20 = vsel %vm6946_vm2, %v3972_v41, 0  ;;  %v5584_v3 = vsel %vm2018_vm1, %v5557_v17, %v9493_v36 }
 0x45d   : > { %4440 = vrot.lane.b32.xlu0 %v9740_v26, %s6846_s15  ;;  %v4222_v0 = vor.u32 %v4221_v44, %v4217_v38  ;;  %v4023_v13 = vsel %vm6946_vm2, 0, %v3975_v19  ;;  %v4300_v38 = vrot.slane %v9766_v10, 1  ;;  %v4301_v44 = vrot.slane %v4038_v46, 1 }
 0x45e   : > { %v9770_v23 = vpop.permute.xlu1 %5534  ;;  %5765 = vmatpush1.bf16.xpose.msra.mxu1 %v5576_v28  ;;  %v4304_v47 = vshrl.u32 %v4023_v13, 16  ;;  %v5644_v46 = vsel %vm809_vm6, %v5619_v53, %v9674_v21 }
 0x45f   : > { %v9789_v56 = vpop.permute.xlu0 %5500  ;;  %5766 = vmatprep.subr.bf16.mxu1 %v5667_v45  ;;  %v9823_v9 = vsel %vm1340_vm8, %v4222_v0, %v4226_v8  ;;  %v5581_v45 = vsel %vm2018_vm1, %v5557_v17, %v9458_v6  ;;  %v4306_v6 = vshll.u32 %v4023_v13, 16  ;;  %v9859_v29 = vsel %vm1564_vm7, %v4300_v38, %v4301_v44 }
 0x460   : > { %4348 = vrot.lane.b32.xlu1 %v9780_v18, %s6846_s15  ;;  %v4311_v8 = vshll.u32 %v4039_v20, 16  ;;  %v4317_v38 = vrot.slane %v4023_v13, 1 }
 0x461   : > { %4472 = vrot.lane.b32.xlu0 %v9708_v24, %s6845_s23  ;;  %v4308_v0 = vrot.slane %v4306_v6, 1 }
 0x462   : > { %v9792_v25 = vpop.permute.xlu1 %5528 }
 0x463   : > { %v9802_v60 = vpop.permute.xlu0 %5468  ;;  %v5675_v41 = vsel %vm2018_vm1, %v5644_v46, %v9792_v25  ;;  %v4309_v53 = vor.u32 %v4308_v0, %v4304_v47 }
 0x464   : > { %4380 = vrot.lane.b32.xlu1 %v9797_v11, %s6845_s23 }
 0x465   : > { %4504 = vrot.lane.b32.xlu0 %v9780_v18, %s6849_s18 }
 0x466   : > { %v9805_v51 = vpop.permute.xlu1 %4364  ;;  %5767 = vmatpush1.bf16.xpose.msra.mxu1 %v5579_v57 }
 0x467   : > { %v5497_v16 = vpop.permute.xlu0 %5496  ;;  %5768 = vmatprep.subr.bf16.mxu1 %v5670_v27  ;;  %v5543_v27 = vsel %vm1887_vm0, %v8962_v35, %v9632_v22  ;;  %v4525_v35 = vsel %vm1887_vm0, %v8871_v58, %v9606_v14 }
 0x468   : > { %4412 = vrot.lane.b32.xlu1 %v9766_v10, %s6849_s18  ;;  %v5622_v19 = vsel %vm1887_vm0, %v9372_v39, %v5497_v16  ;;  %v5559_v17 = vsel %vm809_vm6, %v5543_v27, %v9554_v43  ;;  %v4557_v44 = vsel %vm809_vm6, %v4525_v35, %v9805_v51  ;;  %v6819_v51 = vld [vmem:[%s10235_s8 + $0x4] ss:$12 sps:$4 sm:$0xff]  }
 0x469   : > { %4442 = vrot.lane.b32.xlu0 %v9797_v11, %s6846_s15  ;;  %v5645_v16 = vsel %vm809_vm6, %v5622_v19, %v9674_v21  ;;  %v5586_v14 = vsel %vm2018_vm1, %v5559_v17, %v9493_v36  ;;  %5977 = vmatprep.mubr.bf16.mxu0 %v6819_v51  ;;  %v5647_v47 = vsel %vm809_vm6, %v5622_v19, %v9714_v12 }
 0x46a   : > { %v4397_v28 = vpop.permute.xlu1 %4396  ;;  %v5677_v21 = vsel %vm2018_vm1, %v5645_v16, %v9792_v25  ;;  %v5589_v25 = vsel %vm2018_vm1, %v5559_v17, %v9692_v2 }
 0x46b   : > { %v9832_v37 = vpop.permute.xlu0 %5464  ;;  %v4595_v58 = vsel %vm2018_vm1, %v4557_v44, %v4397_v28 }
 0x46c   : > { %4350 = vrot.lane.b32.xlu1 %v9823_v9, %s6846_s15 }
 0x46d   : > { %4474 = vrot.lane.b32.xlu0 %v9766_v10, %s6845_s23 }
 0x46e   : > { %v9834_v61 = vpop.permute.xlu1 %5486  ;;  %5769 = vmatpush1.bf16.xpose.msra.mxu1 %v5581_v45  ;;  %v4313_v45 = vrot.slane %v4311_v8, 1 }
 0x46f   : > { %v9847_v1 = vpop.permute.xlu0 %5498  ;;  %5770 = vmatprep.subr.bf16.mxu1 %v5672_v40  ;;  %v4644_v40 = vsel %vm1887_vm0, %v9279_v31, %v9733_v32  ;;  %v4318_v32 = vrot.slane %v4039_v20, 1 }
 0x470   : > { %4414 = vrot.lane.b32.xlu1 %v4023_v13, %s6849_s18  ;;  %v4685_v22 = vsel %vm809_vm6, %v4644_v40, %v9768_v33  ;;  %v9894_v43 = vsel %vm1340_vm8, %v4309_v53, %v4313_v45 }
 0x471   : > { %4506 = vrot.lane.b32.xlu0 %v9823_v9, %s6849_s18  ;;  %v9910_v28 = vsel %vm1564_vm7, %v4317_v38, %v4318_v32 }
 0x472   : > { %v9850_v30 = vpop.permute.xlu1 %5530 }
 0x473   : > { %v9856_v50 = vpop.permute.xlu0 %5466  ;;  %v5680_v0 = vsel %vm2018_vm1, %v5647_v47, %v9850_v30 }
 0x475   : > { %4444 = vrot.lane.b32.xlu0 %v9859_v29, %s6846_s15 }
 0x476   : > { %v9861_v57 = vpop.permute.xlu1 %4334  ;;  %5771 = vmatpush1.bf16.xpose.msra.mxu1 %v5584_v3 }
 0x477   : > { %v9874_v59 = vpop.permute.xlu0 %5452  ;;  %5772 = vmatprep.subr.bf16.mxu1 %v5675_v41  ;;  %v5625_v41 = vsel %vm1887_vm0, %v9422_v49, %v9847_v1  ;;  %v10389_v49 = vld [vmem:[#allocation20_spill] sm:$0xff] }
 0x478   : > { %v5648_v17 = vsel %vm809_vm6, %v5625_v41, %v9714_v12  ;;  %v4527_v1 = vsel %vm1887_vm0, %v10389_v49, %v9861_v57 }
 0x479   : > { %4476 = vrot.lane.b32.xlu0 %v4023_v13, %s6845_s23 }
 0x47a   : > { %v4367_v48 = vpop.permute.xlu1 %4366 }
 0x47b   : > { %v4493_v39 = vpop.permute.xlu0 %4492 }
 0x47c   : > { %v4723_v31 = vsel %vm2018_vm1, %v4685_v22, %v4493_v39 }
 0x47d   : > { %4508 = vrot.lane.b32.xlu0 %v9894_v43, %s6849_s18  ;;  %5957 = vmatprep.subr.bf16.mxu0 %v4723_v31  ;;  %v10391_v31 = vld [vmem:[#allocation22_spill] sm:$0xff]  ;;  %s6521_s18 = sshll.u32 %s10424_s30, 6 }
 0x47e   : > { %v4399_v6 = vpop.permute.xlu1 %4398  ;;  %5773 = vmatpush1.bf16.xpose.msra.mxu1 %v5586_v14  ;;  %5958 = vmatpush1.bf16.xpose.msra.mxu0 %v4595_v58  ;;  %v5628_v32 = vsel %vm1887_vm0, %v10391_v31, %v9789_v56  ;;  %v10398_v31 = vld [vmem:[#allocation30_spill] sm:$0xff]  ;;  %s10206_s16 = scalar_lea.vmem %s10240_s13, %s6521_s18 }
 0x47f   : > { %v9904_v33 = vpop.permute.xlu0 %5502  ;;  %5774 = vmatprep.subr.bf16.mxu1 %v5677_v21 }
 0x481   : > { %4446 = vrot.lane.b32.xlu0 %v9910_v28, %s6846_s15 }
 0x482   : > { %v9912_v13 = vpop.permute.xlu1 %5454 }
 0x483   : > { %v4431_v36 = vpop.permute.xlu0 %4430 }
 0x484   : > { %v4647_v40 = vsel %vm1887_vm0, %v9450_v4, %v4431_v36 }
 0x485   : > { %4382 = vrot.lane.b32.xlu0 %v9859_v29, %s6845_s23 }
 0x486   : > { %v9916_v20 = vpop.permute.xlu1 %5470  ;;  %5775 = vmatpush1.bf16.xpose.msra.mxu1 %v5589_v25 }
 0x487   : > { %v5449_v8 = vpop.permute.xlu0 %5448  ;;  %5776 = vmatprep.subr.bf16.mxu1 %v5680_v0 }
 0x488   : > { %v5545_v46 = vsel %vm1887_vm0, %v9248_v62, %v5449_v8  ;;  %v5682_v62 = vsel %vm2018_vm1, %v5648_v17, %v9850_v30  ;;  %v10390_v30 = vld [vmem:[#allocation32_spill] sm:$0xff] }
 0x489   : > { %v5561_v27 = vsel %vm809_vm6, %v5545_v46, %v9832_v37  ;;  %v5650_v16 = vsel %vm809_vm6, %v5625_v41, %v10390_v30  ;;  %v5651_v36 = vsel %vm809_vm6, %v5628_v32, %v10390_v30 }
 0x48a   : > { %v4337_v3 = vpop.permute.xlu1 %4336  ;;  %v5591_v19 = vsel %vm2018_vm1, %v5561_v27, %v9692_v2  ;;  %v4559_v2 = vsel %vm809_vm6, %v4527_v1, %v4367_v48  ;;  %v5594_v57 = vsel %vm2018_vm1, %v5561_v27, %v9737_v42  ;;  %v5685_v48 = vsel %vm2018_vm1, %v5650_v16, %v9753_v54  ;;  %v10393_v27 = vld [vmem:[#allocation34_spill] sm:$0xff] }
 0x48b   : > { %v4463_v53 = vpop.permute.xlu0 %4462  ;;  %v4598_v39 = vsel %vm2018_vm1, %v4559_v2, %v4399_v6  ;;  %v10392_v6 = vld [vmem:[#allocation2_spill] sm:$0xff]  ;;  %v5687_v56 = vsel %vm2018_vm1, %v5651_v36, %v9753_v54  ;;  %v10395_v54 = vld [vmem:[#allocation19_spill] sm:$0xff] }
 0x48c   : > { %v4687_v37 = vsel %vm809_vm6, %v4647_v40, %v4463_v53  ;;  %v5549_v40 = vsel %vm1887_vm0, %v10395_v54, %v9874_v59 }
 0x48d   : > { %v5565_v59 = vsel %vm809_vm6, %v5549_v40, %v9802_v60  ;;  %v10399_v60 = vld [vmem:[#allocation26_spill] sm:$0xff] }
 0x48e   : > { %v4369_v45 = vpop.permute.xlu1 %4368  ;;  %5777 = vmatpush1.bf16.xpose.msra.mxu1 %v5591_v19  ;;  %v10394_v19 = vld [vmem:[#allocation10_spill] sm:$0xff] }
 0x48f   : > { %v4495_v35 = vpop.permute.xlu0 %4494  ;;  %5778 = vmatprep.subr.bf16.mxu1 %v5682_v62  ;;  %v10396_v62 = vld [vmem:[#allocation23_spill] sm:$0xff] }
 0x490   : > { %v4726_v22 = vsel %vm2018_vm1, %v4687_v37, %v4495_v35  ;;  %v4529_v49 = vsel %vm1887_vm0, %v10396_v62, %v4337_v3  ;;  %v10397_v35 = vld [vmem:[#allocation24_spill] sm:$0xff] }
 0x491   : > { %5959 = vmatprep.subr.bf16.mxu0 %v4726_v22  ;;  %v5631_v2 = vsel %vm1887_vm0, %v10397_v35, %v9904_v33  ;;  %v4561_v22 = vsel %vm809_vm6, %v4529_v49, %v4369_v45  ;;  %v5601_v33 = vsel %vm2018_vm1, %v5565_v59, %v10393_v27  ;;  %v10402_v49 = vld [vmem:[#allocation25_spill] sm:$0xff] }
 0x492   : > { %v4401_v12 = vpop.permute.xlu1 %4400  ;;  %5960 = vmatpush1.bf16.xpose.msra.mxu0 %v4598_v39  ;;  %v10403_v35 = vld [vmem:[#allocation17_spill] sm:$0xff] }
 0x493   : > { %v9948_v4 = vpop.permute.xlu0 %4478  ;;  %v4601_v16 = vsel %vm2018_vm1, %v4561_v22, %v4401_v12  ;;  %v6051_v22 = vld [vmem:[%s10237_s10] sm:$0xff] }
 0x494   : > { %6057 = vperm.xlu0 %6750, %v6051_v22  }
 0x496   : > { %v4339_v38 = vpop.permute.xlu1 %4338  ;;  %5779 = vmatpush1.bf16.xpose.msra.mxu1 %v5594_v57  ;;  %v5654_v57 = vsel %vm809_vm6, %v5631_v2, %v9649_v34 }
 0x497   : > { %v5451_v44 = vpop.permute.xlu0 %5450  ;;  %5780 = vmatprep.subr.bf16.mxu1 %v5685_v48  ;;  %v5692_v45 = vsel %vm2018_vm1, %v5654_v57, %v9770_v23  ;;  %v6054_v57 = vld [vmem:[%s10237_s10 + $0x18] sm:$0xff] }
 0x498   : > { %v5547_v58 = vsel %vm1887_vm0, %v10392_v6, %v5451_v44  ;;  %v4531_v6 = vsel %vm1887_vm0, %v10399_v60, %v4339_v38  ;;  %v10063_v60 = vld [vmem:[%s10236_s9 + $0x8] ss:$12 sps:$4 sm:$0xff]   ;;  %6072 = vperm.xlu0 %6750, %v6054_v57  }
 0x499   : > { %v5563_v21 = vsel %vm809_vm6, %v5547_v58, %v9856_v50  ;;  %v5653_v50 = vsel %vm809_vm6, %v5628_v32, %v9649_v34 }
 0x49a   : > { %v4371_v14 = vpop.permute.xlu1 %4370  ;;  %v5596_v47 = vsel %vm2018_vm1, %v5563_v21, %v9737_v42  ;;  %v5599_v53 = vsel %vm2018_vm1, %v5563_v21, %v10393_v27  ;;  %v5690_v42 = vsel %vm2018_vm1, %v5653_v50, %v9770_v23 }
 0x49b   : > { %v9963_v51 = vpop.permute.xlu0 %4510  ;;  %v4563_v21 = vsel %vm809_vm6, %v4531_v6, %v4371_v14  ;;  %v10400_v14 = vld [vmem:[#allocation21_spill] sm:$0xff] }
 0x49c   : > { %v5551_v50 = vsel %vm1887_vm0, %v10400_v14, %v9912_v13  ;;  %v10407_v14 = vld [vmem:[#allocation8_spill] sm:$0xff] }
 0x49d   : > { %v5567_v27 = vsel %vm809_vm6, %v5551_v50, %v9916_v20 }
 0x49e   : > { %v4403_v25 = vpop.permute.xlu1 %4402  ;;  %5781 = vmatpush1.bf16.xpose.msra.mxu1 %v5596_v47  ;;  %v5655_v47 = vsel %vm809_vm6, %v5631_v2, %v9948_v4  ;;  %v6052_v2 = vld [vmem:[%s10237_s10 + $0x8] sm:$0xff] }
 0x49f   : > { %v4433_v0 = vpop.permute.xlu0 %4432  ;;  %5782 = vmatprep.subr.bf16.mxu1 %v5687_v56  ;;  %v4604_v23 = vsel %vm2018_vm1, %v4563_v21, %v4403_v25  ;;  %v5604_v56 = vsel %vm2018_vm1, %v5565_v59, %v9834_v61  ;;  %v5694_v38 = vsel %vm2018_vm1, %v5655_v47, %v9963_v51  ;;  %6062 = vperm.xlu1 %6751, %v6052_v2   ;;  %v6053_v59 = vld [vmem:[%s10237_s10 + $0x10] sm:$0xff]  ;;  %v6104_v21 = vld [vmem:[%s10239_s12] sm:$0x7] }
 0x4a0   : > { %v4650_v17 = vsel %vm1887_vm0, %v10394_v19, %v4433_v0  ;;  %v5606_v19 = vsel %vm2018_vm1, %v5567_v27, %v9834_v61 }
 0x4a2   : > { %v4341_v8 = vpop.permute.xlu1 %4340 }
 0x4a3   : > { %v4465_v46 = vpop.permute.xlu0 %4464  ;;  %6067 = vperm.xlu1 %6751, %v6053_v59  }
 0x4a4   : > { %v4689_v1 = vsel %vm809_vm6, %v4650_v17, %v4465_v46 }
 0x4a6   : > { %v4373_v41 = vpop.permute.xlu1 %4372  ;;  %5783 = vmatpush1.bf16.xpose.msra.mxu1 %v5599_v53 }
 0x4a7   : > { %v4497_v37 = vpop.permute.xlu0 %4496  ;;  %5784 = vmatprep.subr.bf16.mxu1 %v5690_v42  ;;  %v10401_v42 = vld [vmem:[#allocation28_spill] sm:$0xff]  ;;  %6107 = vperm.xlu1 %6751, %v6104_v21   ;;  %v10414_v21 = vld [vmem:[#allocation33_spill] sm:$0xff] }
 0x4a8   : > { %v4729_v39 = vsel %vm2018_vm1, %v4689_v1, %v4497_v37  ;;  %v4533_v54 = vsel %vm1887_vm0, %v10401_v42, %v4341_v8  ;;  %v6814_v8 = vld [vmem:[%s10236_s9 + $0x1c] ss:$12 sps:$4 sm:$0xff]  }
 0x4a9   : > { %5961 = vmatprep.subr.bf16.mxu0 %v4729_v39  ;;  %v4565_v13 = vsel %vm809_vm6, %v4533_v54, %v4373_v41  ;;  %v5733_v41 = vsel %vm1887_vm0, %v10403_v35, 0 }
 0x4aa   : > { %v4405_v30 = vpop.permute.xlu1 %4404  ;;  %5962 = vmatpush1.bf16.xpose.msra.mxu0 %v4601_v16 }
 0x4ab   : > { %v4435_v3 = vpop.permute.xlu0 %4434  ;;  %v4607_v1 = vsel %vm2018_vm1, %v4565_v13, %v4405_v30  ;;  %v10404_v30 = vld [vmem:[#allocation6_spill] sm:$0xff] }
 0x4ac   : > { %v4653_v32 = vsel %vm1887_vm0, %v10398_v31, %v4435_v3  ;;  %v6816_v3 = vld [vmem:[%s10236_s9 + $0x18] ss:$12 sps:$4 sm:$0xff]  }
 0x4ae   : > { %v4343_v48 = vpop.permute.xlu1 %4342  ;;  %5785 = vmatpush1.bf16.xpose.msra.mxu1 %v5601_v33 }
 0x4af   : > { %v4467_v44 = vpop.permute.xlu0 %4466  ;;  %5786 = vmatprep.subr.bf16.mxu1 %v5692_v45  ;;  %v10405_v45 = vld [vmem:[#allocation4_spill] sm:$0xff] }
 0x4b0   : > { %v4691_v58 = vsel %vm809_vm6, %v4653_v32, %v4467_v44  ;;  %v4535_v44 = vsel %vm1887_vm0, %v10405_v45, %v4343_v48 }
 0x4b2   : > { %v4375_v12 = vpop.permute.xlu1 %4374 }
 0x4b3   : > { %v4499_v34 = vpop.permute.xlu0 %4498  ;;  %v4567_v6 = vsel %vm809_vm6, %v4535_v44, %v4375_v12 }
 0x4b4   : > { %v4732_v36 = vsel %vm2018_vm1, %v4691_v58, %v4499_v34 }
 0x4b5   : > { %5963 = vmatprep.subr.bf16.mxu0 %v4732_v36 }
 0x4b6   : > { %5787 = vmatpush1.bf16.xpose.msra.mxu1 %v5604_v56  ;;  %5964 = vmatpush1.bf16.xpose.msra.mxu0 %v4604_v23  ;;  %v4407_v0 = vpop.permute.xlu1 %4406 }
 0x4b7   : > { %v4437_v46 = vpop.permute.xlu0 %4436  ;;  %5788 = vmatprep.subr.bf16.mxu1 %v5694_v38  ;;  %v4610_v34 = vsel %vm2018_vm1, %v4567_v6, %v4407_v0 }
 0x4b8   : > { %v4656_v17 = vsel %vm1887_vm0, %v9611_v5, %v4437_v46  ;;  %v6811_v5 = vld [vmem:[%s10236_s9] ss:$12 sps:$4 sm:$0xff]  }
 0x4ba   : > { %v4345_v53 = vpop.permute.xlu1 %4344 }
 0x4bb   : > { %v4469_v25 = vpop.permute.xlu0 %4468  ;;  %v4537_v38 = vsel %vm1887_vm0, %v9602_v7, %v4345_v53 }
 0x4bc   : > { %v4693_v40 = vsel %vm809_vm6, %v4656_v17, %v4469_v25  ;;  %v10408_v17 = vld [vmem:[#allocation15_spill] sm:$0xff] }
 0x4bd   : > { %v5739_v42 = vsel %vm1887_vm0, %v10408_v17, 0 }
 0x4be   : > { %5789 = vmatpush1.bf16.xpose.msra.mxu1 %v5606_v19  ;;  %v4377_v61 = vpop.permute.xlu1 %4376 }
 0x4bf   : > { %v4501_v62 = vpop.permute.xlu0 %4500  ;;  %6709 = vmatprep.subr.msk.bf16.mxu1 %vm1887_vm0, %v10402_v49  ;;  %v4569_v50 = vsel %vm809_vm6, %v4537_v38, %v4377_v61 }
 0x4c0   : > { %v4735_v20 = vsel %vm2018_vm1, %v4693_v40, %v4501_v62 }
 0x4c1   : > { %5965 = vmatprep.subr.bf16.mxu0 %v4735_v20 }
 0x4c2   : > { %5966 = vmatpush1.bf16.xpose.msra.mxu0 %v4607_v1  ;;  %v4409_v16 = vpop.permute.xlu1 %4408 }
 0x4c3   : > { %v4439_v37 = vpop.permute.xlu0 %4438  ;;  %v4613_v25 = vsel %vm2018_vm1, %v4569_v50, %v4409_v16 }
 0x4c4   : > { %v4659_v33 = vsel %vm1887_vm0, %v9664_v63, %v4439_v37  ;;  %v10406_v63 = vld [vmem:[#allocation18_spill] sm:$0xff]  ;;  %v10409_v37 = vld [vmem:[#allocation7_spill] sm:$0xff] }
 0x4c5   : > { %5791 = vmatmul.mubr.bf16.vlgmr.msra.gmra.mrb[64].mxu1 %v6811_v5  ;;  %v5736_v48 = vsel %vm1887_vm0, %v10406_v63, 0  ;;  %v10413_v63 = vld [vmem:[#allocation9_spill] sm:$0xff] }
 0x4c6   : > { %6618 = vmatpush3.bf16.xpose.msra.mxu1 %v5733_v41  ;;  %5800 = vmatprep.mubr.bf16.mxu1 %v6814_v8  ;;  %v4347_v36 = vpop.permute.xlu1 %4346 }
 0x4c7   : > { %v4471_v39 = vpop.permute.xlu0 %4470  ;;  %6710 = vmatprep.subr.msk.bf16.mxu1 %vm1887_vm0, %v10404_v30  ;;  %v4539_v40 = vsel %vm1887_vm0, %v9645_v52, %v4347_v36  ;;  %v10410_v52 = vld [vmem:[#allocation16_spill] sm:$0xff]  ;;  %v6824_v36 = vld [vmem:[%s10235_s8 + $0x18] ss:$12 sps:$4 sm:$0xff]  }
 0x4c8   : > { %v4695_v31 = vsel %vm809_vm6, %v4659_v33, %v4471_v39  ;;  %v5742_v41 = vsel %vm1887_vm0, %v10410_v52, 0 }
 0x4ca   : > { %v4379_v23 = vpop.permute.xlu1 %4378 }
 0x4cb   : > { %v4503_v32 = vpop.permute.xlu0 %4502  ;;  %v4571_v20 = vsel %vm809_vm6, %v4539_v40, %v4379_v23 }
 0x4cc   : > { %v4738_v58 = vsel %vm2018_vm1, %v4695_v31, %v4503_v32  ;;  %v10411_v32 = vld [vmem:[#allocation3_spill] sm:$0xff] }
 0x4cd   : > { %5967 = vmatprep.subr.bf16.mxu0 %v4738_v58  ;;  %5801 = vmatmul.mubr.bf16.gmra.mrb[68].mxu1 %v6816_v3 }
 0x4ce   : > { %6620 = vmatpush3.bf16.xpose.msra.mxu1 %v5736_v48  ;;  %5968 = vmatpush1.bf16.xpose.msra.mxu0 %v4610_v34  ;;  %v4411_v19 = vpop.permute.xlu1 %4410  ;;  %v10412_v34 = vld [vmem:[#allocation31_spill] sm:$0xff] }
 0x4cf   : > { %v4441_v47 = vpop.permute.xlu0 %4440  ;;  %6711 = vmatprep.subr.msk.bf16.mxu1 %vm1887_vm0, %v10404_v30  ;;  %6633 = vmatprep.mubr.msk.bf16.mxu1 %vm1887_vm0, %v10063_v60  ;;  %v4616_v5 = vsel %vm2018_vm1, %v4571_v20, %v4411_v19  ;;  %v10422_v19 = vmov 0  }
 0x4d0   : > { %v4662_v56 = vsel %vm1887_vm0, %v9725_v55, %v4441_v47  ;;  %v6825_v47 = vld [vmem:[%s10235_s8 + $0x8] ss:$12 sps:$4 sm:$0xff]  }
 0x4d2   : > { %v4349_v53 = vpop.permute.xlu1 %4348 }
 0x4d3   : > { %v4473_v12 = vpop.permute.xlu0 %4472  ;;  %v4541_v22 = vsel %vm1887_vm0, %v9708_v24, %v4349_v53 }
 0x4d4   : > { %v4697_v0 = vsel %vm809_vm6, %v4662_v56, %v4473_v12  ;;  %v10415_v12 = vld [vmem:[#allocation11_spill] sm:$0xff]  ;;  %v10416_v56 = vld [vmem:[#allocation12_spill] sm:$0xff] }
 0x4d5   : > { %v5904_v23 = vsel %vm1887_vm0, %v10415_v12, 0  ;;  %v5907_v38 = vsel %vm1887_vm0, %v10416_v56, 0 }
 0x4d6   : > { %6622 = vmatpush3.bf16.xpose.msra.mxu1 %v5736_v48  ;;  %v4381_v61 = vpop.permute.xlu1 %4380  ;;  %v5901_v48 = vsel %vm1887_vm0, %v10413_v63, 0 }
 0x4d7   : > { %v4505_v46 = vpop.permute.xlu0 %4504  ;;  %6712 = vmatprep.subr.msk.bf16.mxu1 %vm1887_vm0, %v10407_v14  ;;  %v4573_v16 = vsel %vm809_vm6, %v4541_v22, %v4381_v61 }
 0x4d8   : > { %v4741_v27 = vsel %vm2018_vm1, %v4697_v0, %v4505_v46  ;;  %v10417_v0 = vld [vmem:[#allocation13_spill] sm:$0xff] }
 0x4d9   : > { %5969 = vmatprep.subr.bf16.mxu0 %v4741_v27  ;;  %v5910_v46 = vsel %vm1887_vm0, %v10417_v0, 0 }
 0x4da   : > { %5970 = vmatpush1.bf16.xpose.msra.mxu0 %v4613_v25  ;;  %v4413_v35 = vpop.permute.xlu1 %4412 }
 0x4db   : > { %v4443_v55 = vpop.permute.xlu0 %4442  ;;  %v4619_v3 = vsel %vm2018_vm1, %v4573_v16, %v4413_v35 }
 0x4dc   : > { %v4665_v54 = vsel %vm1887_vm0, %v9780_v18, %v4443_v55 }
 0x4de   : > { %6624 = vmatpush3.bf16.xpose.msra.mxu1 %v5739_v42  ;;  %v4351_v57 = vpop.permute.xlu1 %4350 }
 0x4df   : > { %v4475_v7 = vpop.permute.xlu0 %4474  ;;  %6713 = vmatprep.subr.msk.bf16.mxu1 %vm1887_vm0, %v10407_v14  ;;  %v4543_v44 = vsel %vm1887_vm0, %v9766_v10, %v4351_v57  ;;  %v6817_v10 = vld [vmem:[%s10235_s8] ss:$12 sps:$4 sm:$0xff]  }
 0x4e0   : > { %v4699_v62 = vsel %vm809_vm6, %v4665_v54, %v4475_v7 }
 0x4e2   : > { %v4415_v6 = vpop.permute.xlu1 %4414 }
 0x4e3   : > { %v4507_v13 = vpop.permute.xlu0 %4506 }
 0x4e4   : > { %v4744_v1 = vsel %vm2018_vm1, %v4699_v62, %v4507_v13 }
 0x4e5   : > { %5971 = vmatprep.subr.bf16.mxu0 %v4744_v1 }
 0x4e6   : > { %6626 = vmatpush3.bf16.xpose.msra.mxu1 %v5739_v42  ;;  %5972 = vmatpush1.bf16.xpose.msra.mxu0 %v4616_v5 }
 0x4e7   : > { %v4445_v8 = vpop.permute.xlu0 %4444  ;;  %6714 = vmatprep.subr.msk.bf16.mxu1 %vm1887_vm0, %v10409_v37 }
 0x4e8   : > { %v4668_v2 = vsel %vm1887_vm0, %v9823_v9, %v4445_v8 }
 0x4eb   : > { %v4477_v18 = vpop.permute.xlu0 %4476 }
 0x4ec   : > { %v4701_v39 = vsel %vm809_vm6, %v4668_v2, %v4477_v18 }
 0x4ee   : > { %6628 = vmatpush3.bf16.xpose.msra.mxu1 %v5742_v41 }
 0x4ef   : > { %v4509_v30 = vpop.permute.xlu0 %4508  ;;  %6715 = vmatprep.subr.msk.bf16.mxu1 %vm1887_vm0, %v10409_v37 }
 0x4f0   : > { %v4747_v59 = vsel %vm2018_vm1, %v4701_v39, %v4509_v30 }
 0x4f1   : > { %5973 = vmatprep.subr.bf16.mxu0 %v4747_v59 }
 0x4f2   : > { %5974 = vmatpush1.bf16.xpose.msra.mxu0 %v4619_v3 }
 0x4f3   : > { %v4447_v9 = vpop.permute.xlu0 %4446 }
 0x4f4   : > { %v4671_v33 = vsel %vm1887_vm0, %v9894_v43, %v4447_v9 }
 0x4f5   : > { %v4703_v24 = vsel %vm809_vm6, %v4671_v33, %v9948_v4  ;;  %v5745_v4 = vsel %vm1887_vm0, %v10402_v49, 0  ;;  %v6821_v49 = vld [vmem:[%s10236_s9 + $0x20] ss:$12 sps:$4 sm:$0xff]  }
 0x4f6   : > { %6630 = vmatpush3.bf16.xpose.msra.mxu1 %v5742_v41  ;;  %v4750_v45 = vsel %vm2018_vm1, %v4703_v24, %v9963_v51  ;;  %v6822_v51 = vld [vmem:[%s10235_s8 + $0x1c] ss:$12 sps:$4 sm:$0xff]  }
 0x4f7   : > { %v4383_v31 = vpop.permute.xlu0 %4382  ;;  %5975 = vmatprep.subr.bf16.mxu0 %v4750_v45  ;;  %6716 = vmatprep.subr.msk.bf16.mxu1 %vm1887_vm0, %v10411_v32 }
 0x4f8   : > { %v4575_v58 = vsel %vm809_vm6, %v4543_v44, %v4383_v31 }
 0x4f9   : > { %v4622_v43 = vsel %vm2018_vm1, %v4575_v58, %v4415_v6 }
 0x4fa   : > { %5976 = vmatpush1.bf16.xpose.msra.mxu0 %v4622_v43 }
 0x4fb   : > { %6717 = vmatprep.subr.msk.bf16.mxu0 %vm1887_vm0, %v10412_v34 }
 0x4fe   : > { %6632 = vmatpush3.bf16.xpose.msra.mxu1 %v5745_v4 }
 0x4ff   : > { %6718 = vmatprep.subr.msk.bf16.mxu1 %vm1887_vm0, %v10412_v34 }
 0x501   : > { %5978 = vmatmul.mubr.bf16.vlgmr.msra.gmra.mrb[40].mxu0 %v6817_v10 }
 0x502   : > { %6638 = vmatpush3.bf16.xpose.msra.mxu0 %v5901_v48  ;;  %5987 = vmatprep.mubr.bf16.mxu0 %v6822_v51 }
 0x503   : > { %6719 = vmatprep.subr.msk.bf16.mxu0 %vm1887_vm0, %v10414_v21 }
 0x505   : > { %6634 = vmatmul.mubr.msk.bf16.vlgmr.msra.gmra.mrb[64].mxu1 %vm1887_vm0, %v10063_v60  ;;  %v6826_v60 = vld [vmem:[%s10235_s8 + $0x20] ss:$12 sps:$4 sm:$0xff]  }
 0x506   : > { %6677 = vmatpush3.bf16.xpose.msra.mxu1 %v5901_v48  ;;  %6635 = vmatprep.mubr.msk.bf16.mxu1 %vm1887_vm0, %v6821_v49 }
 0x507   : > { %6720 = vmatprep.subr.msk.bf16.mxu1 %vm1887_vm0, %v10414_v21 }
 0x509   : > { %5988 = vmatmul.mubr.bf16.gmra.mrb[44].mxu0 %v6824_v36 }
 0x50a   : > { %6640 = vmatpush3.bf16.xpose.msra.mxu0 %v5904_v23  ;;  %6653 = vmatprep.mubr.msk.bf16.mxu0 %vm1887_vm0, %v6825_v47 }
 0x50b   : > { %6721 = vmatprep.subr.msk.bf16.mxu0 %vm1887_vm0, %v9683_v15 }
 0x50d   : > { %6636 = vmatmul.mubr.msk.bf16.gmra.mrb[68].mxu1 %vm1887_vm0, %v6821_v49 }
 0x50e   : > { %6678 = vmatpush3.bf16.xpose.msra.mxu1 %v5904_v23  ;;  %6655 = vmatprep.mubr.msk.bf16.mxu1 %vm1887_vm0, %v6826_v60 }
 0x50f   : > { %6722 = vmatprep.subr.msk.bf16.mxu1 %vm1887_vm0, %v9683_v15  ;;  %v10418_v15 = vld [vmem:[#allocation14_spill] sm:$0xff] }
 0x510   : > { %v5913_v14 = vsel %vm1887_vm0, %v10418_v15, 0 }
 0x512   : > { %6642 = vmatpush3.bf16.xpose.msra.mxu0 %v5907_v38 }
 0x513   : > { %6723 = vmatprep.subr.msk.bf16.mxu0 %vm1887_vm0, %v9740_v26  ;;  %v6058_v52 = vpop.permute.xlu0 %6057 }
 0x516   : > { %6679 = vmatpush3.bf16.xpose.msra.mxu1 %v5907_v38 }
 0x517   : > { %6724 = vmatprep.subr.msk.bf16.mxu1 %vm1887_vm0, %v9740_v26  ;;  %v10419_v26 = vld [vmem:[#allocation5_spill] sm:$0xff]  ;;  %v6073_v48 = vpop.permute.xlu0 %6072 }
 0x518   : > { %v5916_v50 = vsel %vm1887_vm0, %v10419_v26, 0 }
 0x51a   : > { %6644 = vmatpush3.bf16.xpose.msra.mxu0 %v5910_v46 }
 0x51b   : > { %6725 = vmatprep.subr.msk.bf16.mxu0 %vm1887_vm0, %v9797_v11 }
 0x51e   : > { %6680 = vmatpush3.bf16.xpose.msra.mxu1 %v5910_v46  ;;  %v6063_v18 = vpop.permute.xlu1 %6062 }
 0x51f   : > { %6726 = vmatprep.subr.msk.bf16.mxu1 %vm1887_vm0, %v9797_v11  ;;  %v10420_v11 = vld [vmem:[#allocation27_spill] sm:$0xff] }
 0x520   : > { %v5919_v27 = vsel %vm1887_vm0, %v10420_v11, 0 }
 0x522   : > { %6646 = vmatpush3.bf16.xpose.msra.mxu0 %v5913_v14 }
 0x523   : > { %6727 = vmatprep.subr.msk.bf16.mxu0 %vm1887_vm0, %v9859_v29 }
 0x526   : > { %6681 = vmatpush3.bf16.xpose.msra.mxu1 %v5913_v14  ;;  %v6099_v14 = vld [vmem:[%s10238_s11] sm:$0x3] }
 0x527   : > { %6728 = vmatprep.subr.msk.bf16.mxu1 %vm1887_vm0, %v9859_v29  ;;  %v10421_v29 = vld [vmem:[#allocation29_spill] sm:$0xff] }
 0x528   : > { %v5922_v25 = vsel %vm1887_vm0, %v10421_v29, 0 }
 0x52a   : > { %6648 = vmatpush3.bf16.xpose.msra.mxu0 %v5916_v50 }
 0x52b   : > { %6729 = vmatprep.subr.msk.bf16.mxu0 %vm1887_vm0, %v9910_v28 }
 0x52e   : > { %6682 = vmatpush3.bf16.xpose.msra.mxu1 %v5916_v50 }
 0x52f   : > { %6730 = vmatprep.subr.msk.bf16.mxu1 %vm1887_vm0, %v9910_v28 }
 0x532   : > { %6650 = vmatpush3.bf16.xpose.msra.mxu0 %v5919_v27 }
 0x533   : > { %6731 = vmatprep.subr.msk.bf16.mxu0 %vm1887_vm0, %v10411_v32 }
 0x536   : > { %6683 = vmatpush3.bf16.xpose.msra.mxu1 %v5919_v27 }
 0x537   : > { %6732 = vmatprep.subr.msk.bf16.mxu1 %vm1887_vm0, %v10411_v32  ;;  %v6068_v32 = vpop.permute.xlu1 %6067 }
 0x53a   : > { %6652 = vmatpush3.bf16.xpose.msra.mxu0 %v5922_v25 }
 0x53b   : > { %v6108_v26 = vpop.permute.xlu1 %6107 }
 0x53e   : > { %6684 = vmatpush3.bf16.xpose.msra.mxu1 %v5922_v25 }
 0x541   : > { %6654 = vmatmul.mubr.msk.bf16.vlgmr.msra.gmra.mrb[40].mxu0 %vm1887_vm0, %v6825_v47 }
 0x542   : > { %6145 = vmatprep.mubr.bf16.mxu0 %v10422_v19 }
 0x545   : > { %6656 = vmatmul.mubr.msk.bf16.vlgmr.msra.gmra.mrb[72].mxu1 %vm1887_vm0, %v6826_v60 }
 0x5d8   : > { %v5845_v28 = vpop.f32.mrb[64].mxu1 }
 0x5d9   : > { %v5847_v55 = vpop.f32.mrb[65].mxu1 }
 0x5da   : > { %v5849_v17 = vpop.f32.mrb[66].mxu1 }
 0x5db   : > { %v5851_v42 = vpop.f32.mrb[67].mxu1 }
 0x5dc   : > { %v5989_v7 = vpop.f32.mrb[44].mxu0 }
 0x5dd   : > { %v5991_v53 = vpop.f32.mrb[45].mxu0 }
 0x5de   : > { %v5993_v54 = vpop.f32.mrb[46].mxu0 }
 0x5df   : > { %v5995_v40 = vpop.f32.mrb[47].mxu0 }
 0x5e0   : > { %v5855_v62 = vpop.f32.mrb[68].mxu1 }
 0x5e1   : > { %v6689_v13 = vadd.f32 %v5989_v7, %v5855_v62  ;;  %v5857_v20 = vpop.f32.mrb[69].mxu1 }
 0x5e2   : > { %v6691_v1 = vadd.f32 %v5991_v53, %v5857_v20  ;;  %v5859_v5 = vpop.f32.mrb[70].mxu1 }
 0x5e3   : > { %v6693_v61 = vadd.f32 %v5993_v54, %v5859_v5  ;;  %v5861_v8 = vpop.f32.mrb[71].mxu1 }
 0x5e4   : > { %v6695_v37 = vadd.f32 %v5995_v40, %v5861_v8 }
 0x614   : > { %v6032_v35 = vpop.f32.mrb[40].mxu0 }
 0x615   : > { %v6685_v41 = vadd.f32 %v6032_v35, %v5845_v28  ;;  %v6034_v2 = vpop.f32.mrb[41].mxu0 }
 0x616   : > { %v6686_v22 = vadd.f32 %v6034_v2, %v5847_v55  ;;  %v6036_v39 = vpop.f32.mrb[42].mxu0 }
 0x617   : > { %v6075_v30 = vadd.f32 %v6685_v41, %v6058_v52  ;;  %v6687_v16 = vadd.f32 %v6036_v39, %v5849_v17  ;;  %v6038_v59 = vpop.f32.mrb[43].mxu0 }
 0x618   : > { %v6076_v3 = vadd.f32 %v6686_v22, %v6058_v52  ;;  %v6688_v57 = vadd.f32 %v6038_v59, %v5851_v42  ;;  %v6042_v9 = vpop.f32.mrb[72].mxu1 }
 0x619   : > { %v6083_v33 = vmax.f32 %v6075_v30, 0.0  ;;  %v6077_v24 = vadd.f32 %v6687_v16, %v6063_v18  ;;  %v6690_v45 = vadd.f32 %v6689_v13, %v6042_v9  ;;  %v6044_v44 = vpop.f32.mrb[73].mxu1 }
 0x61a   : > { %v6084_v31 = vmax.f32 %v6076_v3, 0.0  ;;  %v6078_v6 = vadd.f32 %v6688_v57, %v6063_v18  ;;  %v6692_v58 = vadd.f32 %v6691_v1, %v6044_v44  ;;  %v6046_v43 = vpop.f32.mrb[74].mxu1 }
 0x61b   : > { %6091 = vst [vmem:[%s10206_s16] sm:$0xff] %v6083_v33  ;;  %v6085_v34 = vmax.f32 %v6077_v24, 0.0  ;;  %v6079_v4 = vadd.f32 %v6690_v45, %v6068_v32  ;;  %v6694_v10 = vadd.f32 %v6693_v61, %v6046_v43  ;;  %v6048_v51 = vpop.f32.mrb[75].mxu1 }
 0x61c   : > { %6092 = vst [vmem:[%s10206_s16 + $0x8] sm:$0xff] %v6084_v31  ;;  %v6086_v63 = vmax.f32 %v6078_v6, 0.0  ;;  %v6080_v49 = vadd.f32 %v6692_v58, %v6068_v32  ;;  %v6696_v21 = vadd.f32 %v6695_v37, %v6048_v51 }
 0x61d   : > { %6093 = vst [vmem:[%s10206_s16 + $0x10] sm:$0xff] %v6085_v34  ;;  %v6100_v36 = vpack.c.bf16 %v6085_v34, %v6083_v33  ;;  %v6087_v47 = vmax.f32 %v6079_v4, 0.0  ;;  %v6081_v12 = vadd.f32 %v6694_v10, %v6073_v48 }
 0x61e   : > { %6094 = vst [vmem:[%s10206_s16 + $0x18] sm:$0xff] %v6086_v63  ;;  %v6088_v23 = vmax.f32 %v6080_v49, 0.0  ;;  %v6082_v60 = vadd.f32 %v6696_v21, %v6073_v48  ;;  %v6101_v56 = vpack.c.bf16 %v6086_v63, %v6084_v31 }
 0x61f   : > { %6095 = vst [vmem:[%s10206_s16 + $0x20] sm:$0xff] %v6087_v47  ;;  %v6089_v38 = vmax.f32 %v6081_v12, 0.0 }
 0x620   : > { %6096 = vst [vmem:[%s10206_s16 + $0x28] sm:$0xff] %v6088_v23  ;;  %v6090_v0 = vmax.f32 %v6082_v60, 0.0  ;;  %6113 = vmatprep.subr.bf16.mxu0 %v6101_v56 }
 0x621   : > { %6097 = vst [vmem:[%s10206_s16 + $0x30] sm:$0xff] %v6089_v38  ;;  %v6102_v46 = vpack.c.bf16 %v6089_v38, %v6087_v47  ;;  %6114 = vmatpush1.bf16.msra.mxu0 %v6100_v36 }
 0x622   : > { %6098 = vst [vmem:[%s10206_s16 + $0x38] sm:$0xff] %v6090_v0  ;;  %v6103_v15 = vpack.c.bf16 %v6090_v0, %v6088_v23 }
 0x624   : > { %6115 = vmatprep.subr.bf16.mxu0 %v6103_v15 }
 0x625   : > { %6116 = vmatpush1.bf16.msra.mxu0 %v6102_v46 }
 0x628   : > { %6514 = vmatmul.mubr.msk.bf16.vlgmr.msra.gmra.mrb[48].mxu0 %vm1887_vm0, %v6099_v14 }
 0x6fb   : > { %v6147_v50 = vpop.f32.mrb[48].mxu0 }
 0x6fc   : > { %v6148_v11 = vadd.f32 %v6147_v50, %v6108_v26  ;;  %v6149_v27 = vpop.f32.mrb[49].mxu0 }
 0x6fd   : > { %v6150_v29 = vadd.f32 %v6149_v27, %v6108_v26  ;;  %v6151_v25 = vpop.f32.mrb[50].mxu0 }
 0x6fe   : > { %v6515_v19 = vmul.f32 -1.442695, %v6148_v11  ;;  %v6152_v28 = vpop.f32.mrb[51].mxu0 }
 0x6ff   : > { %v6516_v55 = vmul.f32 -1.442695, %v6150_v29 }
 0x700   : > { %6827 = vpow2.f32 %v6515_v19 }
 0x701   : > { %6829 = vpow2.f32 %v6516_v55 }
 0x70a   : > { %v6828_v17 = vpop.eup %6827 }
 0x70b   : > { %v6830_v42 = vpop.eup %6829  ;;  %v6160_v7 = vadd.f32 1.0, %v6828_v17 }
 0x70c   : > { %v6161_v53 = vadd.f32 1.0, %v6830_v42 }
 0x70d   : > { %6831 = vrcp.f32 %v6160_v7 }
 0x70e   : > { %6833 = vrcp.f32 %v6161_v53 }
 0x717   : > { %v6832_v54 = vpop.eup %6831 }
 0x718   : > { %v6834_v40 = vpop.eup %6833 }
 0x719   : > { %v6168_v62 = vcombine.low %v6832_v54, %v6834_v40 }
 0x71b   : > { %6170 = vst [vmem:[%s500_s25] sm:$0x77] %v6168_v62 }
 0x71c PF: > { %s25_s29 = sadd.s32 1, %s6842_s29  }
 0x71d   : > { %p22_p4 = scmp.ge.s32.totalorder %s25_s29, 4  }
 0x71f   :  { %24 = sbr.rel (!%p22_p4) target bundleno = 1 (0x1), region = 117 }

</bundles_post_ra>
